<compile_context>
chip_gen: v7x
topology: tpu7x:2x2x1
jax: 0.10.0
libtpu: 0.0.40
codegen_flags: <defaults>
</compile_context>

<pallas_src>
import functools
import math

import jax
import jax.numpy as jnp
from jax import lax
from jax.experimental import pallas as pl
from jax.experimental.pallas import tpu as pltpu
import numpy as np


def _sigmoid(v):
    return 1.0 / (1.0 + jnp.exp(-v))


def _softplus(v):
    # PyTorch softplus with threshold=20
    return jnp.where(v > 20.0, v, jnp.log(1.0 + jnp.exp(v)))


def _mamba_layer_kernel(
    x_ref, gamma_ref, beta_ref, win_ref, convw_ref, convb_ref, wx_ref,
    wdt_ref, bdt_ref, anegT_ref, dpar_ref, wout_ref,
    o_ref,
    delta_ref, xc_ref, zy_ref, bc_ref, state_ref,
    *, L, C, d_inner, d_state, d_conv, dt_rank, eps, chunk,
):
    x = x_ref[0].astype(jnp.float32)                          # (L, C)

    # ---------------- LayerNorm over channels ----------------
    mean = jnp.mean(x, axis=-1, keepdims=True)
    var = jnp.mean(jnp.square(x - mean), axis=-1, keepdims=True)
    xn = (x - mean) * lax.rsqrt(var + eps)
    xn = xn * gamma_ref[...] + beta_ref[...]

    # ---------------- in_proj (single bf16 MXU matmul): [x | z] ----------------
    xz = jnp.dot(xn.astype(jnp.bfloat16), win_ref[...],
                 preferred_element_type=jnp.float32)          # (L, 2*d_inner)
    xm = xz[:, :d_inner]
    zy_ref[...] = xz[:, d_inner:]                             # stash gate z (rewritten w/ gated y later)

    # ---------------- depthwise causal conv1d + SiLU ----------------
    convw = convw_ref[...]                                    # (d_conv, d_inner)
    xpad = jnp.concatenate(
        [jnp.zeros((d_conv - 1, d_inner), jnp.float32), xm], axis=0)
    conv = jnp.zeros((L, d_inner), jnp.float32)
    for k in range(d_conv):                                   # d_conv taps, static
        conv = conv + xpad[k:k + L, :] * convw[k:k + 1, :]
    conv = conv + convb_ref[...]
    xc = conv * _sigmoid(conv)                                # SiLU
    xc_ref[...] = xc

    # ---------------- x_proj (bf16 MXU): [dt | B | C] ----------------
    dbc = jnp.dot(xc.astype(jnp.bfloat16), wx_ref[...],
                  preferred_element_type=jnp.float32)         # (L, dt_rank + 2*d_state)
    dt = dbc[:, :dt_rank]
    bc_ref[...] = dbc[:, dt_rank:]                            # (L, 2*d_state) = [B | C]

    # ---------------- dt_proj + softplus (kept f32 for exp(delta*A) accuracy) ---
    if dt_rank == 1:
        delta_pre = dt * wdt_ref[...]                         # (L,1)*(1,d_inner)
    else:
        delta_pre = jnp.dot(dt, wdt_ref[...], preferred_element_type=jnp.float32)
    delta_ref[...] = _softplus(delta_pre + bdt_ref[...])      # (L, d_inner)

    # ---------------- chunked selective scan ----------------
    # Running state (d_state, d_inner): d_inner on lanes (lane-dense for real
    # sizes), d_state on sublanes.  One dense state load/store per chunk.
    state_ref[...] = jnp.zeros_like(state_ref)
    n_chunks = L // chunk
    two_ds = 2 * d_state

    @pl.loop(0, n_chunks)
    def _scan_chunk(ci):
        base = pl.multiple_of(ci * chunk, chunk)
        a_T = anegT_ref[...]                                  # (d_state, d_inner) = (-exp(A_log)).T
        d_par = dpar_ref[...]                                 # (1, d_inner)

        delta_c = delta_ref[pl.ds(base, chunk), :]            # (chunk, d_inner)
        u_c = xc_ref[pl.ds(base, chunk), :]                   # (chunk, d_inner)
        z_c = zy_ref[pl.ds(base, chunk), :]                   # (chunk, d_inner)  gate rows
        bc_c = bc_ref[pl.ds(base, chunk), :]                  # (chunk, 2*d_state)
        w_c = delta_c * u_c                                   # delta * u

        # Identity mask used to move each token's (B_t, C_t) row from lanes to
        # sublanes via a masked lane reduction (tiny, recomputed per chunk).
        rid = lax.broadcasted_iota(jnp.int32, (two_ds, two_ds), 0)
        cid = lax.broadcasted_iota(jnp.int32, (two_ds, two_ds), 1)
        eye = (rid == cid).astype(jnp.float32)                # (2*d_state, 2*d_state)

        s = state_ref[...]                                    # (d_state, d_inner)
        rows = []
        for j in range(chunk):                                # short static unroll
            bc_t = bc_c[j:j + 1, :]                           # (1, 2*d_state)
            cols = jnp.sum(bc_t * eye, axis=1, keepdims=True)  # (2*d_state, 1)
            b_col = cols[:d_state, :]                         # B_t on sublanes
            c_col = cols[d_state:, :]                         # C_t on sublanes
            dA = jnp.exp(a_T * delta_c[j:j + 1, :])           # (d_state, d_inner)
            s = dA * s + b_col * w_c[j:j + 1, :]              # dBu_t = B_t (outer) delta_t*u_t
            rows.append(jnp.sum(c_col * s, axis=0, keepdims=True))  # y_t: (1, d_inner)
        state_ref[...] = s

        y_c = jnp.concatenate(rows, axis=0)                   # (chunk, d_inner)
        gated = (y_c + u_c * d_par) * (z_c * _sigmoid(z_c))   # D skip + SiLU gate
        zy_ref[pl.ds(base, chunk), :] = gated                 # dense aligned store

    # ---------------- out_proj (bf16 MXU) ----------------
    out = jnp.dot(zy_ref[...].astype(jnp.bfloat16), wout_ref[...],
                  preferred_element_type=jnp.float32)         # (L, C)
    o_ref[0] = out.astype(o_ref.dtype)


def mamba_layer(x, params, *, d_state=16, d_conv=4, expand=2, eps=1e-5, chunk=8):
    """x: (B, C, H, W) float32 (NCHW, like the PyTorch module). Returns same shape."""
    B, C, H, W = x.shape
    L = H * W
    d_inner = expand * C
    dt_rank = math.ceil(C / 16)
    if L % chunk != 0:
        chunk = 1                                             # fallback for odd token counts

    x_tok = jnp.transpose(jnp.reshape(x, (B, C, L)), (0, 2, 1)).astype(jnp.float32)

    # -------- parameter prep (plain-JAX glue): fuse/ cast weights for the MXU --------
    bf16 = jnp.bfloat16
    w_in = jnp.concatenate([params["win_x"], params["win_z"]], axis=1).astype(bf16)
    wx_all = jnp.concatenate([params["wx_dt"], params["wx_B"], params["wx_C"]],
                             axis=1).astype(bf16)
    wout = params["wout"].astype(bf16)
    a_negT = jnp.transpose(-jnp.exp(params["A_log"]))         # (d_state, d_inner)

    kernel = functools.partial(
        _mamba_layer_kernel, L=L, C=C, d_inner=d_inner, d_state=d_state,
        d_conv=d_conv, dt_rank=dt_rank, eps=eps, chunk=chunk)

    def full(a):
        return pl.BlockSpec(a.shape, lambda b, _n=a.ndim: (0,) * _n)

    # -------- explicit VMEM budget: scratch + double-buffered I/O + weights --------
    def _pad(r, c):
        return (-(-r // 8) * 8) * (-(-c // 128) * 128)

    f32b = 4
    scratch_bytes = f32b * (3 * _pad(L, d_inner) + _pad(L, 2 * d_state)
                            + _pad(d_state, d_inner))
    io_bytes = 2 * 2 * _pad(L, C) * f32b                      # in + out blocks, double buffered
    w_list = (w_in, wx_all, wout, params["conv_w"], params["conv_b"],
              params["wdt"], params["bdt"], a_negT, params["D"],
              params["gamma"], params["beta"])
    w_bytes = 2 * sum(int(np.prod(a.shape)) * a.dtype.itemsize for a in w_list)
    vmem_limit = int(min(100 * 1024 * 1024,
                         max(32 * 1024 * 1024,
                             2 * (scratch_bytes + io_bytes + w_bytes))))

    cost = pl.CostEstimate(
        flops=int(B * (2 * L * C * 2 * d_inner                # in_proj
                       + 2 * L * d_inner * d_conv             # depthwise conv
                       + 2 * L * d_inner * (dt_rank + 2 * d_state)  # x_proj
                       + 2 * L * dt_rank * d_inner            # dt_proj
                       + 8 * L * d_state * d_inner            # selective scan
                       + 2 * L * d_inner * C)),               # out_proj
        transcendentals=int(B * L * d_inner * (d_state + 4)),
        bytes_accessed=int(B * 2 * L * C * 4 + w_bytes),
    )

    out = pl.pallas_call(
        kernel,
        out_shape=jax.ShapeDtypeStruct((B, L, C), jnp.float32),
        grid=(B,),
        in_specs=[
            pl.BlockSpec((1, L, C), lambda b: (b, 0, 0)),
            full(params["gamma"]), full(params["beta"]),
            full(w_in), full(params["conv_w"]), full(params["conv_b"]),
            full(wx_all), full(params["wdt"]), full(params["bdt"]),
            full(a_negT), full(params["D"]), full(wout),
        ],
        out_specs=pl.BlockSpec((1, L, C), lambda b: (b, 0, 0)),
        scratch_shapes=[
            pltpu.VMEM((L, d_inner), jnp.float32),            # delta
            pltpu.VMEM((L, d_inner), jnp.float32),            # conv+SiLU activations (u)
            pltpu.VMEM((L, d_inner), jnp.float32),            # gate z, reused for gated y
            pltpu.VMEM((L, 2 * d_state), jnp.float32),        # [B | C] from x_proj
            pltpu.VMEM((d_state, d_inner), jnp.float32),      # running scan state
        ],
        compiler_params=pltpu.CompilerParams(
            dimension_semantics=("parallel",),                # shard batch over cores (v7x)
            vmem_limit_bytes=vmem_limit),
        cost_estimate=cost,
    )(x_tok, params["gamma"], params["beta"], w_in, params["conv_w"],
      params["conv_b"], wx_all, params["wdt"], params["bdt"], a_negT,
      params["D"], wout)

    return jnp.reshape(jnp.transpose(out, (0, 2, 1)), (B, C, H, W))


def init_params(key, dim, d_state=16, d_conv=4, expand=2):
    """Deterministic synthetic parameters matching the MambaLayer/Mamba shapes."""
    d_inner = expand * dim
    dt_rank = math.ceil(dim / 16)
    ks = jax.random.split(key, 10)

    def rnd(k, shape, scale=0.5):
        return jax.random.normal(k, shape, jnp.float32) * scale

    return dict(
        gamma=jnp.ones((1, dim), jnp.float32),                    # LayerNorm weight
        beta=jnp.zeros((1, dim), jnp.float32),                    # LayerNorm bias
        win_x=rnd(ks[0], (dim, d_inner)),                         # in_proj (x half), transposed
        win_z=rnd(ks[1], (dim, d_inner)),                         # in_proj (z half), transposed
        conv_w=rnd(ks[2], (d_conv, d_inner)),                     # depthwise conv kernel (tap, ch)
        conv_b=rnd(ks[3], (1, d_inner), 0.1),                     # conv bias
        wx_dt=rnd(ks[4], (d_inner, dt_rank)),                     # x_proj dt part, transposed
        wx_B=rnd(ks[5], (d_inner, d_state)),                      # x_proj B part, transposed
        wx_C=rnd(ks[6], (d_inner, d_state)),                      # x_proj C part, transposed
        wdt=rnd(ks[7], (dt_rank, d_inner)),                       # dt_proj weight, transposed
        bdt=jax.random.uniform(ks[8], (1, d_inner), jnp.float32, minval=-4.0, maxval=-2.0),
        A_log=jnp.log(jnp.broadcast_to(
            jnp.arange(1, d_state + 1, dtype=jnp.float32), (d_inner, d_state))),
        D=jnp.ones((1, d_inner), jnp.float32),
        wout=rnd(ks[9], (d_inner, dim)),                          # out_proj weight, transposed
    )


def reference_forward(x, p, *, d_state=16, d_conv=4, expand=2, eps=1e-5,
                      matmul_dtype=jnp.float32):
    """Pure-JAX mirror of MambaLayer.forward (LayerNorm + Mamba reference path).

    matmul_dtype=float32   -> PyTorch (f32) semantics.
    matmul_dtype=bfloat16  -> same matmul precision as the Pallas kernel.
    """
    B, C, H, W = x.shape
    L = H * W
    d_inner = expand * C

    def mm(a, w):
        return jnp.dot(a.astype(matmul_dtype), w.astype(matmul_dtype),
                       preferred_element_type=jnp.float32)

    xt = jnp.transpose(jnp.reshape(x, (B, C, L)), (0, 2, 1)).astype(jnp.float32)
    mean = jnp.mean(xt, -1, keepdims=True)
    var = jnp.mean((xt - mean) ** 2, -1, keepdims=True)
    xn = (xt - mean) / jnp.sqrt(var + eps) * p["gamma"] + p["beta"]
    xm = mm(xn, p["win_x"])
    z = mm(xn, p["win_z"])
    xpad = jnp.pad(xm, ((0, 0), (d_conv - 1, 0), (0, 0)))
    conv = sum(xpad[:, k:k + L, :] * p["conv_w"][k] for k in range(d_conv)) + p["conv_b"]
    xc = conv * jax.nn.sigmoid(conv)
    dt = mm(xc, p["wx_dt"])
    Bm = mm(xc, p["wx_B"])
    Cm = mm(xc, p["wx_C"])
    if p["wdt"].shape[0] == 1:
        delta_pre = dt * p["wdt"]                              # rank-1 dt_proj, exact f32
    else:
        delta_pre = jnp.dot(dt, p["wdt"], preferred_element_type=jnp.float32)
    delta = _softplus(delta_pre + p["bdt"])
    A = -jnp.exp(p["A_log"])                                   # (d_inner, d_state)
    # f32 elementwise (no einsum) to keep the scan arithmetic exact.
    dA = jnp.exp(delta[:, :, :, None] * A[None, None, :, :])   # (B, L, d_inner, d_state)
    dBu = delta[:, :, :, None] * Bm[:, :, None, :] * xc[:, :, :, None]

    def step(s, inp):
        dA_t, dBu_t, C_t = inp
        s = dA_t * s + dBu_t
        y = jnp.sum(s * C_t[:, None, :], axis=-1)              # (B, d_inner)
        return s, y

    s0 = jnp.zeros((B, d_inner, d_state), jnp.float32)
    _, ys = lax.scan(step, s0, (jnp.swapaxes(dA, 0, 1), jnp.swapaxes(dBu, 0, 1),
                                jnp.swapaxes(Cm, 0, 1)))
    y = jnp.swapaxes(ys, 0, 1)                                 # (B, L, d_inner)
    y = y + xc * p["D"]
    y = y * z * jax.nn.sigmoid(z)
    out = mm(y, p["wout"])                                     # (B, L, C)
    return jnp.reshape(jnp.transpose(out, (0, 2, 1)), (B, C, H, W))


if __name__ == "__main__":
    key = jax.random.PRNGKey(0)
    k_x, k_p = jax.random.split(key)
    B, C, H, W = 2, 4, 16, 16                                  # dim=4 -> d_inner=8, dt_rank=1
    x = jax.random.normal(k_x, (B, C, H, W), jnp.float32)
    params = init_params(k_p, C)

    out = jax.block_until_ready(mamba_layer(x, params))
    assert out.shape == (B, C, H, W)

    # (1) tight check against a reference using the same bf16 matmul precision
    ref_bf16 = jax.block_until_ready(
        reference_forward(x, params, matmul_dtype=jnp.bfloat16))
    np.testing.assert_allclose(np.asarray(out), np.asarray(ref_bf16),
                               rtol=5e-3, atol=5e-3)

    # (2) PyTorch-semantics (f32 matmul) reference; looser tolerance for bf16 MXU rounding
    ref_f32 = jax.block_until_ready(reference_forward(x, params))
    np.testing.assert_allclose(np.asarray(out), np.asarray(ref_f32),
                               rtol=5e-2, atol=5e-2)

    print("KERNEL_OK")
</pallas_src>

<mosaic_0001>
module attributes {stable_mosaic.version = 11 : i64} {
  func.func @_mamba_layer_kernel(%arg0: i32, %arg1: memref<1x256x4xf32, #tpu.memory_space<vmem>>, %arg2: memref<1x4xf32, #tpu.memory_space<vmem>>, %arg3: memref<1x4xf32, #tpu.memory_space<vmem>>, %arg4: memref<4x16xbf16, #tpu.memory_space<vmem>>, %arg5: memref<4x8xf32, #tpu.memory_space<vmem>>, %arg6: memref<1x8xf32, #tpu.memory_space<vmem>>, %arg7: memref<8x33xbf16, #tpu.memory_space<vmem>>, %arg8: memref<1x8xf32, #tpu.memory_space<vmem>>, %arg9: memref<1x8xf32, #tpu.memory_space<vmem>>, %arg10: memref<16x8xf32, #tpu.memory_space<vmem>>, %arg11: memref<1x8xf32, #tpu.memory_space<vmem>>, %arg12: memref<8x4xbf16, #tpu.memory_space<vmem>>, %arg13: memref<1x256x4xf32, #tpu.memory_space<vmem>>, %arg14: memref<256x8xf32, #tpu.memory_space<vmem>>, %arg15: memref<256x8xf32, #tpu.memory_space<vmem>>, %arg16: memref<256x8xf32, #tpu.memory_space<vmem>>, %arg17: memref<256x32xf32, #tpu.memory_space<vmem>>, %arg18: memref<16x8xf32, #tpu.memory_space<vmem>>) attributes {dimension_semantics = [#tpu.dimension_semantics<parallel>], iteration_bounds = array<i64: 2>, scalar_prefetch = 0 : i64, scratch_operands = 5 : i64, tpu.core_type = #tpu.core_type<tc>, window_params = [{transform_indices = @transform_0, window_bounds = array<i64: 1, 256, 4>}, {pipeline_mode = #tpu.pipeline_mode<synchronous>, transform_indices = @transform_1, window_bounds = array<i64: 1, 4>}, {pipeline_mode = #tpu.pipeline_mode<synchronous>, transform_indices = @transform_2, window_bounds = array<i64: 1, 4>}, {pipeline_mode = #tpu.pipeline_mode<synchronous>, transform_indices = @transform_3, window_bounds = array<i64: 4, 16>}, {pipeline_mode = #tpu.pipeline_mode<synchronous>, transform_indices = @transform_4, window_bounds = array<i64: 4, 8>}, {pipeline_mode = #tpu.pipeline_mode<synchronous>, transform_indices = @transform_5, window_bounds = array<i64: 1, 8>}, {pipeline_mode = #tpu.pipeline_mode<synchronous>, transform_indices = @transform_6, window_bounds = array<i64: 8, 33>}, {pipeline_mode = #tpu.pipeline_mode<synchronous>, transform_indices = @transform_7, window_bounds = array<i64: 1, 8>}, {pipeline_mode = #tpu.pipeline_mode<synchronous>, transform_indices = @transform_8, window_bounds = array<i64: 1, 8>}, {pipeline_mode = #tpu.pipeline_mode<synchronous>, transform_indices = @transform_9, window_bounds = array<i64: 16, 8>}, {pipeline_mode = #tpu.pipeline_mode<synchronous>, transform_indices = @transform_10, window_bounds = array<i64: 1, 8>}, {pipeline_mode = #tpu.pipeline_mode<synchronous>, transform_indices = @transform_11, window_bounds = array<i64: 8, 4>}, {transform_indices = @transform_12, window_bounds = array<i64: 1, 256, 4>}]} {
    %c0 = arith.constant 0 : index
    %c0_0 = arith.constant 0 : index
    %c0_1 = arith.constant 0 : index
    %0 = vector.load %arg1[%c0, %c0_0, %c0_1] : memref<1x256x4xf32, #tpu.memory_space<vmem>>, vector<1x256x4xf32>
    %1 = vector.shape_cast %0 : vector<1x256x4xf32> to vector<256x4xf32>
    %cst = arith.constant dense<0.000000e+00> : vector<256xf32>
    %2 = vector.multi_reduction <add>, %1, %cst [1] : vector<256x4xf32> to vector<256xf32>
    %3 = vector.shape_cast %2 : vector<256xf32> to vector<256x1xf32>
    %cst_2 = arith.constant 4.000000e+00 : f32
    %4 = vector.broadcast %cst_2 : f32 to vector<256x1xf32>
    %5 = arith.divf %3, %4 : vector<256x1xf32>
    %6 = vector.broadcast %5 : vector<256x1xf32> to vector<256x4xf32>
    %7 = arith.subf %1, %6 : vector<256x4xf32>
    %8 = arith.mulf %7, %7 : vector<256x4xf32>
    %cst_3 = arith.constant dense<0.000000e+00> : vector<256xf32>
    %9 = vector.multi_reduction <add>, %8, %cst_3 [1] : vector<256x4xf32> to vector<256xf32>
    %10 = vector.shape_cast %9 : vector<256xf32> to vector<256x1xf32>
    %cst_4 = arith.constant 4.000000e+00 : f32
    %11 = vector.broadcast %cst_4 : f32 to vector<256x1xf32>
    %12 = arith.divf %10, %11 : vector<256x1xf32>
    %13 = vector.broadcast %5 : vector<256x1xf32> to vector<256x4xf32>
    %14 = arith.subf %1, %13 : vector<256x4xf32>
    %cst_5 = arith.constant 9.99999974E-6 : f32
    %15 = vector.broadcast %cst_5 : f32 to vector<256x1xf32>
    %16 = arith.addf %12, %15 : vector<256x1xf32>
    %17 = math.rsqrt %16 : vector<256x1xf32>
    %18 = vector.broadcast %17 : vector<256x1xf32> to vector<256x4xf32>
    %19 = arith.mulf %14, %18 : vector<256x4xf32>
    %c0_6 = arith.constant 0 : index
    %c0_7 = arith.constant 0 : index
    %20 = vector.load %arg2[%c0_6, %c0_7] : memref<1x4xf32, #tpu.memory_space<vmem>>, vector<1x4xf32>
    %21 = vector.broadcast %20 : vector<1x4xf32> to vector<256x4xf32>
    %22 = arith.mulf %19, %21 : vector<256x4xf32>
    %c0_8 = arith.constant 0 : index
    %c0_9 = arith.constant 0 : index
    %23 = vector.load %arg3[%c0_8, %c0_9] : memref<1x4xf32, #tpu.memory_space<vmem>>, vector<1x4xf32>
    %24 = vector.broadcast %23 : vector<1x4xf32> to vector<256x4xf32>
    %25 = arith.addf %22, %24 : vector<256x4xf32>
    %26 = arith.truncf %25 : vector<256x4xf32> to vector<256x4xbf16>
    %c0_10 = arith.constant 0 : index
    %c0_11 = arith.constant 0 : index
    %27 = vector.load %arg4[%c0_10, %c0_11] : memref<4x16xbf16, #tpu.memory_space<vmem>>, vector<4x16xbf16>
    %cst_12 = arith.constant dense<0.000000e+00> : vector<256x16xf32>
    %28 = tpu.matmul %26, %27, %cst_12 {dimension_numbers = #tpu.dot_dimension_numbers<[1], [0], [0], [1], [0, 0, 1, 1], [], []>} : vector<256x4xbf16>, vector<4x16xbf16>, vector<256x16xf32> -> vector<256x16xf32>
    %29 = vector.extract_strided_slice %28 {offsets = [0, 0], sizes = [256, 8], strides = [1, 1]} : vector<256x16xf32> to vector<256x8xf32>
    %30 = vector.extract_strided_slice %28 {offsets = [0, 8], sizes = [256, 8], strides = [1, 1]} : vector<256x16xf32> to vector<256x8xf32>
    %c0_13 = arith.constant 0 : index
    %c0_14 = arith.constant 0 : index
    %31 = vector.load %arg16[%c0_13, %c0_14] : memref<256x8xf32, #tpu.memory_space<vmem>>, vector<256x8xf32>
    tpu.vector_store %arg16[%c0_13, %c0_14], %30 {strides = array<i32>} : memref<256x8xf32, #tpu.memory_space<vmem>>, vector<256x8xf32>,
    %c0_15 = arith.constant 0 : index
    %c0_16 = arith.constant 0 : index
    %32 = vector.load %arg5[%c0_15, %c0_16] : memref<4x8xf32, #tpu.memory_space<vmem>>, vector<4x8xf32>
    %cst_17 = arith.constant 0.000000e+00 : f32
    %33 = vector.broadcast %cst_17 : f32 to vector<3x8xf32>
    %34 = tpu.concatenate %33, %29 in 0 : vector<3x8xf32>, vector<256x8xf32> -> vector<259x8xf32>
    %cst_18 = arith.constant 0.000000e+00 : f32
    %35 = vector.broadcast %cst_18 : f32 to vector<256x8xf32>
    %36 = vector.extract_strided_slice %34 {offsets = [0, 0], sizes = [256, 8], strides = [1, 1]} : vector<259x8xf32> to vector<256x8xf32>
    %37 = vector.extract_strided_slice %32 {offsets = [0, 0], sizes = [1, 8], strides = [1, 1]} : vector<4x8xf32> to vector<1x8xf32>
    %38 = vector.broadcast %37 : vector<1x8xf32> to vector<256x8xf32>
    %39 = arith.mulf %36, %38 : vector<256x8xf32>
    %40 = arith.addf %35, %39 : vector<256x8xf32>
    %41 = vector.extract_strided_slice %34 {offsets = [1, 0], sizes = [256, 8], strides = [1, 1]} : vector<259x8xf32> to vector<256x8xf32>
    %42 = vector.extract_strided_slice %32 {offsets = [1, 0], sizes = [1, 8], strides = [1, 1]} : vector<4x8xf32> to vector<1x8xf32>
    %43 = vector.broadcast %42 : vector<1x8xf32> to vector<256x8xf32>
    %44 = arith.mulf %41, %43 : vector<256x8xf32>
    %45 = arith.addf %40, %44 : vector<256x8xf32>
    %46 = vector.extract_strided_slice %34 {offsets = [2, 0], sizes = [256, 8], strides = [1, 1]} : vector<259x8xf32> to vector<256x8xf32>
    %47 = vector.extract_strided_slice %32 {offsets = [2, 0], sizes = [1, 8], strides = [1, 1]} : vector<4x8xf32> to vector<1x8xf32>
    %48 = vector.broadcast %47 : vector<1x8xf32> to vector<256x8xf32>
    %49 = arith.mulf %46, %48 : vector<256x8xf32>
    %50 = arith.addf %45, %49 : vector<256x8xf32>
    %51 = vector.extract_strided_slice %34 {offsets = [3, 0], sizes = [256, 8], strides = [1, 1]} : vector<259x8xf32> to vector<256x8xf32>
    %52 = vector.extract_strided_slice %32 {offsets = [3, 0], sizes = [1, 8], strides = [1, 1]} : vector<4x8xf32> to vector<1x8xf32>
    %53 = vector.broadcast %52 : vector<1x8xf32> to vector<256x8xf32>
    %54 = arith.mulf %51, %53 : vector<256x8xf32>
    %55 = arith.addf %50, %54 : vector<256x8xf32>
    %c0_19 = arith.constant 0 : index
    %c0_20 = arith.constant 0 : index
    %56 = vector.load %arg6[%c0_19, %c0_20] : memref<1x8xf32, #tpu.memory_space<vmem>>, vector<1x8xf32>
    %57 = vector.broadcast %56 : vector<1x8xf32> to vector<256x8xf32>
    %58 = arith.addf %55, %57 : vector<256x8xf32>
    %cst_21 = arith.constant 0.000000e+00 : f32
    %59 = vector.broadcast %cst_21 : f32 to vector<256x8xf32>
    %60 = arith.subf %59, %58 : vector<256x8xf32>
    %61 = math.exp %60 : vector<256x8xf32>
    %cst_22 = arith.constant 1.000000e+00 : f32
    %62 = vector.broadcast %cst_22 : f32 to vector<256x8xf32>
    %63 = arith.addf %62, %61 : vector<256x8xf32>
    %cst_23 = arith.constant 1.000000e+00 : f32
    %64 = vector.broadcast %cst_23 : f32 to vector<256x8xf32>
    %65 = arith.divf %64, %63 : vector<256x8xf32>
    %66 = arith.mulf %58, %65 : vector<256x8xf32>
    %c0_24 = arith.constant 0 : index
    %c0_25 = arith.constant 0 : index
    %67 = vector.load %arg15[%c0_24, %c0_25] : memref<256x8xf32, #tpu.memory_space<vmem>>, vector<256x8xf32>
    tpu.vector_store %arg15[%c0_24, %c0_25], %66 {strides = array<i32>} : memref<256x8xf32, #tpu.memory_space<vmem>>, vector<256x8xf32>,
    %68 = arith.truncf %66 : vector<256x8xf32> to vector<256x8xbf16>
    %c0_26 = arith.constant 0 : index
    %c0_27 = arith.constant 0 : index
    %69 = vector.load %arg7[%c0_26, %c0_27] : memref<8x33xbf16, #tpu.memory_space<vmem>>, vector<8x33xbf16>
    %cst_28 = arith.constant dense<0.000000e+00> : vector<256x33xf32>
    %70 = tpu.matmul %68, %69, %cst_28 {dimension_numbers = #tpu.dot_dimension_numbers<[1], [0], [0], [1], [0, 0, 1, 1], [], []>} : vector<256x8xbf16>, vector<8x33xbf16>, vector<256x33xf32> -> vector<256x33xf32>
    %71 = vector.extract_strided_slice %70 {offsets = [0, 0], sizes = [256, 1], strides = [1, 1]} : vector<256x33xf32> to vector<256x1xf32>
    %72 = vector.extract_strided_slice %70 {offsets = [0, 1], sizes = [256, 32], strides = [1, 1]} : vector<256x33xf32> to vector<256x32xf32>
    %c0_29 = arith.constant 0 : index
    %c0_30 = arith.constant 0 : index
    %73 = vector.load %arg17[%c0_29, %c0_30] : memref<256x32xf32, #tpu.memory_space<vmem>>, vector<256x32xf32>
    tpu.vector_store %arg17[%c0_29, %c0_30], %72 {strides = array<i32>} : memref<256x32xf32, #tpu.memory_space<vmem>>, vector<256x32xf32>,
    %c0_31 = arith.constant 0 : index
    %c0_32 = arith.constant 0 : index
    %74 = vector.load %arg8[%c0_31, %c0_32] : memref<1x8xf32, #tpu.memory_space<vmem>>, vector<1x8xf32>
    %75 = vector.broadcast %71 : vector<256x1xf32> to vector<256x8xf32>
    %76 = vector.broadcast %74 : vector<1x8xf32> to vector<256x8xf32>
    %77 = arith.mulf %75, %76 : vector<256x8xf32>
    %c0_33 = arith.constant 0 : index
    %c0_34 = arith.constant 0 : index
    %78 = vector.load %arg9[%c0_33, %c0_34] : memref<1x8xf32, #tpu.memory_space<vmem>>, vector<1x8xf32>
    %79 = vector.broadcast %78 : vector<1x8xf32> to vector<256x8xf32>
    %80 = arith.addf %77, %79 : vector<256x8xf32>
    %cst_35 = arith.constant 2.000000e+01 : f32
    %81 = vector.broadcast %cst_35 : f32 to vector<256x8xf32>
    %82 = arith.cmpf ogt, %80, %81 : vector<256x8xf32>
    %83 = math.exp %80 : vector<256x8xf32>
    %cst_36 = arith.constant 1.000000e+00 : f32
    %84 = vector.broadcast %cst_36 : f32 to vector<256x8xf32>
    %85 = arith.addf %84, %83 : vector<256x8xf32>
    %86 = math.log %85 : vector<256x8xf32>
    %87 = arith.select %82, %80, %86 : vector<256x8xi1>, vector<256x8xf32>
    %c0_37 = arith.constant 0 : index
    %c0_38 = arith.constant 0 : index
    %88 = vector.load %arg14[%c0_37, %c0_38] : memref<256x8xf32, #tpu.memory_space<vmem>>, vector<256x8xf32>
    tpu.vector_store %arg14[%c0_37, %c0_38], %87 {strides = array<i32>} : memref<256x8xf32, #tpu.memory_space<vmem>>, vector<256x8xf32>,
    %cst_39 = arith.constant 0.000000e+00 : f32
    %89 = vector.broadcast %cst_39 : f32 to vector<16x8xf32>
    %c0_40 = arith.constant 0 : index
    %c0_41 = arith.constant 0 : index
    %90 = vector.load %arg18[%c0_40, %c0_41] : memref<16x8xf32, #tpu.memory_space<vmem>>, vector<16x8xf32>
    tpu.vector_store %arg18[%c0_40, %c0_41], %89 {strides = array<i32>} : memref<16x8xf32, #tpu.memory_space<vmem>>, vector<16x8xf32>,
    %c0_i32 = arith.constant 0 : i32
    %c32_i32 = arith.constant 32 : i32
    %91 = arith.addi %c0_i32, %c32_i32 : i32
    %c1_i32 = arith.constant 1 : i32
    scf.for %arg19 = %c0_i32 to %91 step %c1_i32  : i32 {
      %c1_i32_51 = arith.constant 1 : i32
      %99 = arith.muli %arg19, %c1_i32_51 : i32
      %c0_i32_52 = arith.constant 0 : i32
      %100 = arith.addi %c0_i32_52, %99 : i32
      %c8_i32 = arith.constant 8 : i32
      %101 = arith.muli %100, %c8_i32 : i32
      %102 = tpu.assume_multiple %101, 8 : i32
      %c0_53 = arith.constant 0 : index
      %c0_54 = arith.constant 0 : index
      %103 = vector.load %arg10[%c0_53, %c0_54] : memref<16x8xf32, #tpu.memory_space<vmem>>, vector<16x8xf32>
      %c0_55 = arith.constant 0 : index
      %c0_56 = arith.constant 0 : index
      %104 = vector.load %arg11[%c0_55, %c0_56] : memref<1x8xf32, #tpu.memory_space<vmem>>, vector<1x8xf32>
      %105 = arith.index_cast %102 : i32 to index
      %c0_57 = arith.constant 0 : index
      %106 = vector.load %arg14[%105, %c0_57] : memref<256x8xf32, #tpu.memory_space<vmem>>, vector<8x8xf32>
      %107 = arith.index_cast %102 : i32 to index
      %c0_58 = arith.constant 0 : index
      %108 = vector.load %arg15[%107, %c0_58] : memref<256x8xf32, #tpu.memory_space<vmem>>, vector<8x8xf32>
      %109 = arith.index_cast %102 : i32 to index
      %c0_59 = arith.constant 0 : index
      %110 = vector.load %arg16[%109, %c0_59] : memref<256x8xf32, #tpu.memory_space<vmem>>, vector<8x8xf32>
      %111 = arith.index_cast %102 : i32 to index
      %c0_60 = arith.constant 0 : index
      %112 = vector.load %arg17[%111, %c0_60] : memref<256x32xf32, #tpu.memory_space<vmem>>, vector<8x32xf32>
      %113 = arith.mulf %106, %108 : vector<8x8xf32>
      %114 = tpu.iota {dimensions = array<i32: 0>} : vector<32x32xi32>
      %115 = tpu.iota {dimensions = array<i32: 1>} : vector<32x32xi32>
      %116 = arith.cmpi eq, %114, %115 : vector<32x32xi32>
      %117 = arith.extui %116 : vector<32x32xi1> to vector<32x32xi32>
      %118 = arith.sitofp %117 : vector<32x32xi32> to vector<32x32xf32>
      %c0_61 = arith.constant 0 : index
      %c0_62 = arith.constant 0 : index
      %119 = vector.load %arg18[%c0_61, %c0_62] : memref<16x8xf32, #tpu.memory_space<vmem>>, vector<16x8xf32>
      %120 = vector.extract_strided_slice %112 {offsets = [0, 0], sizes = [1, 32], strides = [1, 1]} : vector<8x32xf32> to vector<1x32xf32>
      %121 = vector.broadcast %120 : vector<1x32xf32> to vector<32x32xf32>
      %122 = arith.mulf %121, %118 : vector<32x32xf32>
      %cst_63 = arith.constant dense<0.000000e+00> : vector<32xf32>
      %123 = vector.multi_reduction <add>, %122, %cst_63 [1] : vector<32x32xf32> to vector<32xf32>
      %124 = vector.shape_cast %123 : vector<32xf32> to vector<32x1xf32>
      %125 = vector.extract_strided_slice %124 {offsets = [0, 0], sizes = [16, 1], strides = [1, 1]} : vector<32x1xf32> to vector<16x1xf32>
      %126 = vector.extract_strided_slice %124 {offsets = [16, 0], sizes = [16, 1], strides = [1, 1]} : vector<32x1xf32> to vector<16x1xf32>
      %127 = vector.extract_strided_slice %106 {offsets = [0, 0], sizes = [1, 8], strides = [1, 1]} : vector<8x8xf32> to vector<1x8xf32>
      %128 = vector.broadcast %127 : vector<1x8xf32> to vector<16x8xf32>
      %129 = arith.mulf %103, %128 : vector<16x8xf32>
      %130 = math.exp %129 : vector<16x8xf32>
      %131 = arith.mulf %130, %119 : vector<16x8xf32>
      %132 = vector.extract_strided_slice %113 {offsets = [0, 0], sizes = [1, 8], strides = [1, 1]} : vector<8x8xf32> to vector<1x8xf32>
      %133 = vector.broadcast %125 : vector<16x1xf32> to vector<16x8xf32>
      %134 = vector.broadcast %132 : vector<1x8xf32> to vector<16x8xf32>
      %135 = arith.mulf %133, %134 : vector<16x8xf32>
      %136 = arith.addf %131, %135 : vector<16x8xf32>
      %137 = vector.broadcast %126 : vector<16x1xf32> to vector<16x8xf32>
      %138 = arith.mulf %137, %136 : vector<16x8xf32>
      %cst_64 = arith.constant dense<0.000000e+00> : vector<8xf32>
      %139 = vector.multi_reduction <add>, %138, %cst_64 [0] : vector<16x8xf32> to vector<8xf32>
      %140 = vector.shape_cast %139 : vector<8xf32> to vector<1x8xf32>
      %141 = vector.extract_strided_slice %112 {offsets = [1, 0], sizes = [1, 32], strides = [1, 1]} : vector<8x32xf32> to vector<1x32xf32>
      %142 = vector.broadcast %141 : vector<1x32xf32> to vector<32x32xf32>
      %143 = arith.mulf %142, %118 : vector<32x32xf32>
      %cst_65 = arith.constant dense<0.000000e+00> : vector<32xf32>
      %144 = vector.multi_reduction <add>, %143, %cst_65 [1] : vector<32x32xf32> to vector<32xf32>
      %145 = vector.shape_cast %144 : vector<32xf32> to vector<32x1xf32>
      %146 = vector.extract_strided_slice %145 {offsets = [0, 0], sizes = [16, 1], strides = [1, 1]} : vector<32x1xf32> to vector<16x1xf32>
      %147 = vector.extract_strided_slice %145 {offsets = [16, 0], sizes = [16, 1], strides = [1, 1]} : vector<32x1xf32> to vector<16x1xf32>
      %148 = vector.extract_strided_slice %106 {offsets = [1, 0], sizes = [1, 8], strides = [1, 1]} : vector<8x8xf32> to vector<1x8xf32>
      %149 = vector.broadcast %148 : vector<1x8xf32> to vector<16x8xf32>
      %150 = arith.mulf %103, %149 : vector<16x8xf32>
      %151 = math.exp %150 : vector<16x8xf32>
      %152 = arith.mulf %151, %136 : vector<16x8xf32>
      %153 = vector.extract_strided_slice %113 {offsets = [1, 0], sizes = [1, 8], strides = [1, 1]} : vector<8x8xf32> to vector<1x8xf32>
      %154 = vector.broadcast %146 : vector<16x1xf32> to vector<16x8xf32>
      %155 = vector.broadcast %153 : vector<1x8xf32> to vector<16x8xf32>
      %156 = arith.mulf %154, %155 : vector<16x8xf32>
      %157 = arith.addf %152, %156 : vector<16x8xf32>
      %158 = vector.broadcast %147 : vector<16x1xf32> to vector<16x8xf32>
      %159 = arith.mulf %158, %157 : vector<16x8xf32>
      %cst_66 = arith.constant dense<0.000000e+00> : vector<8xf32>
      %160 = vector.multi_reduction <add>, %159, %cst_66 [0] : vector<16x8xf32> to vector<8xf32>
      %161 = vector.shape_cast %160 : vector<8xf32> to vector<1x8xf32>
      %162 = vector.extract_strided_slice %112 {offsets = [2, 0], sizes = [1, 32], strides = [1, 1]} : vector<8x32xf32> to vector<1x32xf32>
      %163 = vector.broadcast %162 : vector<1x32xf32> to vector<32x32xf32>
      %164 = arith.mulf %163, %118 : vector<32x32xf32>
      %cst_67 = arith.constant dense<0.000000e+00> : vector<32xf32>
      %165 = vector.multi_reduction <add>, %164, %cst_67 [1] : vector<32x32xf32> to vector<32xf32>
      %166 = vector.shape_cast %165 : vector<32xf32> to vector<32x1xf32>
      %167 = vector.extract_strided_slice %166 {offsets = [0, 0], sizes = [16, 1], strides = [1, 1]} : vector<32x1xf32> to vector<16x1xf32>
      %168 = vector.extract_strided_slice %166 {offsets = [16, 0], sizes = [16, 1], strides = [1, 1]} : vector<32x1xf32> to vector<16x1xf32>
      %169 = vector.extract_strided_slice %106 {offsets = [2, 0], sizes = [1, 8], strides = [1, 1]} : vector<8x8xf32> to vector<1x8xf32>
      %170 = vector.broadcast %169 : vector<1x8xf32> to vector<16x8xf32>
      %171 = arith.mulf %103, %170 : vector<16x8xf32>
      %172 = math.exp %171 : vector<16x8xf32>
      %173 = arith.mulf %172, %157 : vector<16x8xf32>
      %174 = vector.extract_strided_slice %113 {offsets = [2, 0], sizes = [1, 8], strides = [1, 1]} : vector<8x8xf32> to vector<1x8xf32>
      %175 = vector.broadcast %167 : vector<16x1xf32> to vector<16x8xf32>
      %176 = vector.broadcast %174 : vector<1x8xf32> to vector<16x8xf32>
      %177 = arith.mulf %175, %176 : vector<16x8xf32>
      %178 = arith.addf %173, %177 : vector<16x8xf32>
      %179 = vector.broadcast %168 : vector<16x1xf32> to vector<16x8xf32>
      %180 = arith.mulf %179, %178 : vector<16x8xf32>
      %cst_68 = arith.constant dense<0.000000e+00> : vector<8xf32>
      %181 = vector.multi_reduction <add>, %180, %cst_68 [0] : vector<16x8xf32> to vector<8xf32>
      %182 = vector.shape_cast %181 : vector<8xf32> to vector<1x8xf32>
      %183 = vector.extract_strided_slice %112 {offsets = [3, 0], sizes = [1, 32], strides = [1, 1]} : vector<8x32xf32> to vector<1x32xf32>
      %184 = vector.broadcast %183 : vector<1x32xf32> to vector<32x32xf32>
      %185 = arith.mulf %184, %118 : vector<32x32xf32>
      %cst_69 = arith.constant dense<0.000000e+00> : vector<32xf32>
      %186 = vector.multi_reduction <add>, %185, %cst_69 [1] : vector<32x32xf32> to vector<32xf32>
      %187 = vector.shape_cast %186 : vector<32xf32> to vector<32x1xf32>
      %188 = vector.extract_strided_slice %187 {offsets = [0, 0], sizes = [16, 1], strides = [1, 1]} : vector<32x1xf32> to vector<16x1xf32>
      %189 = vector.extract_strided_slice %187 {offsets = [16, 0], sizes = [16, 1], strides = [1, 1]} : vector<32x1xf32> to vector<16x1xf32>
      %190 = vector.extract_strided_slice %106 {offsets = [3, 0], sizes = [1, 8], strides = [1, 1]} : vector<8x8xf32> to vector<1x8xf32>
      %191 = vector.broadcast %190 : vector<1x8xf32> to vector<16x8xf32>
      %192 = arith.mulf %103, %191 : vector<16x8xf32>
      %193 = math.exp %192 : vector<16x8xf32>
      %194 = arith.mulf %193, %178 : vector<16x8xf32>
      %195 = vector.extract_strided_slice %113 {offsets = [3, 0], sizes = [1, 8], strides = [1, 1]} : vector<8x8xf32> to vector<1x8xf32>
      %196 = vector.broadcast %188 : vector<16x1xf32> to vector<16x8xf32>
      %197 = vector.broadcast %195 : vector<1x8xf32> to vector<16x8xf32>
      %198 = arith.mulf %196, %197 : vector<16x8xf32>
      %199 = arith.addf %194, %198 : vector<16x8xf32>
      %200 = vector.broadcast %189 : vector<16x1xf32> to vector<16x8xf32>
      %201 = arith.mulf %200, %199 : vector<16x8xf32>
      %cst_70 = arith.constant dense<0.000000e+00> : vector<8xf32>
      %202 = vector.multi_reduction <add>, %201, %cst_70 [0] : vector<16x8xf32> to vector<8xf32>
      %203 = vector.shape_cast %202 : vector<8xf32> to vector<1x8xf32>
      %204 = vector.extract_strided_slice %112 {offsets = [4, 0], sizes = [1, 32], strides = [1, 1]} : vector<8x32xf32> to vector<1x32xf32>
      %205 = vector.broadcast %204 : vector<1x32xf32> to vector<32x32xf32>
      %206 = arith.mulf %205, %118 : vector<32x32xf32>
      %cst_71 = arith.constant dense<0.000000e+00> : vector<32xf32>
      %207 = vector.multi_reduction <add>, %206, %cst_71 [1] : vector<32x32xf32> to vector<32xf32>
      %208 = vector.shape_cast %207 : vector<32xf32> to vector<32x1xf32>
      %209 = vector.extract_strided_slice %208 {offsets = [0, 0], sizes = [16, 1], strides = [1, 1]} : vector<32x1xf32> to vector<16x1xf32>
      %210 = vector.extract_strided_slice %208 {offsets = [16, 0], sizes = [16, 1], strides = [1, 1]} : vector<32x1xf32> to vector<16x1xf32>
      %211 = vector.extract_strided_slice %106 {offsets = [4, 0], sizes = [1, 8], strides = [1, 1]} : vector<8x8xf32> to vector<1x8xf32>
      %212 = vector.broadcast %211 : vector<1x8xf32> to vector<16x8xf32>
      %213 = arith.mulf %103, %212 : vector<16x8xf32>
      %214 = math.exp %213 : vector<16x8xf32>
      %215 = arith.mulf %214, %199 : vector<16x8xf32>
      %216 = vector.extract_strided_slice %113 {offsets = [4, 0], sizes = [1, 8], strides = [1, 1]} : vector<8x8xf32> to vector<1x8xf32>
      %217 = vector.broadcast %209 : vector<16x1xf32> to vector<16x8xf32>
      %218 = vector.broadcast %216 : vector<1x8xf32> to vector<16x8xf32>
      %219 = arith.mulf %217, %218 : vector<16x8xf32>
      %220 = arith.addf %215, %219 : vector<16x8xf32>
      %221 = vector.broadcast %210 : vector<16x1xf32> to vector<16x8xf32>
      %222 = arith.mulf %221, %220 : vector<16x8xf32>
      %cst_72 = arith.constant dense<0.000000e+00> : vector<8xf32>
      %223 = vector.multi_reduction <add>, %222, %cst_72 [0] : vector<16x8xf32> to vector<8xf32>
      %224 = vector.shape_cast %223 : vector<8xf32> to vector<1x8xf32>
      %225 = vector.extract_strided_slice %112 {offsets = [5, 0], sizes = [1, 32], strides = [1, 1]} : vector<8x32xf32> to vector<1x32xf32>
      %226 = vector.broadcast %225 : vector<1x32xf32> to vector<32x32xf32>
      %227 = arith.mulf %226, %118 : vector<32x32xf32>
      %cst_73 = arith.constant dense<0.000000e+00> : vector<32xf32>
      %228 = vector.multi_reduction <add>, %227, %cst_73 [1] : vector<32x32xf32> to vector<32xf32>
      %229 = vector.shape_cast %228 : vector<32xf32> to vector<32x1xf32>
      %230 = vector.extract_strided_slice %229 {offsets = [0, 0], sizes = [16, 1], strides = [1, 1]} : vector<32x1xf32> to vector<16x1xf32>
      %231 = vector.extract_strided_slice %229 {offsets = [16, 0], sizes = [16, 1], strides = [1, 1]} : vector<32x1xf32> to vector<16x1xf32>
      %232 = vector.extract_strided_slice %106 {offsets = [5, 0], sizes = [1, 8], strides = [1, 1]} : vector<8x8xf32> to vector<1x8xf32>
      %233 = vector.broadcast %232 : vector<1x8xf32> to vector<16x8xf32>
      %234 = arith.mulf %103, %233 : vector<16x8xf32>
      %235 = math.exp %234 : vector<16x8xf32>
      %236 = arith.mulf %235, %220 : vector<16x8xf32>
      %237 = vector.extract_strided_slice %113 {offsets = [5, 0], sizes = [1, 8], strides = [1, 1]} : vector<8x8xf32> to vector<1x8xf32>
      %238 = vector.broadcast %230 : vector<16x1xf32> to vector<16x8xf32>
      %239 = vector.broadcast %237 : vector<1x8xf32> to vector<16x8xf32>
      %240 = arith.mulf %238, %239 : vector<16x8xf32>
      %241 = arith.addf %236, %240 : vector<16x8xf32>
      %242 = vector.broadcast %231 : vector<16x1xf32> to vector<16x8xf32>
      %243 = arith.mulf %242, %241 : vector<16x8xf32>
      %cst_74 = arith.constant dense<0.000000e+00> : vector<8xf32>
      %244 = vector.multi_reduction <add>, %243, %cst_74 [0] : vector<16x8xf32> to vector<8xf32>
      %245 = vector.shape_cast %244 : vector<8xf32> to vector<1x8xf32>
      %246 = vector.extract_strided_slice %112 {offsets = [6, 0], sizes = [1, 32], strides = [1, 1]} : vector<8x32xf32> to vector<1x32xf32>
      %247 = vector.broadcast %246 : vector<1x32xf32> to vector<32x32xf32>
      %248 = arith.mulf %247, %118 : vector<32x32xf32>
      %cst_75 = arith.constant dense<0.000000e+00> : vector<32xf32>
      %249 = vector.multi_reduction <add>, %248, %cst_75 [1] : vector<32x32xf32> to vector<32xf32>
      %250 = vector.shape_cast %249 : vector<32xf32> to vector<32x1xf32>
      %251 = vector.extract_strided_slice %250 {offsets = [0, 0], sizes = [16, 1], strides = [1, 1]} : vector<32x1xf32> to vector<16x1xf32>
      %252 = vector.extract_strided_slice %250 {offsets = [16, 0], sizes = [16, 1], strides = [1, 1]} : vector<32x1xf32> to vector<16x1xf32>
      %253 = vector.extract_strided_slice %106 {offsets = [6, 0], sizes = [1, 8], strides = [1, 1]} : vector<8x8xf32> to vector<1x8xf32>
      %254 = vector.broadcast %253 : vector<1x8xf32> to vector<16x8xf32>
      %255 = arith.mulf %103, %254 : vector<16x8xf32>
      %256 = math.exp %255 : vector<16x8xf32>
      %257 = arith.mulf %256, %241 : vector<16x8xf32>
      %258 = vector.extract_strided_slice %113 {offsets = [6, 0], sizes = [1, 8], strides = [1, 1]} : vector<8x8xf32> to vector<1x8xf32>
      %259 = vector.broadcast %251 : vector<16x1xf32> to vector<16x8xf32>
      %260 = vector.broadcast %258 : vector<1x8xf32> to vector<16x8xf32>
      %261 = arith.mulf %259, %260 : vector<16x8xf32>
      %262 = arith.addf %257, %261 : vector<16x8xf32>
      %263 = vector.broadcast %252 : vector<16x1xf32> to vector<16x8xf32>
      %264 = arith.mulf %263, %262 : vector<16x8xf32>
      %cst_76 = arith.constant dense<0.000000e+00> : vector<8xf32>
      %265 = vector.multi_reduction <add>, %264, %cst_76 [0] : vector<16x8xf32> to vector<8xf32>
      %266 = vector.shape_cast %265 : vector<8xf32> to vector<1x8xf32>
      %267 = vector.extract_strided_slice %112 {offsets = [7, 0], sizes = [1, 32], strides = [1, 1]} : vector<8x32xf32> to vector<1x32xf32>
      %268 = vector.broadcast %267 : vector<1x32xf32> to vector<32x32xf32>
      %269 = arith.mulf %268, %118 : vector<32x32xf32>
      %cst_77 = arith.constant dense<0.000000e+00> : vector<32xf32>
      %270 = vector.multi_reduction <add>, %269, %cst_77 [1] : vector<32x32xf32> to vector<32xf32>
      %271 = vector.shape_cast %270 : vector<32xf32> to vector<32x1xf32>
      %272 = vector.extract_strided_slice %271 {offsets = [0, 0], sizes = [16, 1], strides = [1, 1]} : vector<32x1xf32> to vector<16x1xf32>
      %273 = vector.extract_strided_slice %271 {offsets = [16, 0], sizes = [16, 1], strides = [1, 1]} : vector<32x1xf32> to vector<16x1xf32>
      %274 = vector.extract_strided_slice %106 {offsets = [7, 0], sizes = [1, 8], strides = [1, 1]} : vector<8x8xf32> to vector<1x8xf32>
      %275 = vector.broadcast %274 : vector<1x8xf32> to vector<16x8xf32>
      %276 = arith.mulf %103, %275 : vector<16x8xf32>
      %277 = math.exp %276 : vector<16x8xf32>
      %278 = arith.mulf %277, %262 : vector<16x8xf32>
      %279 = vector.extract_strided_slice %113 {offsets = [7, 0], sizes = [1, 8], strides = [1, 1]} : vector<8x8xf32> to vector<1x8xf32>
      %280 = vector.broadcast %272 : vector<16x1xf32> to vector<16x8xf32>
      %281 = vector.broadcast %279 : vector<1x8xf32> to vector<16x8xf32>
      %282 = arith.mulf %280, %281 : vector<16x8xf32>
      %283 = arith.addf %278, %282 : vector<16x8xf32>
      %284 = vector.broadcast %273 : vector<16x1xf32> to vector<16x8xf32>
      %285 = arith.mulf %284, %283 : vector<16x8xf32>
      %cst_78 = arith.constant dense<0.000000e+00> : vector<8xf32>
      %286 = vector.multi_reduction <add>, %285, %cst_78 [0] : vector<16x8xf32> to vector<8xf32>
      %287 = vector.shape_cast %286 : vector<8xf32> to vector<1x8xf32>
      %c0_79 = arith.constant 0 : index
      %c0_80 = arith.constant 0 : index
      %288 = vector.load %arg18[%c0_79, %c0_80] : memref<16x8xf32, #tpu.memory_space<vmem>>, vector<16x8xf32>
      tpu.vector_store %arg18[%c0_79, %c0_80], %283 {strides = array<i32>} : memref<16x8xf32, #tpu.memory_space<vmem>>, vector<16x8xf32>,
      %289 = tpu.concatenate %140, %161, %182, %203, %224, %245, %266, %287 in 0 : vector<1x8xf32>, vector<1x8xf32>, vector<1x8xf32>, vector<1x8xf32>, vector<1x8xf32>, vector<1x8xf32>, vector<1x8xf32>, vector<1x8xf32> -> vector<8x8xf32>
      %290 = vector.broadcast %104 : vector<1x8xf32> to vector<8x8xf32>
      %291 = arith.mulf %108, %290 : vector<8x8xf32>
      %292 = arith.addf %289, %291 : vector<8x8xf32>
      %cst_81 = arith.constant 0.000000e+00 : f32
      %293 = vector.broadcast %cst_81 : f32 to vector<8x8xf32>
      %294 = arith.subf %293, %110 : vector<8x8xf32>
      %295 = math.exp %294 : vector<8x8xf32>
      %cst_82 = arith.constant 1.000000e+00 : f32
      %296 = vector.broadcast %cst_82 : f32 to vector<8x8xf32>
      %297 = arith.addf %296, %295 : vector<8x8xf32>
      %cst_83 = arith.constant 1.000000e+00 : f32
      %298 = vector.broadcast %cst_83 : f32 to vector<8x8xf32>
      %299 = arith.divf %298, %297 : vector<8x8xf32>
      %300 = arith.mulf %110, %299 : vector<8x8xf32>
      %301 = arith.mulf %292, %300 : vector<8x8xf32>
      %302 = arith.index_cast %102 : i32 to index
      %c0_84 = arith.constant 0 : index
      %303 = vector.load %arg16[%302, %c0_84] : memref<256x8xf32, #tpu.memory_space<vmem>>, vector<8x8xf32>
      tpu.vector_store %arg16[%302, %c0_84], %301 {strides = array<i32>} : memref<256x8xf32, #tpu.memory_space<vmem>>, vector<8x8xf32>,
    }
    %c32_i32_42 = arith.constant 32 : i32
    %c0_43 = arith.constant 0 : index
    %c0_44 = arith.constant 0 : index
    %92 = vector.load %arg16[%c0_43, %c0_44] : memref<256x8xf32, #tpu.memory_space<vmem>>, vector<256x8xf32>
    %93 = arith.truncf %92 : vector<256x8xf32> to vector<256x8xbf16>
    %c0_45 = arith.constant 0 : index
    %c0_46 = arith.constant 0 : index
    %94 = vector.load %arg12[%c0_45, %c0_46] : memref<8x4xbf16, #tpu.memory_space<vmem>>, vector<8x4xbf16>
    %cst_47 = arith.constant dense<0.000000e+00> : vector<256x4xf32>
    %95 = tpu.matmul %93, %94, %cst_47 {dimension_numbers = #tpu.dot_dimension_numbers<[1], [0], [0], [1], [0, 0, 1, 1], [], []>} : vector<256x8xbf16>, vector<8x4xbf16>, vector<256x4xf32> -> vector<256x4xf32>
    %c0_48 = arith.constant 0 : index
    %c0_49 = arith.constant 0 : index
    %c0_50 = arith.constant 0 : index
    %96 = vector.load %arg13[%c0_48, %c0_49, %c0_50] : memref<1x256x4xf32, #tpu.memory_space<vmem>>, vector<1x256x4xf32>
    %97 = vector.shape_cast %96 : vector<1x256x4xf32> to vector<256x4xf32>
    %98 = vector.shape_cast %95 : vector<256x4xf32> to vector<1x256x4xf32>
    tpu.vector_store %arg13[%c0_48, %c0_49, %c0_50], %98 {strides = array<i32>} : memref<1x256x4xf32, #tpu.memory_space<vmem>>, vector<1x256x4xf32>,
    return
  }
  func.func @transform_0(%arg0: i32) -> (i32, i32, i32) {
    %c0_i32 = arith.constant 0 : i32
    %c0_i32_0 = arith.constant 0 : i32
    %c0_i32_1 = arith.constant 0 : i32
    return %arg0, %c0_i32, %c0_i32_0 : i32, i32, i32
  }
  func.func @transform_1(%arg0: i32) -> (i32, i32) {
    %c0_i32 = arith.constant 0 : i32
    %c0_i32_0 = arith.constant 0 : i32
    %c0_i32_1 = arith.constant 0 : i32
    return %c0_i32, %c0_i32_0 : i32, i32
  }
  func.func @transform_2(%arg0: i32) -> (i32, i32) {
    %c0_i32 = arith.constant 0 : i32
    %c0_i32_0 = arith.constant 0 : i32
    %c0_i32_1 = arith.constant 0 : i32
    return %c0_i32, %c0_i32_0 : i32, i32
  }
  func.func @transform_3(%arg0: i32) -> (i32, i32) {
    %c0_i32 = arith.constant 0 : i32
    %c0_i32_0 = arith.constant 0 : i32
    %c0_i32_1 = arith.constant 0 : i32
    return %c0_i32, %c0_i32_0 : i32, i32
  }
  func.func @transform_4(%arg0: i32) -> (i32, i32) {
    %c0_i32 = arith.constant 0 : i32
    %c0_i32_0 = arith.constant 0 : i32
    %c0_i32_1 = arith.constant 0 : i32
    return %c0_i32, %c0_i32_0 : i32, i32
  }
  func.func @transform_5(%arg0: i32) -> (i32, i32) {
    %c0_i32 = arith.constant 0 : i32
    %c0_i32_0 = arith.constant 0 : i32
    %c0_i32_1 = arith.constant 0 : i32
    return %c0_i32, %c0_i32_0 : i32, i32
  }
  func.func @transform_6(%arg0: i32) -> (i32, i32) {
    %c0_i32 = arith.constant 0 : i32
    %c0_i32_0 = arith.constant 0 : i32
    %c0_i32_1 = arith.constant 0 : i32
    return %c0_i32, %c0_i32_0 : i32, i32
  }
  func.func @transform_7(%arg0: i32) -> (i32, i32) {
    %c0_i32 = arith.constant 0 : i32
    %c0_i32_0 = arith.constant 0 : i32
    %c0_i32_1 = arith.constant 0 : i32
    return %c0_i32, %c0_i32_0 : i32, i32
  }
  func.func @transform_8(%arg0: i32) -> (i32, i32) {
    %c0_i32 = arith.constant 0 : i32
    %c0_i32_0 = arith.constant 0 : i32
    %c0_i32_1 = arith.constant 0 : i32
    return %c0_i32, %c0_i32_0 : i32, i32
  }
  func.func @transform_9(%arg0: i32) -> (i32, i32) {
    %c0_i32 = arith.constant 0 : i32
    %c0_i32_0 = arith.constant 0 : i32
    %c0_i32_1 = arith.constant 0 : i32
    return %c0_i32, %c0_i32_0 : i32, i32
  }
  func.func @transform_10(%arg0: i32) -> (i32, i32) {
    %c0_i32 = arith.constant 0 : i32
    %c0_i32_0 = arith.constant 0 : i32
    %c0_i32_1 = arith.constant 0 : i32
    return %c0_i32, %c0_i32_0 : i32, i32
  }
  func.func @transform_11(%arg0: i32) -> (i32, i32) {
    %c0_i32 = arith.constant 0 : i32
    %c0_i32_0 = arith.constant 0 : i32
    %c0_i32_1 = arith.constant 0 : i32
    return %c0_i32, %c0_i32_0 : i32, i32
  }
  func.func @transform_12(%arg0: i32) -> (i32, i32, i32) {
    %c0_i32 = arith.constant 0 : i32
    %c0_i32_0 = arith.constant 0 : i32
    %c0_i32_1 = arith.constant 0 : i32
    return %arg0, %c0_i32, %c0_i32_0 : i32, i32, i32
  }
}

</mosaic_0001>

<bundles_post_ra>
// kernel: tpu_custom_call.1
= control target key start
LH: loop header
LB: loop body
LE: loop exit
PB: predicated region body
PF: predicated region fallthrough
CT: control target
= control target key end

     0   :  { %s4784_s21 = smov 0   ;;  %s7134_s0 = inlined_call_operand.vmem [shape: f32[2,256,4], index: 0, kind: input, shape index: {}]   ;;  %s7135_s1 = inlined_call_operand.vmem [shape: f32[1,4], index: 1, kind: input, shape index: {}]   ;;  %s7136_s2 = inlined_call_operand.vmem [shape: f32[1,4], index: 2, kind: input, shape index: {}]   ;;  %s7137_s3 = inlined_call_operand.vmem [shape: bf16[4,16], index: 3, kind: input, shape index: {}]   ;;  %s7138_s4 = inlined_call_operand.vmem [shape: f32[4,8], index: 4, kind: input, shape index: {}]   ;;  %s7139_s5 = inlined_call_operand.vmem [shape: f32[1,8], index: 5, kind: input, shape index: {}]   ;;  %s7140_s6 = inlined_call_operand.vmem [shape: bf16[8,33], index: 6, kind: input, shape index: {}]   ;;  %s7141_s7 = inlined_call_operand.vmem [shape: f32[1,8], index: 7, kind: input, shape index: {}]   ;;  %s7142_s8 = inlined_call_operand.vmem [shape: f32[1,8], index: 8, kind: input, shape index: {}]   ;;  %s7143_s9 = inlined_call_operand.vmem [shape: f32[16,8], index: 9, kind: input, shape index: {}]   ;;  %s7144_s10 = inlined_call_operand.vmem [shape: f32[1,8], index: 10, kind: input, shape index: {}]   ;;  %s7145_s11 = inlined_call_operand.vmem [shape: bf16[8,4], index: 11, kind: input, shape index: {}]   ;;  %s7146_s12 = inlined_call_operand.vmem [shape: f32[2,256,4], index: 12, kind: output, shape index: {}]  }
   0x1 LB: > { %s4087_s22 = sadd.s32 4294967295, %s4708_s21   ;;  %p4091_p0 = scmp.ge.s32.totalorder %s4708_s21, 1  ;;  %s4708_s21 = sphi %s4784_s21, %s22_s21  }
   0x2   : > { %p362_p1 = scmp.lt.s32.totalorder %s4708_s21, 3 }
   0x4   : > { %p363_p2 = pnand %p4091_p0, %p362_p1 }
   0x6   : > { %366 = sbr.rel (%p363_p2) target bundleno = 1720 (0x6b8), region = 68 }
   0xd   : > { %p404_p3 = scmp.lt.s32.totalorder %s4087_s22, 1  ;;  %vm447_vm0 = vcmask 31744   ;;  %vm1008_vm1 = vcmask 1041408   ;;  %vm2461_vm2 = vcmask 1043456   ;;  %vm1335_vm3 = vcmask 1042432   ;;  %s4716_s28 = smov 127  }
   0xe   : > { %vm1571_vm4 = vcmask 1046528   ;;  %vm1771_vm5 = vcmask 1045504   ;;  %vm1971_vm6 = vcmask 1044480   ;;  %vm1301_vm7 = vcmask 64512   ;;  %s6773_s16 = smov 0  }
   0xf   : > { %s7357_s22 = smov (!%p404_p3, %s4087_s22), 1  ;;  %vm2754_vm8 = vcmask 261120  }
  0x10   : > { %s4157_s23 = sshll.u32 %s7357_s22, 8 }
  0x11   : > { %s4795_s26 = scalar_lea.vmem %s7134_s0, %s4157_s23  ;;  %s4800_s29 = scalar_lea.vmem %s7146_s12, %s4157_s23 }
  0x12   : > { %v4803_v0 = vld [vmem:[%s4795_s26] sm:$0xff]  ;;  %v4806_v1 = vld [vmem:[%s4795_s26 + $0x10] sm:$0xff]  ;;  %v4809_v2 = vld [vmem:[%s4795_s26 + $0x8] sm:$0xff]  ;;  %s4714_s23 = smov 120  }
  0x13   : > { %v448_v3 = vsel %vm447_vm0, %v4803_v0, 0.0  ;;  %v454_v4 = vsel %vm447_vm0, %v4806_v1, 0.0  ;;  %v4816_v5 = vld [vmem:[%s4795_s26 + $0x18] sm:$0xff]  ;;  %v451_v6 = vsel %vm447_vm0, %v4809_v2, 0.0  ;;  %v4823_v8 = vld [vmem:[%s4795_s26 + $0x20] sm:$0xff]  ;;  %v4826_v9 = vld [vmem:[%s4795_s26 + $0x28] sm:$0xff] }
  0x14   : > { %449 = vadd.xlane.f32.xlu0 %v448_v3  ;;  %455 = vadd.xlane.f32.xlu1 %v454_v4  ;;  %v457_v7 = vsel %vm447_vm0, %v4816_v5, 0.0  ;;  %v460_v10 = vsel %vm447_vm0, %v4823_v8, 0.0  ;;  %v463_v11 = vsel %vm447_vm0, %v4826_v9, 0.0  ;;  %v4833_v12 = vld [vmem:[%s4795_s26 + $0x30] sm:$0xff]  ;;  %v4836_v13 = vld [vmem:[%s4795_s26 + $0x38] sm:$0xff]  ;;  %v4843_v16 = vld [vmem:[%s4795_s26 + $0x40] sm:$0xff] }
  0x15   : > { %v466_v14 = vsel %vm447_vm0, %v4833_v12, 0.0  ;;  %v469_v15 = vsel %vm447_vm0, %v4836_v13, 0.0  ;;  %v4846_v17 = vld [vmem:[%s4795_s26 + $0x48] sm:$0xff]  ;;  %v472_v18 = vsel %vm447_vm0, %v4843_v16, 0.0  ;;  %v4853_v20 = vld [vmem:[%s4795_s26 + $0x50] sm:$0xff]  ;;  %v4856_v21 = vld [vmem:[%s4795_s26 + $0x58] sm:$0xff] }
  0x16   : > { %v475_v19 = vsel %vm447_vm0, %v4846_v17, 0.0  ;;  %v478_v22 = vsel %vm447_vm0, %v4853_v20, 0.0  ;;  %v481_v23 = vsel %vm447_vm0, %v4856_v21, 0.0  ;;  %v4863_v24 = vld [vmem:[%s4795_s26 + $0x60] sm:$0xff]  ;;  %v4866_v25 = vld [vmem:[%s4795_s26 + $0x68] sm:$0xff]  ;;  %v4873_v28 = vld [vmem:[%s4795_s26 + $0x70] sm:$0xff] }
  0x17   : > { %v484_v26 = vsel %vm447_vm0, %v4863_v24, 0.0  ;;  %v487_v27 = vsel %vm447_vm0, %v4866_v25, 0.0  ;;  %v4876_v29 = vld [vmem:[%s4795_s26 + $0x78] sm:$0xff]  ;;  %v490_v30 = vsel %vm447_vm0, %v4873_v28, 0.0  ;;  %v4883_v32 = vld [vmem:[%s4795_s26 + $0x80] sm:$0xff]  ;;  %v4886_v33 = vld [vmem:[%s4795_s26 + $0x88] sm:$0xff] }
  0x18   : > { %452 = vadd.xlane.f32.xlu0 %v451_v6  ;;  %458 = vadd.xlane.f32.xlu1 %v457_v7  ;;  %v493_v31 = vsel %vm447_vm0, %v4876_v29, 0.0  ;;  %v496_v34 = vsel %vm447_vm0, %v4883_v32, 0.0  ;;  %v499_v35 = vsel %vm447_vm0, %v4886_v33, 0.0  ;;  %v4893_v36 = vld [vmem:[%s4795_s26 + $0x90] sm:$0xff]  ;;  %v4896_v37 = vld [vmem:[%s4795_s26 + $0x98] sm:$0xff]  ;;  %v4903_v40 = vld [vmem:[%s4795_s26 + $0xa0] sm:$0xff] }
  0x19   : > { %v502_v38 = vsel %vm447_vm0, %v4893_v36, 0.0  ;;  %v505_v39 = vsel %vm447_vm0, %v4896_v37, 0.0  ;;  %v4906_v41 = vld [vmem:[%s4795_s26 + $0xa8] sm:$0xff]  ;;  %v508_v42 = vsel %vm447_vm0, %v4903_v40, 0.0  ;;  %v4913_v44 = vld [vmem:[%s4795_s26 + $0xb0] sm:$0xff]  ;;  %v4916_v45 = vld [vmem:[%s4795_s26 + $0xb8] sm:$0xff] }
  0x1a   : > { %v511_v43 = vsel %vm447_vm0, %v4906_v41, 0.0  ;;  %v514_v46 = vsel %vm447_vm0, %v4913_v44, 0.0  ;;  %v517_v47 = vsel %vm447_vm0, %v4916_v45, 0.0  ;;  %v4923_v48 = vld [vmem:[%s4795_s26 + $0xc0] sm:$0xff]  ;;  %v4926_v49 = vld [vmem:[%s4795_s26 + $0xc8] sm:$0xff]  ;;  %v4933_v52 = vld [vmem:[%s4795_s26 + $0xd0] sm:$0xff] }
  0x1b   : > { %v520_v50 = vsel %vm447_vm0, %v4923_v48, 0.0  ;;  %v523_v51 = vsel %vm447_vm0, %v4926_v49, 0.0  ;;  %v4936_v53 = vld [vmem:[%s4795_s26 + $0xd8] sm:$0xff]  ;;  %v526_v54 = vsel %vm447_vm0, %v4933_v52, 0.0  ;;  %v4943_v56 = vld [vmem:[%s4795_s26 + $0xe0] sm:$0xff]  ;;  %v4946_v57 = vld [vmem:[%s4795_s26 + $0xe8] sm:$0xff] }
  0x1c   : > { %461 = vadd.xlane.f32.xlu0 %v460_v10  ;;  %464 = vadd.xlane.f32.xlu1 %v463_v11  ;;  %v529_v55 = vsel %vm447_vm0, %v4936_v53, 0.0  ;;  %v532_v58 = vsel %vm447_vm0, %v4943_v56, 0.0  ;;  %v535_v59 = vsel %vm447_vm0, %v4946_v57, 0.0  ;;  %v4953_v60 = vld [vmem:[%s4795_s26 + $0xf0] sm:$0xff]  ;;  %v4956_v61 = vld [vmem:[%s4795_s26 + $0xf8] sm:$0xff] }
  0x1d   : > { %v538_v62 = vsel %vm447_vm0, %v4953_v60, 0.0  ;;  %v541_v63 = vsel %vm447_vm0, %v4956_v61, 0.0 }
  0x20   : > { %467 = vadd.xlane.f32.xlu0 %v466_v14  ;;  %470 = vadd.xlane.f32.xlu1 %v469_v15 }
  0x24   : > { %473 = vadd.xlane.f32.xlu0 %v472_v18  ;;  %476 = vadd.xlane.f32.xlu1 %v475_v19 }
  0x28   : > { %479 = vadd.xlane.f32.xlu0 %v478_v22  ;;  %482 = vadd.xlane.f32.xlu1 %v481_v23 }
  0x2c   : > { %485 = vadd.xlane.f32.xlu0 %v484_v26  ;;  %488 = vadd.xlane.f32.xlu1 %v487_v27 }
  0x30   : > { %491 = vadd.xlane.f32.xlu0 %v490_v30  ;;  %494 = vadd.xlane.f32.xlu1 %v493_v31 }
  0x34   : > { %497 = vadd.xlane.f32.xlu0 %v496_v34  ;;  %500 = vadd.xlane.f32.xlu1 %v499_v35 }
  0x38   : > { %503 = vadd.xlane.f32.xlu0 %v502_v38  ;;  %506 = vadd.xlane.f32.xlu1 %v505_v39 }
  0x3c   : > { %509 = vadd.xlane.f32.xlu0 %v508_v42  ;;  %512 = vadd.xlane.f32.xlu1 %v511_v43 }
  0x40   : > { %515 = vadd.xlane.f32.xlu0 %v514_v46  ;;  %518 = vadd.xlane.f32.xlu1 %v517_v47 }
  0x44   : > { %521 = vadd.xlane.f32.xlu0 %v520_v50  ;;  %524 = vadd.xlane.f32.xlu1 %v523_v51 }
  0x48   : > { %527 = vadd.xlane.f32.xlu0 %v526_v54  ;;  %530 = vadd.xlane.f32.xlu1 %v529_v55 }
  0x4c   : > { %533 = vadd.xlane.f32.xlu0 %v532_v58  ;;  %536 = vadd.xlane.f32.xlu1 %v535_v59 }
  0x50   : > { %539 = vadd.xlane.f32.xlu0 %v538_v62  ;;  %542 = vadd.xlane.f32.xlu1 %v541_v63 }
  0xa1   : > { %v450_v3 = vpop.xlane.xlu0 %449  ;;  %v456_v4 = vpop.xlane.xlu1 %455 }
  0xa2   : > { %v545_v6 = vmul.f32 0.25, %v450_v3  ;;  %v547_v7 = vmul.f32 0.25, %v456_v4 }
  0xa4   : > { %v4963_v10 = vsub.f32 %v4803_v0, %v545_v6  ;;  %v4966_v11 = vsub.f32 %v4806_v1, %v547_v7 }
  0xa5   : > { %v453_v14 = vpop.xlane.xlu0 %452  ;;  %v459_v15 = vpop.xlane.xlu1 %458 }
  0xa6   : > { %v546_v18 = vmul.f32 0.25, %v453_v14  ;;  %v548_v19 = vmul.f32 0.25, %v459_v15  ;;  %v609_v22 = vmul.f32 %v4963_v10, %v4963_v10  ;;  %v611_v23 = vmul.f32 %v4966_v11, %v4966_v11 }
  0xa8   : > { %v4973_v26 = vsub.f32 %v4809_v2, %v546_v18  ;;  %v4976_v27 = vsub.f32 %v4816_v5, %v548_v19  ;;  %v641_v0 = vsel %vm447_vm0, %v609_v22, 0.0  ;;  %v647_v31 = vsel %vm447_vm0, %v611_v23, 0.0 }
  0xa9   : > { %642 = vadd.xlane.f32.xlu0 %v641_v0  ;;  %v462_v1 = vpop.xlane.xlu0 %461  ;;  %v465_v30 = vpop.xlane.xlu1 %464 }
  0xaa   : > { %v549_v34 = vmul.f32 0.25, %v462_v1  ;;  %v550_v35 = vmul.f32 0.25, %v465_v30  ;;  %v610_v38 = vmul.f32 %v4973_v26, %v4973_v26  ;;  %v612_v39 = vmul.f32 %v4976_v27, %v4976_v27 }
  0xac   : > { %v4985_v2 = vsub.f32 %v4823_v8, %v549_v34  ;;  %v4988_v5 = vsub.f32 %v4826_v9, %v550_v35  ;;  %v644_v42 = vsel %vm447_vm0, %v610_v38, 0.0  ;;  %v650_v47 = vsel %vm447_vm0, %v612_v39, 0.0 }
  0xad   : > { %648 = vadd.xlane.f32.xlu0 %v647_v31  ;;  %645 = vadd.xlane.f32.xlu1 %v644_v42  ;;  %v468_v43 = vpop.xlane.xlu0 %467  ;;  %v471_v46 = vpop.xlane.xlu1 %470 }
  0xae   : > { %v551_v50 = vmul.f32 0.25, %v468_v43  ;;  %v552_v51 = vmul.f32 0.25, %v471_v46  ;;  %v613_v54 = vmul.f32 %v4985_v2, %v4985_v2  ;;  %v614_v8 = vmul.f32 %v4988_v5, %v4988_v5 }
  0xb0   : > { %v4997_v55 = vsub.f32 %v4833_v12, %v551_v50  ;;  %v5000_v9 = vsub.f32 %v4836_v13, %v552_v51  ;;  %v653_v58 = vsel %vm447_vm0, %v613_v54, 0.0  ;;  %v656_v63 = vsel %vm447_vm0, %v614_v8, 0.0 }
  0xb1   : > { %651 = vadd.xlane.f32.xlu1 %v650_v47  ;;  %654 = vadd.xlane.f32.xlu0 %v653_v58  ;;  %v474_v59 = vpop.xlane.xlu0 %473  ;;  %v477_v62 = vpop.xlane.xlu1 %476 }
  0xb2   : > { %v553_v3 = vmul.f32 0.25, %v474_v59  ;;  %v554_v4 = vmul.f32 0.25, %v477_v62  ;;  %v615_v6 = vmul.f32 %v4997_v55, %v4997_v55  ;;  %v616_v12 = vmul.f32 %v5000_v9, %v5000_v9 }
  0xb4   : > { %v5009_v7 = vsub.f32 %v4843_v16, %v553_v3  ;;  %v5012_v13 = vsub.f32 %v4846_v17, %v554_v4  ;;  %v659_v14 = vsel %vm447_vm0, %v615_v6, 0.0  ;;  %v662_v19 = vsel %vm447_vm0, %v616_v12, 0.0 }
  0xb5   : > { %657 = vadd.xlane.f32.xlu1 %v656_v63  ;;  %660 = vadd.xlane.f32.xlu0 %v659_v14  ;;  %v480_v15 = vpop.xlane.xlu0 %479  ;;  %v483_v18 = vpop.xlane.xlu1 %482 }
  0xb6   : > { %v555_v22 = vmul.f32 0.25, %v480_v15  ;;  %v556_v23 = vmul.f32 0.25, %v483_v18  ;;  %v617_v0 = vmul.f32 %v5009_v7, %v5009_v7  ;;  %v618_v16 = vmul.f32 %v5012_v13, %v5012_v13 }
  0xb8   : > { %v5021_v1 = vsub.f32 %v4853_v20, %v555_v22  ;;  %v5024_v17 = vsub.f32 %v4856_v21, %v556_v23  ;;  %v665_v30 = vsel %vm447_vm0, %v617_v0, 0.0  ;;  %v668_v35 = vsel %vm447_vm0, %v618_v16, 0.0 }
  0xb9   : > { %663 = vadd.xlane.f32.xlu1 %v662_v19  ;;  %666 = vadd.xlane.f32.xlu0 %v665_v30  ;;  %v486_v31 = vpop.xlane.xlu0 %485  ;;  %v489_v34 = vpop.xlane.xlu1 %488 }
  0xba   : > { %v557_v38 = vmul.f32 0.25, %v486_v31  ;;  %v558_v39 = vmul.f32 0.25, %v489_v34  ;;  %v619_v42 = vmul.f32 %v5021_v1, %v5021_v1  ;;  %v620_v20 = vmul.f32 %v5024_v17, %v5024_v17 }
  0xbc   : > { %v5033_v43 = vsub.f32 %v4863_v24, %v557_v38  ;;  %v5036_v21 = vsub.f32 %v4866_v25, %v558_v39  ;;  %v671_v46 = vsel %vm447_vm0, %v619_v42, 0.0  ;;  %v674_v51 = vsel %vm447_vm0, %v620_v20, 0.0 }
  0xbd   : > { %669 = vadd.xlane.f32.xlu1 %v668_v35  ;;  %672 = vadd.xlane.f32.xlu0 %v671_v46  ;;  %v492_v47 = vpop.xlane.xlu0 %491  ;;  %v495_v50 = vpop.xlane.xlu1 %494 }
  0xbe   : > { %v559_v54 = vmul.f32 0.25, %v492_v47  ;;  %v560_v8 = vmul.f32 0.25, %v495_v50  ;;  %v621_v58 = vmul.f32 %v5033_v43, %v5033_v43  ;;  %v622_v24 = vmul.f32 %v5036_v21, %v5036_v21 }
  0xc0   : > { %v5045_v59 = vsub.f32 %v4873_v28, %v559_v54  ;;  %v5048_v25 = vsub.f32 %v4876_v29, %v560_v8  ;;  %v677_v62 = vsel %vm447_vm0, %v621_v58, 0.0  ;;  %v680_v4 = vsel %vm447_vm0, %v622_v24, 0.0 }
  0xc1   : > { %675 = vadd.xlane.f32.xlu1 %v674_v51  ;;  %678 = vadd.xlane.f32.xlu0 %v677_v62  ;;  %v498_v63 = vpop.xlane.xlu0 %497  ;;  %v501_v3 = vpop.xlane.xlu1 %500 }
  0xc2   : > { %v561_v6 = vmul.f32 0.25, %v498_v63  ;;  %v562_v12 = vmul.f32 0.25, %v501_v3  ;;  %v623_v14 = vmul.f32 %v5045_v59, %v5045_v59  ;;  %v624_v28 = vmul.f32 %v5048_v25, %v5048_v25 }
  0xc4   : > { %v5057_v15 = vsub.f32 %v4883_v32, %v561_v6  ;;  %v5060_v29 = vsub.f32 %v4886_v33, %v562_v12  ;;  %v683_v18 = vsel %vm447_vm0, %v623_v14, 0.0  ;;  %v686_v23 = vsel %vm447_vm0, %v624_v28, 0.0 }
  0xc5   : > { %681 = vadd.xlane.f32.xlu1 %v680_v4  ;;  %684 = vadd.xlane.f32.xlu0 %v683_v18  ;;  %v504_v19 = vpop.xlane.xlu0 %503  ;;  %v507_v22 = vpop.xlane.xlu1 %506 }
  0xc6   : > { %v563_v0 = vmul.f32 0.25, %v504_v19  ;;  %v564_v16 = vmul.f32 0.25, %v507_v22  ;;  %v625_v30 = vmul.f32 %v5057_v15, %v5057_v15  ;;  %v626_v32 = vmul.f32 %v5060_v29, %v5060_v29 }
  0xc8   : > { %v5069_v31 = vsub.f32 %v4893_v36, %v563_v0  ;;  %v5072_v33 = vsub.f32 %v4896_v37, %v564_v16  ;;  %v689_v34 = vsel %vm447_vm0, %v625_v30, 0.0  ;;  %v692_v39 = vsel %vm447_vm0, %v626_v32, 0.0 }
  0xc9   : > { %687 = vadd.xlane.f32.xlu1 %v686_v23  ;;  %690 = vadd.xlane.f32.xlu0 %v689_v34  ;;  %v510_v35 = vpop.xlane.xlu0 %509  ;;  %v513_v38 = vpop.xlane.xlu1 %512 }
  0xca   : > { %v565_v42 = vmul.f32 0.25, %v510_v35  ;;  %v566_v20 = vmul.f32 0.25, %v513_v38  ;;  %v627_v46 = vmul.f32 %v5069_v31, %v5069_v31  ;;  %v628_v36 = vmul.f32 %v5072_v33, %v5072_v33 }
  0xcc   : > { %v5081_v47 = vsub.f32 %v4903_v40, %v565_v42  ;;  %v5084_v37 = vsub.f32 %v4906_v41, %v566_v20  ;;  %v695_v50 = vsel %vm447_vm0, %v627_v46, 0.0  ;;  %v698_v8 = vsel %vm447_vm0, %v628_v36, 0.0 }
  0xcd   : > { %693 = vadd.xlane.f32.xlu1 %v692_v39  ;;  %696 = vadd.xlane.f32.xlu0 %v695_v50  ;;  %v516_v51 = vpop.xlane.xlu0 %515  ;;  %v519_v54 = vpop.xlane.xlu1 %518 }
  0xce   : > { %v567_v58 = vmul.f32 0.25, %v516_v51  ;;  %v568_v24 = vmul.f32 0.25, %v519_v54  ;;  %v629_v62 = vmul.f32 %v5081_v47, %v5081_v47  ;;  %v630_v40 = vmul.f32 %v5084_v37, %v5084_v37 }
  0xd0   : > { %v5093_v63 = vsub.f32 %v4913_v44, %v567_v58  ;;  %v5096_v41 = vsub.f32 %v4916_v45, %v568_v24  ;;  %v701_v3 = vsel %vm447_vm0, %v629_v62, 0.0  ;;  %v704_v12 = vsel %vm447_vm0, %v630_v40, 0.0  ;;  %v959_v45 = vld [vmem:[%s7137_s3] sm:$0x3] }
  0xd1   : > { %699 = vadd.xlane.f32.xlu1 %v698_v8  ;;  %702 = vadd.xlane.f32.xlu0 %v701_v3  ;;  %v522_v4 = vpop.xlane.xlu0 %521  ;;  %v525_v6 = vpop.xlane.xlu1 %524  ;;  %v1010_v32 = vsel %vm1008_vm1, %v959_v45, 0 }
  0xd2   : > { %v569_v14 = vmul.f32 0.25, %v522_v4  ;;  %v570_v28 = vmul.f32 0.25, %v525_v6  ;;  %v631_v18 = vmul.f32 %v5093_v63, %v5093_v63  ;;  %v632_v44 = vmul.f32 %v5096_v41, %v5096_v41  ;;  %4314 = vmatprep.subr.msk.bf16.mxu0 %vm1008_vm1, %v959_v45  ;;  %4315 = vmatprep.subr.msk.bf16.mxu1 %vm1008_vm1, %v959_v45 }
  0xd3   : > { %4211 = vmatpush3.bf16.msra.mxu0 %v1010_v32  ;;  %4313 = vmatpush3.bf16.msra.mxu1 %v1010_v32 }
  0xd4   : > { %v5108_v19 = vsub.f32 %v4923_v48, %v569_v14  ;;  %v5111_v22 = vsub.f32 %v4926_v49, %v570_v28  ;;  %v707_v23 = vsel %vm447_vm0, %v631_v18, 0.0  ;;  %v710_v30 = vsel %vm447_vm0, %v632_v44, 0.0 }
  0xd5   : > { %705 = vadd.xlane.f32.xlu1 %v704_v12  ;;  %708 = vadd.xlane.f32.xlu0 %v707_v23  ;;  %v528_v0 = vpop.xlane.xlu0 %527  ;;  %v531_v16 = vpop.xlane.xlu1 %530 }
  0xd6   : > { %v571_v34 = vmul.f32 0.25, %v528_v0  ;;  %v572_v48 = vmul.f32 0.25, %v531_v16  ;;  %v633_v49 = vmul.f32 %v5108_v19, %v5108_v19  ;;  %v634_v35 = vmul.f32 %v5111_v22, %v5111_v22 }
  0xd8   : > { %v5123_v38 = vsub.f32 %v4933_v52, %v571_v34  ;;  %v5126_v39 = vsub.f32 %v4936_v53, %v572_v48  ;;  %v713_v42 = vsel %vm447_vm0, %v633_v49, 0.0  ;;  %v716_v36 = vsel %vm447_vm0, %v634_v35, 0.0 }
  0xd9   : > { %711 = vadd.xlane.f32.xlu1 %v710_v30  ;;  %714 = vadd.xlane.f32.xlu0 %v713_v42  ;;  %v534_v20 = vpop.xlane.xlu0 %533  ;;  %v537_v46 = vpop.xlane.xlu1 %536 }
  0xda   : > { %v573_v50 = vmul.f32 0.25, %v534_v20  ;;  %v574_v51 = vmul.f32 0.25, %v537_v46  ;;  %v635_v54 = vmul.f32 %v5123_v38, %v5123_v38  ;;  %v636_v52 = vmul.f32 %v5126_v39, %v5126_v39 }
  0xdc   : > { %v5135_v8 = vsub.f32 %v4943_v56, %v573_v50  ;;  %v5138_v53 = vsub.f32 %v4946_v57, %v574_v51  ;;  %v719_v58 = vsel %vm447_vm0, %v635_v54, 0.0  ;;  %v722_v40 = vsel %vm447_vm0, %v636_v52, 0.0 }
  0xdd   : > { %717 = vadd.xlane.f32.xlu1 %v716_v36  ;;  %720 = vadd.xlane.f32.xlu0 %v719_v58  ;;  %v540_v24 = vpop.xlane.xlu0 %539  ;;  %v543_v62 = vpop.xlane.xlu1 %542 }
  0xde   : > { %v575_v3 = vmul.f32 0.25, %v540_v24  ;;  %v576_v4 = vmul.f32 0.25, %v543_v62  ;;  %v637_v6 = vmul.f32 %v5135_v8, %v5135_v8  ;;  %v638_v56 = vmul.f32 %v5138_v53, %v5138_v53 }
  0xe0   : > { %v5147_v12 = vsub.f32 %v4953_v60, %v575_v3  ;;  %v5150_v57 = vsub.f32 %v4956_v61, %v576_v4  ;;  %v725_v14 = vsel %vm447_vm0, %v637_v6, 0.0  ;;  %v728_v28 = vsel %vm447_vm0, %v638_v56, 0.0 }
  0xe1   : > { %723 = vadd.xlane.f32.xlu1 %v722_v40  ;;  %726 = vadd.xlane.f32.xlu0 %v725_v14 }
  0xe2   : > { %v639_v18 = vmul.f32 %v5147_v12, %v5147_v12  ;;  %v640_v44 = vmul.f32 %v5150_v57, %v5150_v57 }
  0xe4   : > { %v731_v45 = vsel %vm447_vm0, %v639_v18, 0.0  ;;  %v734_v60 = vsel %vm447_vm0, %v640_v44, 0.0 }
  0xe5   : > { %729 = vadd.xlane.f32.xlu1 %v728_v28  ;;  %732 = vadd.xlane.f32.xlu0 %v731_v45  ;;  %v5164_v28 = vld [vmem:[%s7135_s1] ss:$0 sm:$0xff] }
  0xe9   : > { %735 = vadd.xlane.f32.xlu1 %v734_v60 }
 0x136   : > { %v643_v61 = vpop.xlane.xlu0 %642 }
 0x137   : > { %v737_v23 = vmul.f32 0.25, %v643_v61 }
 0x139   : > { %v769_v0 = vadd.f32 1e-05, %v737_v23 }
 0x13a   : > { %v646_v16 = vpop.xlane.xlu1 %645  ;;  %v649_v30 = vpop.xlane.xlu0 %648 }
 0x13b   : > { %4341 = vrsqrt.f32 %v769_v0  ;;  %v738_v32 = vmul.f32 0.25, %v646_v16  ;;  %v739_v34 = vmul.f32 0.25, %v649_v30 }
 0x13d   : > { %v770_v48 = vadd.f32 1e-05, %v738_v32  ;;  %v771_v49 = vadd.f32 1e-05, %v739_v34  ;;  %v5171_v32 = vld [vmem:[%s7136_s2] ss:$0 sm:$0xff] }
 0x13e   : > { %v652_v35 = vpop.xlane.xlu1 %651  ;;  %v655_v42 = vpop.xlane.xlu0 %654 }
 0x13f   : > { %4343 = vrsqrt.f32 %v770_v48  ;;  %v740_v20 = vmul.f32 0.25, %v652_v35  ;;  %v741_v46 = vmul.f32 0.25, %v655_v42 }
 0x140   : > { %4345 = vrsqrt.f32 %v771_v49 }
 0x141   : > { %v772_v36 = vadd.f32 1e-05, %v740_v20  ;;  %v773_v50 = vadd.f32 1e-05, %v741_v46 }
 0x142   : > { %v658_v51 = vpop.xlane.xlu1 %657  ;;  %v661_v54 = vpop.xlane.xlu0 %660 }
 0x143   : > { %4347 = vrsqrt.f32 %v772_v36  ;;  %v742_v52 = vmul.f32 0.25, %v658_v51  ;;  %v743_v58 = vmul.f32 0.25, %v661_v54 }
 0x144   : > { %4349 = vrsqrt.f32 %v773_v50 }
 0x145   : > { %v4342_v24 = vpop.eup %4341  ;;  %v774_v62 = vadd.f32 1e-05, %v742_v52  ;;  %v775_v40 = vadd.f32 1e-05, %v743_v58 }
 0x146   : > { %v664_v3 = vpop.xlane.xlu1 %663  ;;  %v667_v4 = vpop.xlane.xlu0 %666  ;;  %v833_v6 = vmul.f32 %v4342_v24, %v4963_v10 }
 0x147   : > { %4351 = vrsqrt.f32 %v774_v62  ;;  %v744_v56 = vmul.f32 0.25, %v664_v3  ;;  %v745_v14 = vmul.f32 0.25, %v667_v4 }
 0x148   : > { %4353 = vrsqrt.f32 %v775_v40  ;;  %v872_v16 = vmul.f32 %v5164_v28, %v833_v6 }
 0x149   : > { %v4344_v18 = vpop.eup %4343  ;;  %v776_v44 = vadd.f32 1e-05, %v744_v56  ;;  %v777_v45 = vadd.f32 1e-05, %v745_v14 }
 0x14a   : > { %v4346_v60 = vpop.eup %4345  ;;  %v670_v61 = vpop.xlane.xlu1 %669  ;;  %v834_v0 = vmul.f32 %v4344_v18, %v4973_v26  ;;  %v911_v36 = vadd.f32 %v5171_v32, %v872_v16 }
 0x14b   : > { %v673_v23 = vpop.xlane.xlu0 %672  ;;  %4355 = vrsqrt.f32 %v776_v44  ;;  %v746_v10 = vmul.f32 0.25, %v670_v61  ;;  %v835_v34 = vmul.f32 %v4346_v60, %v4966_v11 }
 0x14c   : > { %v747_v30 = vmul.f32 0.25, %v673_v23  ;;  %4357 = vrsqrt.f32 %v777_v45  ;;  %v873_v48 = vmul.f32 %v5164_v28, %v834_v0 }
 0x14d   : > { %v4348_v49 = vpop.eup %4347  ;;  %v778_v35 = vadd.f32 1e-05, %v746_v10  ;;  %v874_v54 = vmul.f32 %v5164_v28, %v835_v34 }
 0x14e   : > { %v779_v42 = vadd.f32 1e-05, %v747_v30  ;;  %v4350_v20 = vpop.eup %4349  ;;  %v676_v26 = vpop.xlane.xlu1 %675  ;;  %v912_v50 = vadd.f32 %v5171_v32, %v873_v48  ;;  %v836_v51 = vmul.f32 %v4348_v49, %v4976_v27 }
 0x14f   : > { %v679_v46 = vpop.xlane.xlu0 %678  ;;  %4359 = vrsqrt.f32 %v778_v35  ;;  %v748_v52 = vmul.f32 0.25, %v676_v26  ;;  %v837_v62 = vmul.f32 %v4350_v20, %v4985_v2  ;;  %v913_v27 = vadd.f32 %v5171_v32, %v874_v54 }
 0x150   : > { %v749_v11 = vmul.f32 0.25, %v679_v46  ;;  %4361 = vrsqrt.f32 %v779_v42  ;;  %v943_v58 = vpack.c.bf16 %v912_v50, %v911_v36  ;;  %v875_v24 = vmul.f32 %v5164_v28, %v836_v51 }
 0x151   : > { %v4352_v40 = vpop.eup %4351  ;;  %v780_v3 = vadd.f32 1e-05, %v748_v52  ;;  %v876_v45 = vmul.f32 %v5164_v28, %v837_v62 }
 0x152   : > { %v781_v4 = vadd.f32 1e-05, %v749_v11  ;;  %v4354_v6 = vpop.eup %4353  ;;  %v682_v56 = vpop.xlane.xlu1 %681  ;;  %4212 = vmatprep.mubr.msk.bf16.mxu0 %vm447_vm0, %v943_v58  ;;  %v914_v18 = vadd.f32 %v5171_v32, %v875_v24  ;;  %v838_v44 = vmul.f32 %v4352_v40, %v4988_v5 }
 0x153   : > { %v685_v14 = vpop.xlane.xlu0 %684  ;;  %4363 = vrsqrt.f32 %v780_v3  ;;  %v750_v60 = vmul.f32 0.25, %v682_v56  ;;  %v839_v2 = vmul.f32 %v4354_v6, %v4997_v55  ;;  %v915_v5 = vadd.f32 %v5171_v32, %v876_v45 }
 0x154   : > { %v751_v61 = vmul.f32 0.25, %v685_v14  ;;  %4365 = vrsqrt.f32 %v781_v4  ;;  %v944_v23 = vpack.c.bf16 %v914_v18, %v913_v27  ;;  %v877_v0 = vmul.f32 %v5164_v28, %v838_v44 }
 0x155   : > { %v4356_v16 = vpop.eup %4355  ;;  %v782_v10 = vadd.f32 1e-05, %v750_v60  ;;  %v878_v55 = vmul.f32 %v5164_v28, %v839_v2 }
 0x156   : > { %v783_v30 = vadd.f32 1e-05, %v751_v61  ;;  %v4358_v34 = vpop.eup %4357  ;;  %v688_v48 = vpop.xlane.xlu1 %687  ;;  %4213 = vmatmul.mubr.msk.bf16.vlgmr.msra.gmra.mrb[0].mxu0 %vm447_vm0, %v944_v23  ;;  %v916_v35 = vadd.f32 %v5171_v32, %v877_v0  ;;  %v840_v42 = vmul.f32 %v4356_v16, %v5000_v9 }
 0x157   : > { %v691_v49 = vpop.xlane.xlu0 %690  ;;  %4367 = vrsqrt.f32 %v782_v10  ;;  %v752_v20 = vmul.f32 0.25, %v688_v48  ;;  %v841_v50 = vmul.f32 %v4358_v34, %v5009_v7  ;;  %v917_v9 = vadd.f32 %v5171_v32, %v878_v55 }
 0x158   : > { %v753_v26 = vmul.f32 0.25, %v691_v49  ;;  %4369 = vrsqrt.f32 %v783_v30  ;;  %v945_v46 = vpack.c.bf16 %v916_v35, %v915_v5  ;;  %v879_v36 = vmul.f32 %v5164_v28, %v840_v42 }
 0x159   : > { %v4360_v51 = vpop.eup %4359  ;;  %v784_v54 = vadd.f32 1e-05, %v752_v20  ;;  %v880_v3 = vmul.f32 %v5164_v28, %v841_v50 }
 0x15a   : > { %v785_v52 = vadd.f32 1e-05, %v753_v26  ;;  %v4362_v11 = vpop.eup %4361  ;;  %v694_v58 = vpop.xlane.xlu1 %693  ;;  %4216 = vmatprep.mubr.msk.bf16.mxu0 %vm447_vm0, %v945_v46  ;;  %v918_v62 = vadd.f32 %v5171_v32, %v879_v36  ;;  %v842_v40 = vmul.f32 %v4360_v51, %v5012_v13 }
 0x15b   : > { %v697_v24 = vpop.xlane.xlu0 %696  ;;  %4371 = vrsqrt.f32 %v784_v54  ;;  %v754_v4 = vmul.f32 0.25, %v694_v58  ;;  %v843_v7 = vmul.f32 %v4362_v11, %v5021_v1  ;;  %v919_v13 = vadd.f32 %v5171_v32, %v880_v3 }
 0x15c   : > { %v755_v6 = vmul.f32 0.25, %v697_v24  ;;  %4373 = vrsqrt.f32 %v785_v52  ;;  %v946_v56 = vpack.c.bf16 %v918_v62, %v917_v9  ;;  %v881_v14 = vmul.f32 %v5164_v28, %v842_v40 }
 0x15d   : > { %v4364_v27 = vpop.eup %4363  ;;  %v786_v18 = vadd.f32 1e-05, %v754_v4  ;;  %v882_v1 = vmul.f32 %v5164_v28, %v843_v7 }
 0x15e   : > { %v787_v44 = vadd.f32 1e-05, %v755_v6  ;;  %v4366_v45 = vpop.eup %4365  ;;  %v700_v60 = vpop.xlane.xlu1 %699  ;;  %4217 = vmatmul.mubr.msk.bf16.gmra.mrb[4].mxu0 %vm447_vm0, %v946_v56  ;;  %v920_v2 = vadd.f32 %v5171_v32, %v881_v14  ;;  %v844_v23 = vmul.f32 %v4364_v27, %v5024_v17 }
 0x15f   : > { %v703_v61 = vpop.xlane.xlu0 %702  ;;  %4375 = vrsqrt.f32 %v786_v18  ;;  %v756_v0 = vmul.f32 0.25, %v700_v60  ;;  %v845_v34 = vmul.f32 %v4366_v45, %v5033_v43  ;;  %v921_v17 = vadd.f32 %v5171_v32, %v882_v1 }
 0x160   : > { %v757_v16 = vmul.f32 0.25, %v703_v61  ;;  %4377 = vrsqrt.f32 %v787_v44  ;;  %v947_v10 = vpack.c.bf16 %v920_v2, %v919_v13  ;;  %v883_v30 = vmul.f32 %v5164_v28, %v844_v23 }
 0x161   : > { %v4368_v48 = vpop.eup %4367  ;;  %v788_v49 = vadd.f32 1e-05, %v756_v0  ;;  %v884_v46 = vmul.f32 %v5164_v28, %v845_v34 }
 0x162   : > { %v789_v5 = vadd.f32 1e-05, %v757_v16  ;;  %v4370_v35 = vpop.eup %4369  ;;  %v706_v42 = vpop.xlane.xlu1 %705  ;;  %4220 = vmatprep.mubr.msk.bf16.mxu0 %vm447_vm0, %v947_v10  ;;  %v922_v20 = vadd.f32 %v5171_v32, %v883_v30  ;;  %v846_v26 = vmul.f32 %v4368_v48, %v5036_v21 }
 0x163   : > { %v709_v55 = vpop.xlane.xlu0 %708  ;;  %4379 = vrsqrt.f32 %v788_v49  ;;  %v758_v36 = vmul.f32 0.25, %v706_v42  ;;  %v847_v43 = vmul.f32 %v4370_v35, %v5045_v59  ;;  %v923_v21 = vadd.f32 %v5171_v32, %v884_v46 }
 0x164   : > { %v759_v50 = vmul.f32 0.25, %v709_v55  ;;  %4381 = vrsqrt.f32 %v789_v5  ;;  %v948_v51 = vpack.c.bf16 %v922_v20, %v921_v17  ;;  %v885_v54 = vmul.f32 %v5164_v28, %v846_v26 }
 0x165   : > { %v4372_v52 = vpop.eup %4371  ;;  %v790_v11 = vadd.f32 1e-05, %v758_v36  ;;  %v886_v59 = vmul.f32 %v5164_v28, %v847_v43 }
 0x166   : > { %v791_v58 = vadd.f32 1e-05, %v759_v50  ;;  %v4374_v24 = vpop.eup %4373  ;;  %v712_v9 = vpop.xlane.xlu1 %711  ;;  %4221 = vmatmul.mubr.msk.bf16.gmra.mrb[8].mxu0 %vm447_vm0, %v948_v51  ;;  %v924_v40 = vadd.f32 %v5171_v32, %v885_v54  ;;  %v848_v3 = vmul.f32 %v4372_v52, %v5048_v25 }
 0x167   : > { %v715_v62 = vpop.xlane.xlu0 %714  ;;  %4383 = vrsqrt.f32 %v790_v11  ;;  %v760_v4 = vmul.f32 0.25, %v712_v9  ;;  %v849_v14 = vmul.f32 %v4374_v24, %v5057_v15  ;;  %v925_v25 = vadd.f32 %v5171_v32, %v886_v59 }
 0x168   : > { %v761_v6 = vmul.f32 0.25, %v715_v62  ;;  %4385 = vrsqrt.f32 %v791_v58  ;;  %v949_v7 = vpack.c.bf16 %v924_v40, %v923_v21  ;;  %v887_v56 = vmul.f32 %v5164_v28, %v848_v3 }
 0x169   : > { %v4376_v27 = vpop.eup %4375  ;;  %v792_v18 = vadd.f32 1e-05, %v760_v4  ;;  %v888_v23 = vmul.f32 %v5164_v28, %v849_v14 }
 0x16a   : > { %v793_v44 = vadd.f32 1e-05, %v761_v6  ;;  %v4378_v45 = vpop.eup %4377  ;;  %v718_v60 = vpop.xlane.xlu1 %717  ;;  %4224 = vmatprep.mubr.msk.bf16.mxu0 %vm447_vm0, %v949_v7  ;;  %v926_v13 = vadd.f32 %v5171_v32, %v887_v56  ;;  %v850_v2 = vmul.f32 %v4376_v27, %v5060_v29 }
 0x16b   : > { %v721_v61 = vpop.xlane.xlu0 %720  ;;  %4387 = vrsqrt.f32 %v792_v18  ;;  %v762_v1 = vmul.f32 0.25, %v718_v60  ;;  %v851_v15 = vmul.f32 %v4378_v45, %v5069_v31  ;;  %v927_v29 = vadd.f32 %v5171_v32, %v888_v23 }
 0x16c   : > { %v763_v0 = vmul.f32 0.25, %v721_v61  ;;  %4389 = vrsqrt.f32 %v793_v44  ;;  %v950_v16 = vpack.c.bf16 %v926_v13, %v925_v25  ;;  %v889_v10 = vmul.f32 %v5164_v28, %v850_v2 }
 0x16d   : > { %v4380_v30 = vpop.eup %4379  ;;  %v794_v34 = vadd.f32 1e-05, %v762_v1  ;;  %v890_v31 = vmul.f32 %v5164_v28, %v851_v15 }
 0x16e   : > { %v795_v48 = vadd.f32 1e-05, %v763_v0  ;;  %v4382_v49 = vpop.eup %4381  ;;  %v724_v5 = vpop.xlane.xlu1 %723  ;;  %4225 = vmatmul.mubr.msk.bf16.gmra.mrb[12].mxu0 %vm447_vm0, %v950_v16  ;;  %v928_v42 = vadd.f32 %v5171_v32, %v889_v10  ;;  %v852_v55 = vmul.f32 %v4380_v30, %v5072_v33 }
 0x16f   : > { %v727_v35 = vpop.xlane.xlu0 %726  ;;  %4391 = vrsqrt.f32 %v794_v34  ;;  %v764_v17 = vmul.f32 0.25, %v724_v5  ;;  %v853_v36 = vmul.f32 %v4382_v49, %v5081_v47  ;;  %v929_v33 = vadd.f32 %v5171_v32, %v890_v31 }
 0x170   : > { %v765_v20 = vmul.f32 0.25, %v727_v35  ;;  %4393 = vrsqrt.f32 %v795_v48  ;;  %v951_v26 = vpack.c.bf16 %v928_v42, %v927_v29  ;;  %v891_v46 = vmul.f32 %v5164_v28, %v852_v55 }
 0x171   : > { %v4384_v50 = vpop.eup %4383  ;;  %v796_v43 = vadd.f32 1e-05, %v764_v17  ;;  %v892_v9 = vmul.f32 %v5164_v28, %v853_v36 }
 0x172   : > { %v797_v51 = vadd.f32 1e-05, %v765_v20  ;;  %v4386_v54 = vpop.eup %4385  ;;  %v730_v52 = vpop.xlane.xlu1 %729  ;;  %4228 = vmatprep.mubr.msk.bf16.mxu1 %vm447_vm0, %v951_v26  ;;  %v930_v58 = vadd.f32 %v5171_v32, %v891_v46  ;;  %v854_v24 = vmul.f32 %v4384_v50, %v5084_v37 }
 0x173   : > { %v733_v11 = vpop.xlane.xlu0 %732  ;;  %4395 = vrsqrt.f32 %v796_v43  ;;  %v766_v62 = vmul.f32 0.25, %v730_v52  ;;  %v855_v47 = vmul.f32 %v4386_v54, %v5093_v63  ;;  %v931_v37 = vadd.f32 %v5171_v32, %v892_v9  ;;  %v1334_v9 = vld [vmem:[%s7138_s4] sm:$0xf] }
 0x174   : > { %v767_v21 = vmul.f32 0.25, %v733_v11  ;;  %4397 = vrsqrt.f32 %v797_v51  ;;  %v952_v40 = vpack.c.bf16 %v930_v58, %v929_v33  ;;  %v893_v3 = vmul.f32 %v5164_v28, %v854_v24  ;;  %v2412_v11 = vld [vmem:[%s7140_s6] sm:$0xf] }
 0x175   : > { %v4388_v59 = vpop.eup %4387  ;;  %v798_v4 = vadd.f32 1e-05, %v766_v62  ;;  %v894_v18 = vmul.f32 %v5164_v28, %v855_v47  ;;  %4316 = vmatprep.subr.msk.bf16.mxu1 %vm2461_vm2, %v2412_v11 }
 0x176   : > { %v799_v6 = vadd.f32 1e-05, %v767_v21  ;;  %v4390_v7 = vpop.eup %4389  ;;  %v736_v56 = vpop.xlane.xlu1 %735  ;;  %4229 = vmatmul.mubr.msk.bf16.vlgmr.msra.gmra.mrb[0].mxu1 %vm447_vm0, %v952_v40  ;;  %v932_v14 = vadd.f32 %v5171_v32, %v893_v3  ;;  %v856_v27 = vmul.f32 %v4388_v59, %v5096_v41 }
 0x177   : > { %4399 = vrsqrt.f32 %v798_v4  ;;  %v768_v63 = vmul.f32 0.25, %v736_v56  ;;  %v857_v44 = vmul.f32 %v4390_v7, %v5108_v19  ;;  %v933_v2 = vadd.f32 %v5171_v32, %v894_v18 }
 0x178   : > { %4401 = vrsqrt.f32 %v799_v6  ;;  %v953_v45 = vpack.c.bf16 %v932_v14, %v931_v37  ;;  %v895_v60 = vmul.f32 %v5164_v28, %v856_v27 }
 0x179   : > { %v4392_v61 = vpop.eup %4391  ;;  %v800_v25 = vadd.f32 1e-05, %v768_v63  ;;  %v896_v1 = vmul.f32 %v5164_v28, %v857_v44 }
 0x17a   : > { %v4394_v13 = vpop.eup %4393  ;;  %4232 = vmatprep.mubr.msk.bf16.mxu1 %vm447_vm0, %v953_v45  ;;  %v934_v23 = vadd.f32 %v5171_v32, %v895_v60  ;;  %v858_v41 = vmul.f32 %v4392_v61, %v5111_v22 }
 0x17b   : > { %4403 = vrsqrt.f32 %v800_v25  ;;  %v859_v19 = vmul.f32 %v4394_v13, %v5123_v38  ;;  %v935_v30 = vadd.f32 %v5171_v32, %v896_v1 }
 0x17c   : > { %v954_v0 = vpack.c.bf16 %v934_v23, %v933_v2  ;;  %v897_v15 = vmul.f32 %v5164_v28, %v858_v41 }
 0x17d   : > { %v4396_v16 = vpop.eup %4395  ;;  %v898_v22 = vmul.f32 %v5164_v28, %v859_v19 }
 0x17e   : > { %v4398_v10 = vpop.eup %4397  ;;  %4233 = vmatmul.mubr.msk.bf16.gmra.mrb[4].mxu1 %vm447_vm0, %v954_v0  ;;  %v936_v34 = vadd.f32 %v5171_v32, %v897_v15  ;;  %v860_v48 = vmul.f32 %v4396_v16, %v5126_v39 }
 0x17f   : > { %v861_v49 = vmul.f32 %v4398_v10, %v5135_v8  ;;  %v937_v42 = vadd.f32 %v5171_v32, %v898_v22 }
 0x180   : > { %v955_v5 = vpack.c.bf16 %v936_v34, %v935_v30  ;;  %v899_v38 = vmul.f32 %v5164_v28, %v860_v48 }
 0x181   : > { %v4400_v35 = vpop.eup %4399  ;;  %v900_v17 = vmul.f32 %v5164_v28, %v861_v49 }
 0x182   : > { %v4402_v29 = vpop.eup %4401  ;;  %4236 = vmatprep.mubr.msk.bf16.mxu1 %vm447_vm0, %v955_v5  ;;  %v938_v55 = vadd.f32 %v5171_v32, %v899_v38  ;;  %v862_v31 = vmul.f32 %v4400_v35, %v5138_v53 }
 0x183   : > { %v863_v39 = vmul.f32 %v4402_v29, %v5147_v12  ;;  %v939_v46 = vadd.f32 %v5171_v32, %v900_v17 }
 0x184   : > { %v956_v20 = vpack.c.bf16 %v938_v55, %v937_v42  ;;  %v901_v8 = vmul.f32 %v5164_v28, %v862_v31 }
 0x185   : > { %v4404_v26 = vpop.eup %4403  ;;  %v902_v43 = vmul.f32 %v5164_v28, %v863_v39 }
 0x186   : > { %4237 = vmatmul.mubr.msk.bf16.gmra.mrb[8].mxu1 %vm447_vm0, %v956_v20  ;;  %v940_v36 = vadd.f32 %v5171_v32, %v901_v8  ;;  %v864_v50 = vmul.f32 %v4404_v26, %v5150_v57  ;;  %v2463_v57 = vsel %vm2461_vm2, %v2412_v11, 0 }
 0x187   : > { %v941_v12 = vadd.f32 %v5171_v32, %v902_v43  ;;  %4245 = vmatpush3.bf16.msra.mxu1 %v2463_v57 }
 0x188   : > { %v957_v51 = vpack.c.bf16 %v940_v36, %v939_v46  ;;  %v903_v53 = vmul.f32 %v5164_v28, %v864_v50  ;;  %v7147_v28 = vlaneseq }
 0x18a   : > { %4240 = vmatprep.mubr.msk.bf16.mxu1 %vm447_vm0, %v957_v51  ;;  %v942_v54 = vadd.f32 %v5171_v32, %v903_v53  ;;  %v5288_v33 = vshrl.u32 %v7147_v28, 7 }
 0x18c   : > { %v958_v52 = vpack.c.bf16 %v942_v54, %v941_v12  ;;  %7194 = vst [vmem:[#allocation7_spill] sm:$0xff] %v5288_v33  ;;  %v5291_v58 = vsub.s32 1, %v5288_v33  ;;  %v5294_v32 = vsub.s32 2, %v5288_v33  ;;  %v5297_v24 = vsub.s32 3, %v5288_v33 }
 0x18d   : > { %v5303_v62 = vsub.s32 0, %v5288_v33 }
 0x18e   : > { %4241 = vmatmul.mubr.msk.bf16.gmra.mrb[12].mxu1 %vm447_vm0, %v958_v52  ;;  %7195 = vst [vmem:[#allocation8_spill] sm:$0xff] %v5291_v58  ;;  %7196 = vst [vmem:[#allocation9_spill] sm:$0xff] %v5294_v32  ;;  %v5309_v40 = vrot.slane %v1334_v9, %v5291_v58  ;;  %v5312_v3 = vrot.slane %v1334_v9, %v5294_v32  ;;  %v5315_v59 = vrot.slane %v1334_v9, %v5297_v24 }
 0x18f   : > { %7197 = vst [vmem:[#allocation10_spill] sm:$0xff] %v5297_v24  ;;  %7198 = vst [vmem:[#allocation11_spill] sm:$0xff] %v5303_v62  ;;  %v5319_v6 = vrot.slane %v1334_v9, %v5303_v62 }
 0x229   : > { %v4214_v21 = vpop.f32.mrb[0].mxu0 }
 0x22a   : > { %1209 = vrot.lane.b32.xlu1 %v4214_v21, %s4714_s23  ;;  %v5306_v47 = vpop.f32.mrb[1].mxu0  ;;  %v1339_v14 = vrot.slane %v4214_v21, 5 }
 0x22b   : > { %v1336_v4 = vrot.slane %v5306_v47, 5  ;;  %v4215_v7 = vpop.f32.mrb[2].mxu0 }
 0x22c   : > { %v1341_v56 = vrot.slane %v4215_v7, 5  ;;  %v5321_v37 = vpop.f32.mrb[3].mxu0 }
 0x22d   : > { %v1432_v27 = vsel %vm1335_vm3, 0.0, %v1336_v4  ;;  %v1337_v18 = vrot.slane %v5321_v37, 5 }
 0x22e   : > { %v1505_v63 = vmul.f32 %v5309_v40, %v1432_v27  ;;  %v1705_v44 = vmul.f32 %v5312_v3, %v1432_v27  ;;  %v5328_v45 = vmul.f32 %v5315_v59, %v1432_v27  ;;  %1211 = vrot.lane.b32.xlu1 %v4215_v7, %s4714_s23  ;;  %v1437_v60 = vmul.f32 %v5319_v6, %v1432_v27 }
 0x22f   : > { %v1342_v61 = vsel %vm1335_vm3, %v1339_v14, %v1341_v56  ;;  %v1338_v25 = vsel %vm1335_vm3, %v1336_v4, %v1337_v18  ;;  %v1340_v13 = vsel %vm1335_vm3, %v1337_v18, %v1339_v14 }
 0x230   : > { %v1572_v2 = vrot.slane %v1505_v63, 1  ;;  %v1772_v23 = vrot.slane %v1705_v44, 2  ;;  %v1440_v1 = vmul.f32 %v5319_v6, %v1342_v61  ;;  %v1508_v19 = vmul.f32 %v5309_v40, %v1342_v61 }
 0x231   : > { %v5339_v0 = vmul.f32 %v5312_v3, %v1342_v61  ;;  %v5342_v15 = vmul.f32 %v5315_v59, %v1342_v61  ;;  %v1438_v16 = vmul.f32 %v5319_v6, %v1338_v25  ;;  %v5345_v10 = vpop.f32.mrb[4].mxu0  ;;  %v1439_v30 = vmul.f32 %v5319_v6, %v1340_v13 }
 0x232   : > { %v1506_v34 = vmul.f32 %v5309_v40, %v1338_v25  ;;  %v1507_v48 = vmul.f32 %v5309_v40, %v1340_v13  ;;  %v1706_v22 = vmul.f32 %v5312_v3, %v1338_v25  ;;  %v5351_v49 = vpop.f32.mrb[5].mxu0  ;;  %v1577_v5 = vrot.slane %v1508_v19, 1 }
 0x233   : > { %v1777_v38 = vrot.slane %v5339_v0, 2  ;;  %v1977_v35 = vrot.slane %v5342_v15, 3  ;;  %v1707_v29 = vmul.f32 %v5312_v3, %v1340_v13  ;;  %v5356_v42 = vpop.f32.mrb[6].mxu0  ;;  %v5359_v39 = vmul.f32 %v5315_v59, %v1338_v25 }
 0x234   : > { %v1573_v55 = vrot.slane %v1506_v34, 1  ;;  %v1575_v31 = vrot.slane %v1507_v48, 1  ;;  %v1773_v17 = vrot.slane %v1706_v22, 2  ;;  %v5361_v20 = vpop.f32.mrb[7].mxu0  ;;  %v5364_v26 = vmul.f32 %v5315_v59, %v1340_v13 }
 0x235   : > { %v1775_v8 = vrot.slane %v1707_v29, 2  ;;  %v1347_v46 = vrot.slane %v5345_v10, 5  ;;  %v1343_v36 = vrot.slane %v5351_v49, 5  ;;  %v1349_v25 = vrot.slane %v5356_v42, 5 }
 0x236   : > { %v1574_v50 = vsel %vm1571_vm4, %v1572_v2, %v1573_v55  ;;  %v1576_v43 = vsel %vm1571_vm4, %v1573_v55, %v1575_v31  ;;  %v1578_v51 = vsel %vm1571_vm4, %v1575_v31, %v1577_v5  ;;  %v5372_v53 = vsel %vm1771_vm5, %v1772_v23, %v1773_v17 }
 0x237   : > { %v5374_v12 = vadd.f32 %v1574_v50, %v1437_v60  ;;  %v1670_v54 = vadd.f32 %v1576_v43, %v1438_v16  ;;  %v1671_v52 = vadd.f32 %v1578_v51, %v1439_v30  ;;  %v1776_v11 = vsel %vm1771_vm5, %v1773_v17, %v1775_v8  ;;  %v5395_v60 = vld [vmem:[%s7139_s5] ss:$0 sm:$0xff] }
 0x238   : > { %v1778_v57 = vsel %vm1771_vm5, %v1775_v8, %v1777_v38  ;;  %v7149_v21 = vrot.slane %v5364_v26, 3  ;;  %v1344_v4 = vsel %vm1335_vm3, %v1341_v56, %v1343_v36  ;;  %v1345_v19 = vrot.slane %v5361_v20, 5 }
 0x239   : > { %v5381_v7 = vadd.f32 %v1776_v11, %v1670_v54  ;;  %v1871_v14 = vadd.f32 %v1778_v57, %v1671_v52  ;;  %v5384_v27 = vmul.f32 %v5319_v6, %v1344_v4  ;;  %v1509_v18 = vmul.f32 %v5309_v40, %v1344_v4  ;;  %v5387_v63 = vpop.f32.mrb[8].mxu0 }
 0x23a   : > { %v1978_v44 = vsel %vm1971_vm6, %v7149_v21, %v1977_v35  ;;  %v1709_v56 = vmul.f32 %v5312_v3, %v1344_v4  ;;  %v5399_v61 = vmul.f32 %v5315_v59, %v1344_v4  ;;  %v5402_v13 = vpop.f32.mrb[9].mxu0  ;;  %v1355_v0 = vrot.slane %v5387_v63, 5 }
 0x23b   : > { %v2071_v2 = vadd.f32 %v1978_v44, %v1871_v14  ;;  %v1579_v23 = vrot.slane %v1509_v18, 1  ;;  %v5406_v15 = vpop.f32.mrb[10].mxu0  ;;  %v1350_v34 = vsel %vm1335_vm3, %v1347_v46, %v1349_v25  ;;  %v1351_v48 = vrot.slane %v5402_v13, 5 }
 0x23c   : > { %7199 = vst [vmem:[#allocation12_spill] sm:$0xff] %v5399_v61  ;;  %v1779_v16 = vrot.slane %v1709_v56, 2  ;;  %v7148_v30 = vrot.slane %v5399_v61, 3  ;;  %v5411_v22 = vpop.f32.mrb[11].mxu0  ;;  %v5418_v31 = vmul.f32 %v5319_v6, %v1350_v34  ;;  %v5421_v17 = vmul.f32 %v5309_v40, %v1350_v34 }
 0x23d   : > { %v5414_v29 = vadd.f32 %v5395_v60, %v2071_v2  ;;  %v1580_v55 = vsel %vm1571_vm4, %v1577_v5, %v1579_v23  ;;  %v5428_v51 = vmul.f32 %v5312_v3, %v1350_v34  ;;  %v5433_v52 = vmul.f32 %v5315_v59, %v1350_v34 }
 0x23e   : > { %v1672_v8 = vadd.f32 %v1580_v55, %v1440_v1  ;;  %v1780_v50 = vsel %vm1771_vm5, %v1777_v38, %v1779_v16  ;;  %v1980_v43 = vsel %vm1971_vm6, %v1977_v35, %v7148_v30  ;;  %v1585_v5 = vrot.slane %v5421_v17, 1 }
 0x23f   : > { %v2142_v54 = vsub.f32 0.0, %v5414_v29  ;;  %7200 = vst [vmem:[#allocation13_spill] sm:$0xff] %v5433_v52  ;;  %v1346_v11 = vsel %vm1335_vm3, %v1343_v36, %v1345_v19  ;;  %v1785_v1 = vrot.slane %v5428_v51, 2  ;;  %v1348_v38 = vsel %vm1335_vm3, %v1345_v19, %v1347_v46 }
 0x240   : > { %v1872_v57 = vadd.f32 %v1780_v50, %v1672_v8  ;;  %v1442_v4 = vmul.f32 %v5319_v6, %v1346_v11  ;;  %v1443_v18 = vmul.f32 %v5319_v6, %v1348_v38  ;;  %v1510_v44 = vmul.f32 %v5309_v40, %v1346_v11 }
 0x241   : > { %v2176_v35 = vmul.f32 1.442695, %v2142_v54  ;;  %v5442_v56 = vpop.f32.mrb[12].mxu0  ;;  %v1511_v34 = vmul.f32 %v5309_v40, %v1348_v38  ;;  %v1710_v36 = vmul.f32 %v5312_v3, %v1346_v11  ;;  %v1711_v55 = vmul.f32 %v5312_v3, %v1348_v38 }
 0x242   : > { %v2072_v2 = vadd.f32 %v1980_v43, %v1872_v57  ;;  %v5447_v17 = vpop.f32.mrb[13].mxu0  ;;  %v1581_v46 = vrot.slane %v1510_v44, 1  ;;  %v5450_v19 = vmul.f32 %v5315_v59, %v1346_v11  ;;  %v5453_v8 = vmul.f32 %v5315_v59, %v1348_v38 }
 0x243   : > { %4405 = vpow2.f32 %v2176_v35  ;;  %v5455_v50 = vpop.f32.mrb[14].mxu0  ;;  %v1583_v54 = vrot.slane %v1511_v34, 1  ;;  %v1781_v57 = vrot.slane %v1710_v36, 2  ;;  %v1783_v28 = vrot.slane %v1711_v55, 2 }
 0x244   : > { %7201 = vst [vmem:[#allocation14_spill] sm:$0xff] %v5450_v19  ;;  %7202 = vst [vmem:[#allocation15_spill] sm:$0xff] %v5453_v8  ;;  %v5458_v43 = vadd.f32 %v5395_v60, %v2072_v2  ;;  %v5460_v14 = vpop.f32.mrb[15].mxu0  ;;  %v1582_v30 = vsel %vm1571_vm4, %v1579_v23, %v1581_v46  ;;  %v1352_v38 = vsel %vm1335_vm3, %v1349_v25, %v1351_v48 }
 0x245   : > { %v1584_v2 = vsel %vm1571_vm4, %v1581_v46, %v1583_v54  ;;  %v1586_v34 = vsel %vm1571_vm4, %v1583_v54, %v1585_v5  ;;  %v5472_v36 = vadd.f32 %v1582_v30, %v5384_v27  ;;  %v5475_v23 = vsel %vm1771_vm5, %v1779_v16, %v1781_v57 }
 0x246   : > { %v2143_v44 = vsub.f32 0.0, %v5458_v43  ;;  %v1674_v55 = vadd.f32 %v1584_v2, %v1442_v4  ;;  %v1675_v21 = vadd.f32 %v1586_v34, %v1443_v18  ;;  %7204 = vst [vmem:[#allocation17_spill] sm:$0xff] %v5475_v23  ;;  %v1784_v11 = vsel %vm1771_vm5, %v1781_v57, %v1783_v28 }
 0x247   : > { %7203 = vst [vmem:[#allocation16_spill] sm:$0xff] %v5472_v36  ;;  %v1786_v25 = vsel %vm1771_vm5, %v1783_v28, %v1785_v1  ;;  %v1445_v41 = vmul.f32 %v5319_v6, %v1352_v38  ;;  %v1513_v46 = vmul.f32 %v5309_v40, %v1352_v38  ;;  %v1713_v30 = vmul.f32 %v5312_v3, %v1352_v38 }
 0x248   : > { %v2178_v35 = vmul.f32 1.442695, %v2143_v44  ;;  %v5483_v54 = vadd.f32 %v1784_v11, %v1674_v55  ;;  %v5485_v27 = vadd.f32 %v1786_v25, %v1675_v21  ;;  %v5489_v16 = vmul.f32 %v5315_v59, %v1352_v38 }
 0x249   : > { %v5491_v4 = vpop.f32.mrb[0].mxu1  ;;  %v1587_v18 = vrot.slane %v1513_v46, 1  ;;  %v1357_v57 = vrot.slane %v5406_v15, 5  ;;  %v1353_v28 = vrot.slane %v5411_v22, 5  ;;  %v1787_v21 = vrot.slane %v1713_v30, 2 }
 0x24a   : > { %7205 = vst [vmem:[#allocation18_spill] sm:$0xff] %v5483_v54  ;;  %7206 = vst [vmem:[#allocation19_spill] sm:$0xff] %v5485_v27  ;;  %4407 = vpow2.f32 %v2178_v35  ;;  %1241 = vrot.lane.b32.xlu0 %v5491_v4, %s4714_s23  ;;  %v5497_v11 = vpop.f32.mrb[1].mxu1 }
 0x24b   : > { %7207 = vst [vmem:[#allocation20_spill] sm:$0xff] %v5489_v16  ;;  %v5502_v34 = vpop.f32.mrb[2].mxu1  ;;  %v1588_v35 = vsel %vm1571_vm4, %v1585_v5, %v1587_v18  ;;  %v1358_v55 = vsel %vm1335_vm3, %v1355_v0, %v1357_v57  ;;  %v1354_v25 = vsel %vm1335_vm3, %v1351_v48, %v1353_v28  ;;  %v1356_v46 = vsel %vm1335_vm3, %v1353_v28, %v1355_v0 }
 0x24c   : > { %1243 = vrot.lane.b32.xlu1 %v5502_v34, %s4714_s23  ;;  %v5516_v30 = vpop.f32.mrb[3].mxu1  ;;  %v5519_v5 = vadd.f32 %v1588_v35, %v5418_v31  ;;  %v5524_v9 = vsel %vm1771_vm5, %v1785_v1, %v1787_v21  ;;  %v5527_v48 = vmul.f32 %v5319_v6, %v1358_v55  ;;  %v5530_v2 = vmul.f32 %v5309_v40, %v1358_v55 }
 0x24d   : > { %v4406_v44 = vpop.eup %4405  ;;  %7209 = vst [vmem:[#allocation22_spill] sm:$0xff] %v5524_v9  ;;  %v5533_v28 = vmul.f32 %v5312_v3, %v1358_v55  ;;  %v5536_v38 = vmul.f32 %v5315_v59, %v1358_v55  ;;  %v1446_v31 = vmul.f32 %v5319_v6, %v1354_v25  ;;  %v1447_v1 = vmul.f32 %v5319_v6, %v1356_v46 }
 0x24e   : > { %7208 = vst [vmem:[#allocation21_spill] sm:$0xff] %v5519_v5  ;;  %v2238_v0 = vadd.f32 1.0, %v4406_v44  ;;  %1205 = vrot.lane.b32.xlu0 %v5306_v47, %s4714_s23  ;;  %v1514_v35 = vmul.f32 %v5309_v40, %v1354_v25  ;;  %v1515_v24 = vmul.f32 %v5309_v40, %v1356_v46  ;;  %v1714_v55 = vmul.f32 %v5312_v3, %v1354_v25 }
 0x24f   : > { %7210 = vst [vmem:[#allocation23_spill] sm:$0xff] %v5536_v38  ;;  %v1793_v44 = vrot.slane %v5533_v28, 2  ;;  %v1715_v51 = vmul.f32 %v5312_v3, %v1356_v46  ;;  %v5552_v58 = vmul.f32 %v5315_v59, %v1354_v25  ;;  %v7213_v28 = vrot.slane %v5447_v17, 5 }
 0x250   : > { %4409 = vrcp.f32 %v2238_v0  ;;  %1207 = vrot.lane.b32.xlu1 %v5321_v37, %s4714_s23  ;;  %v1589_v62 = vrot.slane %v1514_v35, 1  ;;  %v1591_v47 = vrot.slane %v1515_v24, 1  ;;  %v1789_v27 = vrot.slane %v1714_v55, 2 }
 0x251   : > { %7211 = vst [vmem:[#allocation24_spill] sm:$0xff] %v5552_v58  ;;  %v5554_v33 = vpop.f32.mrb[4].mxu1  ;;  %v5557_v0 = vmul.f32 %v5315_v59, %v1356_v46  ;;  %v1360_v32 = vsel %vm1335_vm3, %v1357_v57, %v7213_v28  ;;  %v7214_v35 = vrot.slane %v5530_v2, 1  ;;  %v1791_v55 = vrot.slane %v1715_v51, 2 }
 0x252   : > { %1237 = vrot.lane.b32.xlu0 %v5497_v11, %s4714_s23  ;;  %v5565_v24 = vpop.f32.mrb[5].mxu1  ;;  %v1590_v37 = vsel %vm1571_vm4, %v1587_v18, %v1589_v62  ;;  %v1592_v25 = vsel %vm1571_vm4, %v1589_v62, %v1591_v47  ;;  %v5577_v54 = vsel %vm1771_vm5, %v1787_v21, %v1789_v27  ;;  %v1449_v21 = vmul.f32 %v5319_v6, %v1360_v32 }
 0x253   : > { %7212 = vst [vmem:[#allocation25_spill] sm:$0xff] %v5557_v0  ;;  %v1594_v46 = vsel %vm1571_vm4, %v1591_v47, %v7214_v35  ;;  %v5572_v16 = vpop.f32.mrb[6].mxu1  ;;  %v5574_v57 = vadd.f32 %v1590_v37, %v1445_v41  ;;  %v1678_v28 = vadd.f32 %v1592_v25, %v1446_v31  ;;  %7216 = vst [vmem:[#allocation27_spill] sm:$0xff] %v5577_v54  ;;  %v1361_v25 = vrot.slane %v5460_v14, 5 }
 0x254   : > { %v4408_v52 = vpop.eup %4407  ;;  %v1679_v38 = vadd.f32 %v1594_v46, %v1447_v1  ;;  %1239 = vrot.lane.b32.xlu1 %v5516_v30, %s4714_s23  ;;  %v5581_v18 = vpop.f32.mrb[7].mxu1  ;;  %v1792_v9 = vsel %vm1771_vm5, %v1789_v27, %v1791_v55  ;;  %v1794_v51 = vsel %vm1771_vm5, %v1791_v55, %v1793_v44  ;;  %v1717_v27 = vmul.f32 %v5312_v3, %v1360_v32 }
 0x255   : > { %7215 = vst [vmem:[#allocation26_spill] sm:$0xff] %v5574_v57  ;;  %v2239_v62 = vadd.f32 1.0, %v4408_v52  ;;  %v5586_v35 = vadd.f32 %v1792_v9, %v1678_v28  ;;  %v1517_v52 = vmul.f32 %v5309_v40, %v1360_v32  ;;  %v5597_v1 = vmul.f32 %v5315_v59, %v1360_v32 }
 0x256   : > { %v5588_v41 = vadd.f32 %v1794_v51, %v1679_v38  ;;  %1217 = vrot.lane.b32.xlu0 %v5345_v10, %s4714_s23  ;;  %v7219_v9 = vrot.slane %v5455_v50, 5  ;;  %v7220_v38 = vrot.slane %v5442_v56, 5  ;;  %v1795_v28 = vrot.slane %v1717_v27, 2 }
 0x257   : > { %7217 = vst [vmem:[#allocation28_spill] sm:$0xff] %v5586_v35  ;;  %4411 = vrcp.f32 %v2239_v62  ;;  %v1595_v55 = vrot.slane %v1517_v52, 1  ;;  %v7223_v46 = vrot.slane %v5530_v2, 1 }
 0x258   : > { %7218 = vst [vmem:[#allocation29_spill] sm:$0xff] %v5588_v41  ;;  %v1366_v37 = vsel %vm1335_vm3, %v7220_v38, %v7219_v9  ;;  %1219 = vrot.lane.b32.xlu1 %v5356_v42, %s4714_s23  ;;  %v7222_v42 = vrot.slane %v5447_v17, 5  ;;  %v5637_v10 = vsel %vm1771_vm5, %v1793_v44, %v1795_v28  ;;  %v7225_v41 = vrot.slane %v5442_v56, 5 }
 0x259   : > { %v5611_v62 = vmul.f32 %v5319_v6, %v1366_v37  ;;  %v5613_v51 = vpop.f32.mrb[8].mxu1  ;;  %v5618_v9 = vmul.f32 %v5309_v40, %v1366_v37  ;;  %v5621_v38 = vmul.f32 %v5312_v3, %v1366_v37  ;;  %v5624_v47 = vmul.f32 %v5315_v59, %v1366_v37  ;;  %7224 = vst [vmem:[#allocation31_spill] sm:$0xff] %v5637_v10 }
 0x25a   : > { %v5615_v31 = vpop.eup %4409  ;;  %v1362_v52 = vsel %vm1335_vm3, %v7222_v42, %v1361_v25  ;;  %1249 = vrot.lane.b32.xlu0 %v5554_v33, %s4714_s23  ;;  %v5631_v27 = vpop.f32.mrb[9].mxu1  ;;  %v1596_v32 = vsel %vm1571_vm4, %v7223_v46, %v1595_v55  ;;  %v1364_v37 = vsel %vm1335_vm3, %v1361_v25, %v7225_v41  ;;  %v7227_v46 = vrot.slane %v5497_v11, 5 }
 0x25b   : > { %7221 = vst [vmem:[#allocation30_spill] sm:$0xff] %v5624_v47  ;;  %v1450_v35 = vmul.f32 %v5319_v6, %v1362_v52  ;;  %v5643_v0 = vpop.f32.mrb[10].mxu1  ;;  %v5646_v42 = vadd.f32 %v1596_v32, %v5527_v48  ;;  %v1601_v58 = vrot.slane %v5618_v9, 1  ;;  %v1451_v41 = vmul.f32 %v5319_v6, %v1364_v37 }
 0x25c   : > { %1251 = vrot.lane.b32.xlu1 %v5572_v16, %s4714_s23  ;;  %v5653_v44 = vpop.f32.mrb[11].mxu1  ;;  %v1518_v25 = vmul.f32 %v5309_v40, %v1362_v52  ;;  %v1519_v10 = vmul.f32 %v5309_v40, %v1364_v37  ;;  %v1718_v48 = vmul.f32 %v5312_v3, %v1362_v52  ;;  %v1719_v32 = vmul.f32 %v5312_v3, %v1364_v37 }
 0x25d   : > { %7226 = vst [vmem:[#allocation32_spill] sm:$0xff] %v5646_v42  ;;  %v1918_v9 = vmul.f32 %v5315_v59, %v1362_v52  ;;  %v1919_v2 = vmul.f32 %v5315_v59, %v1364_v37  ;;  %v7228_v42 = vrot.slane %v5455_v50, 5 }
 0x25e   : > { %1213 = vrot.lane.b32.xlu0 %v5351_v49, %s4714_s23  ;;  %v1597_v57 = vrot.slane %v1518_v25, 1  ;;  %v1599_v5 = vrot.slane %v1519_v10, 1  ;;  %v1797_v8 = vrot.slane %v1718_v48, 2  ;;  %v1799_v19 = vrot.slane %v1719_v32, 2 }
 0x25f   : > { %v1368_v54 = vsel %vm1335_vm3, %v7228_v42, %v7227_v46  ;;  %v1997_v23 = vrot.slane %v1918_v9, 3  ;;  %v1999_v52 = vrot.slane %v1919_v2, 3 }
 0x260   : > { %v5670_v61 = vmul.f32 %v5319_v6, %v1368_v54  ;;  %v5673_v37 = vmul.f32 %v5309_v40, %v1368_v54  ;;  %1215 = vrot.lane.b32.xlu1 %v5361_v20, %s4714_s23  ;;  %v1598_v42 = vsel %vm1571_vm4, %v1595_v55, %v1597_v57  ;;  %v1600_v49 = vsel %vm1571_vm4, %v1597_v57, %v1599_v5 }
 0x261   : > { %v5677_v36 = vpop.eup %4411  ;;  %v1602_v10 = vsel %vm1571_vm4, %v1599_v5, %v1601_v58  ;;  %v1798_v46 = vsel %vm1771_vm5, %v1795_v28, %v1797_v8  ;;  %v5683_v25 = vpop.f32.mrb[12].mxu1  ;;  %v1681_v48 = vadd.f32 %v1598_v42, %v1449_v21  ;;  %v1682_v2 = vadd.f32 %v1600_v49, %v1450_v35 }
 0x262   : > { %v1683_v32 = vadd.f32 %v1602_v10, %v1451_v41  ;;  %v1800_v9 = vsel %vm1771_vm5, %v1797_v8, %v1799_v19  ;;  %1245 = vrot.lane.b32.xlu0 %v5565_v24, %s4714_s23  ;;  %v5688_v20 = vpop.f32.mrb[13].mxu1  ;;  %v7229_v55 = vrot.slane %v5621_v38, 2  ;;  %v7230_v5 = vrot.slane %v5597_v1, 3 }
 0x263   : > { %v5699_v21 = vsel %vm1971_vm6, %v1997_v23, %v1999_v52  ;;  %v7231_v35 = vrot.slane %v5624_v47, 3  ;;  %v5706_v41 = vpop.f32.mrb[14].mxu1  ;;  %v5708_v42 = vadd.f32 %v1798_v46, %v1681_v48  ;;  %v5710_v49 = vadd.f32 %v1800_v9, %v1682_v2 }
 0x264   : > { %v1802_v57 = vsel %vm1771_vm5, %v1799_v19, %v7229_v55  ;;  %v5696_v28 = vsel %vm1971_vm6, %v7230_v5, %v1997_v23  ;;  %v1603_v10 = vrot.slane %v5673_v37, 1  ;;  %1247 = vrot.lane.b32.xlu1 %v5581_v18, %s4714_s23  ;;  %v5717_v23 = vpop.f32.mrb[15].mxu1  ;;  %v1721_v55 = vmul.f32 %v5312_v3, %v1368_v54 }
 0x265   : > { %v5704_v8 = vsel %vm1971_vm6, %v1999_v52, %v7231_v35  ;;  %v5712_v19 = vadd.f32 %v1802_v57, %v1683_v32  ;;  %v5721_v52 = vmul.f32 %v5315_v59, %v1368_v54  ;;  %v1373_v5 = vrot.slane %v5502_v34, 5 }
 0x266   : > { %7232 = vst [vmem:[#allocation33_spill] sm:$0xff] %v5704_v8  ;;  %v1369_v46 = vrot.slane %v5516_v30, 5  ;;  %v1604_v48 = vsel %vm1571_vm4, %v1601_v58, %v1603_v10  ;;  %v7175_v37 = vrot.slane %v5565_v24, 5  ;;  %1225 = vrot.lane.b32.xlu0 %v5387_v63, %s4714_s23  ;;  %v1803_v54 = vrot.slane %v1721_v55, 2 }
 0x267   : > { %7233 = vst [vmem:[#allocation34_spill] sm:$0xff] %v5712_v19  ;;  %7234 = vst [vmem:[#allocation35_spill] sm:$0xff] %v5721_v52  ;;  %v5732_v9 = vadd.f32 %v1604_v48, %v5611_v62  ;;  %v7236_v34 = vrot.slane %v5491_v4, 5  ;;  %v7238_v63 = vrot.slane %v5621_v38, 2  ;;  %v7240_v55 = vrot.slane %v5497_v11, 5 }
 0x268   : > { %1227 = vrot.lane.b32.xlu1 %v5406_v15, %s4714_s23 }
 0x269   : > { %7235 = vst [vmem:[#allocation36_spill] sm:$0xff] %v5732_v9  ;;  %v1374_v30 = vsel %vm1335_vm3, %v7236_v34, %v1373_v5  ;;  %v5749_v62 = vsel %vm1771_vm5, %v7238_v63, %v1803_v54  ;;  %v1370_v48 = vsel %vm1335_vm3, %v7240_v55, %v1369_v46  ;;  %v1372_v57 = vsel %vm1335_vm3, %v1369_v46, %v7236_v34 }
 0x26a   : > { %v1456_v58 = vmul.f32 %v5319_v6, %v1374_v30  ;;  %v1524_v35 = vmul.f32 %v5309_v40, %v1374_v30  ;;  %v1724_v2 = vmul.f32 %v5312_v3, %v1374_v30  ;;  %v5742_v32 = vmul.f32 %v5315_v59, %v1374_v30  ;;  %7239 = vst [vmem:[#allocation38_spill] sm:$0xff] %v5749_v62 }
 0x26b   : > { %v1376_v30 = vsel %vm1335_vm3, %v1373_v5, %v7175_v37  ;;  %v1454_v38 = vmul.f32 %v5319_v6, %v1370_v48  ;;  %1257 = vrot.lane.b32.xlu0 %v5613_v51, %s4714_s23  ;;  %v1455_v11 = vmul.f32 %v5319_v6, %v1372_v57  ;;  %v1522_v63 = vmul.f32 %v5309_v40, %v1370_v48 }
 0x26c   : > { %7237 = vst [vmem:[#allocation37_spill] sm:$0xff] %v5742_v32  ;;  %v1609_v8 = vrot.slane %v1524_v35, 1  ;;  %v1809_v19 = vrot.slane %v1724_v2, 2  ;;  %v1523_v4 = vmul.f32 %v5309_v40, %v1372_v57  ;;  %v1722_v46 = vmul.f32 %v5312_v3, %v1370_v48  ;;  %1259 = vrot.lane.b32.xlu1 %v5643_v0, %s4714_s23 }
 0x26d   : > { %v1723_v55 = vmul.f32 %v5312_v3, %v1372_v57  ;;  %v5770_v5 = vmul.f32 %v5315_v59, %v1370_v48  ;;  %v5773_v2 = vmul.f32 %v5315_v59, %v1372_v57  ;;  %v5776_v35 = vmul.f32 %v5319_v6, %v1376_v30 }
 0x26e   : > { %v1605_v34 = vrot.slane %v1522_v63, 1  ;;  %v1607_v15 = vrot.slane %v1523_v4, 1  ;;  %v1805_v37 = vrot.slane %v1722_v46, 2  ;;  %v1525_v32 = vmul.f32 %v5309_v40, %v1376_v30 }
 0x26f   : > { %7241 = vst [vmem:[#allocation39_spill] sm:$0xff] %v5773_v2  ;;  %v1807_v47 = vrot.slane %v1723_v55, 2  ;;  %v1725_v62 = vmul.f32 %v5312_v3, %v1376_v30  ;;  %1221 = vrot.lane.b32.xlu0 %v5402_v13, %s4714_s23 }
 0x270   : > { %v1606_v57 = vsel %vm1571_vm4, %v1603_v10, %v1605_v34  ;;  %v1608_v9 = vsel %vm1571_vm4, %v1605_v34, %v1607_v15  ;;  %v1610_v63 = vsel %vm1571_vm4, %v1607_v15, %v1609_v8  ;;  %v5790_v4 = vsel %vm1771_vm5, %v1803_v54, %v1805_v37  ;;  %1223 = vrot.lane.b32.xlu1 %v5411_v22, %s4714_s23 }
 0x271   : > { %v5793_v46 = vadd.f32 %v1606_v57, %v5670_v61  ;;  %v1686_v55 = vadd.f32 %v1608_v9, %v1454_v38  ;;  %v1687_v52 = vadd.f32 %v1610_v63, %v1455_v11  ;;  %v1808_v48 = vsel %vm1771_vm5, %v1805_v37, %v1807_v47 }
 0x272   : > { %v1810_v13 = vsel %vm1771_vm5, %v1807_v47, %v1809_v19  ;;  %v1611_v10 = vrot.slane %v1525_v32, 1  ;;  %v1811_v2 = vrot.slane %v1725_v62, 2  ;;  %v5800_v34 = vmul.f32 %v5315_v59, %v1376_v30 }
 0x273   : > { %v5802_v15 = vadd.f32 %v1808_v48, %v1686_v55  ;;  %v5804_v54 = vadd.f32 %v1810_v13, %v1687_v52  ;;  %v7242_v61 = vrot.slane %v5572_v16, 5  ;;  %v7243_v9 = vrot.slane %v5554_v33, 5  ;;  %1253 = vrot.lane.b32.xlu0 %v5631_v27, %s4714_s23 }
 0x274   : > { %v1377_v38 = vrot.slane %v5581_v18, 5  ;;  %v1612_v22 = vsel %vm1571_vm4, %v1609_v8, %v1611_v10  ;;  %v5816_v47 = vsel %vm1771_vm5, %v1809_v19, %v1811_v2  ;;  %1255 = vrot.lane.b32.xlu1 %v5653_v44, %s4714_s23  ;;  %v7245_v8 = vrot.slane %v5565_v24, 5 }
 0x275   : > { %v1382_v37 = vsel %vm1335_vm3, %v7243_v9, %v7242_v61  ;;  %v5820_v62 = vadd.f32 %v1612_v22, %v1456_v58  ;;  %v7246_v48 = vmov %v7243_v9  ;;  %v1387_v58 = vrot.slane %v5613_v51, 5 }
 0x276   : > { %v1460_v52 = vmul.f32 %v5319_v6, %v1382_v37  ;;  %v1528_v30 = vmul.f32 %v5309_v40, %v1382_v37  ;;  %v1728_v11 = vmul.f32 %v5312_v3, %v1382_v37  ;;  %v5825_v18 = vmul.f32 %v5315_v59, %v1382_v37 }
 0x277   : > { %v1378_v19 = vsel %vm1335_vm3, %v7245_v8, %v1377_v38  ;;  %v1380_v57 = vsel %vm1335_vm3, %v1377_v38, %v7246_v48  ;;  %v1383_v63 = vrot.slane %v5631_v27, 5  ;;  %1233 = vrot.lane.b32.xlu0 %v5442_v56, %s4714_s23 }
 0x278   : > { %7244 = vst [vmem:[#allocation40_spill] sm:$0xff] %v5825_v18  ;;  %v1617_v55 = vrot.slane %v1528_v30, 1  ;;  %v1817_v13 = vrot.slane %v1728_v11, 2  ;;  %v1458_v9 = vmul.f32 %v5319_v6, %v1378_v19  ;;  %v1459_v24 = vmul.f32 %v5319_v6, %v1380_v57  ;;  %1235 = vrot.lane.b32.xlu1 %v5455_v50, %s4714_s23 }
 0x279   : > { %v1526_v37 = vmul.f32 %v5309_v40, %v1378_v19  ;;  %v1527_v33 = vmul.f32 %v5309_v40, %v1380_v57  ;;  %v1726_v38 = vmul.f32 %v5312_v3, %v1378_v19  ;;  %v1727_v51 = vmul.f32 %v5312_v3, %v1380_v57 }
 0x27a   : > { %v5847_v27 = vmul.f32 %v5315_v59, %v1378_v19  ;;  %v5850_v22 = vmul.f32 %v5315_v59, %v1380_v57  ;;  %v7248_v30 = vmov %v7242_v61 }
 0x27b   : > { %v1384_v56 = vsel %vm1335_vm3, %v7248_v30, %v1383_v63  ;;  %v1613_v11 = vrot.slane %v1526_v37, 1  ;;  %v1615_v8 = vrot.slane %v1527_v33, 1  ;;  %v1813_v48 = vrot.slane %v1726_v38, 2  ;;  %1265 = vrot.lane.b32.xlu0 %v5683_v25, %s4714_s23 }
 0x27c   : > { %7247 = vst [vmem:[#allocation41_spill] sm:$0xff] %v5850_v22  ;;  %v5858_v61 = vmul.f32 %v5319_v6, %v1384_v56  ;;  %v1815_v32 = vrot.slane %v1727_v51, 2  ;;  %v1529_v57 = vmul.f32 %v5309_v40, %v1384_v56  ;;  %1267 = vrot.lane.b32.xlu1 %v5706_v41, %s4714_s23 }
 0x27d   : > { %v1614_v16 = vsel %vm1571_vm4, %v1611_v10, %v1613_v11  ;;  %v1616_v50 = vsel %vm1571_vm4, %v1613_v11, %v1615_v8  ;;  %v1618_v37 = vsel %vm1571_vm4, %v1615_v8, %v1617_v55  ;;  %v5869_v33 = vsel %vm1771_vm5, %v1811_v2, %v1813_v48 }
 0x27e   : > { %v5872_v38 = vadd.f32 %v1614_v16, %v5776_v35  ;;  %v1690_v51 = vadd.f32 %v1616_v50, %v1458_v9  ;;  %v1691_v30 = vadd.f32 %v1618_v37, %v1459_v24  ;;  %v1816_v18 = vsel %vm1771_vm5, %v1813_v48, %v1815_v32 }
 0x27f   : > { %v1818_v19 = vsel %vm1771_vm5, %v1815_v32, %v1817_v13  ;;  %v1619_v10 = vrot.slane %v1529_v57, 1  ;;  %v1729_v11 = vmul.f32 %v5312_v3, %v1384_v56  ;;  %v5880_v8 = vmul.f32 %v5315_v59, %v1384_v56  ;;  %1229 = vrot.lane.b32.xlu0 %v5447_v17, %s4714_s23 }
 0x280   : > { %v5882_v2 = vadd.f32 %v1816_v18, %v1690_v51  ;;  %v5884_v22 = vadd.f32 %v1818_v19, %v1691_v30  ;;  %v1389_v35 = vrot.slane %v5643_v0, 5  ;;  %v1385_v9 = vrot.slane %v5653_v44, 5  ;;  %1231 = vrot.lane.b32.xlu1 %v5460_v14, %s4714_s23 }
 0x281   : > { %7249 = vst [vmem:[#allocation42_spill] sm:$0xff] %v5880_v8  ;;  %v1620_v24 = vsel %vm1571_vm4, %v1617_v55, %v1619_v10  ;;  %v1819_v32 = vrot.slane %v1729_v11, 2  ;;  %v1869_v56 = vadd.f32 %v5372_v53, %v5374_v12  ;;  %v7253_v48 = vrot.slane %v5328_v45, 3 }
 0x282   : > { %7250 = vst [vmem:[#allocation43_spill] sm:$0xff] %v5884_v22  ;;  %v5894_v57 = vadd.f32 %v1620_v24, %v1460_v52  ;;  %v1390_v18 = vsel %vm1335_vm3, %v1387_v58, %v1389_v35  ;;  %v1386_v19 = vsel %vm1335_vm3, %v1383_v63, %v1385_v9  ;;  %v1388_v0 = vsel %vm1335_vm3, %v1385_v9, %v1387_v58 }
 0x283   : > { %v5902_v17 = vsel %vm1771_vm5, %v1817_v13, %v1819_v32  ;;  %v5905_v44 = vmul.f32 %v5319_v6, %v1390_v18  ;;  %v5908_v55 = vmul.f32 %v5309_v40, %v1390_v18  ;;  %v5911_v53 = vmul.f32 %v5312_v3, %v1390_v18  ;;  %1261 = vrot.lane.b32.xlu0 %v5688_v20, %s4714_s23 }
 0x284   : > { %v5914_v12 = vmul.f32 %v5315_v59, %v1390_v18  ;;  %v1462_v52 = vmul.f32 %v5319_v6, %v1386_v19  ;;  %v1463_v58 = vmul.f32 %v5319_v6, %v1388_v0  ;;  %v1530_v14 = vmul.f32 %v5309_v40, %v1386_v19  ;;  %1263 = vrot.lane.b32.xlu1 %v5717_v23, %s4714_s23 }
 0x285   : > { %v1625_v63 = vrot.slane %v5908_v55, 1  ;;  %v1531_v16 = vmul.f32 %v5309_v40, %v1388_v0  ;;  %v1730_v50 = vmul.f32 %v5312_v3, %v1386_v19  ;;  %v1731_v30 = vmul.f32 %v5312_v3, %v1388_v0 }
 0x286   : > { %7251 = vst [vmem:[#allocation44_spill] sm:$0xff] %v5914_v12  ;;  %v1621_v51 = vrot.slane %v1530_v14, 1  ;;  %v5928_v11 = vmul.f32 %v5315_v59, %v1386_v19  ;;  %v5933_v18 = vmul.f32 %v5315_v59, %v1388_v0  ;;  %v7252_v55 = vrot.slane %v5359_v39, 3 }
 0x287   : > { %v1623_v9 = vrot.slane %v1531_v16, 1  ;;  %v1821_v24 = vrot.slane %v1730_v50, 2  ;;  %v1823_v13 = vrot.slane %v1731_v30, 2  ;;  %v7254_v12 = vrot.slane %v5364_v26, 3 }
 0x288   : > { %v1974_v37 = vsel %vm1971_vm6, %v7253_v48, %v7252_v55  ;;  %v1622_v14 = vsel %vm1571_vm4, %v1619_v10, %v1621_v51  ;;  %v7255_v22 = vmov %v7252_v55  ;;  %v7256_v26 = vrot.slane %v5911_v53, 2  ;;  %v7262_v53 = vld [vmem:[#allocation17_spill] sm:$0xff] }
 0x289   : > { %v1976_v16 = vsel %vm1971_vm6, %v7255_v22, %v7254_v12  ;;  %v1624_v0 = vsel %vm1571_vm4, %v1621_v51, %v1623_v9  ;;  %v1626_v50 = vsel %vm1571_vm4, %v1623_v9, %v1625_v63  ;;  %v5950_v8 = vadd.f32 %v1622_v14, %v5858_v61 }
 0x28a   : > { %v5953_v45 = vsel %vm1771_vm5, %v1819_v32, %v1821_v24  ;;  %v1694_v10 = vadd.f32 %v1624_v0, %v1462_v52  ;;  %v1695_v48 = vadd.f32 %v1626_v50, %v1463_v58  ;;  %v1824_v30 = vsel %vm1771_vm5, %v1821_v24, %v1823_v13 }
 0x28b   : > { %v1826_v39 = vsel %vm1771_vm5, %v1823_v13, %v7256_v26  ;;  %v2069_v12 = vadd.f32 %v1974_v37, %v1869_v56  ;;  %v2070_v51 = vadd.f32 %v1976_v16, %v5381_v7  ;;  %v1395_v9 = vrot.slane %v5683_v25, 5 }
 0x28c   : > { %v5962_v61 = vadd.f32 %v1824_v30, %v1694_v10  ;;  %v5964_v55 = vadd.f32 %v1826_v39, %v1695_v48  ;;  %v1391_v32 = vrot.slane %v5688_v20, 5  ;;  %v1397_v52 = vrot.slane %v5706_v41, 5 }
 0x28d   : > { %v5969_v58 = vadd.f32 %v5395_v60, %v2069_v12  ;;  %v5972_v13 = vadd.f32 %v5395_v60, %v2070_v51  ;;  %v5976_v56 = vmul.f32 %v5615_v31, %v5414_v29  ;;  %v5980_v7 = vmul.f32 %v5677_v36, %v5458_v43 }
 0x28e   : > { %v1392_v25 = vsel %vm1335_vm3, %v1389_v35, %v1391_v32  ;;  %v1398_v20 = vsel %vm1335_vm3, %v1395_v9, %v1397_v52  ;;  %v1537_v41 = vmul.f32 %v5309_v40, %v1397_v52  ;;  %v1737_v37 = vmul.f32 %v5312_v3, %v1397_v52 }
 0x28f   : > { %v2140_v24 = vsub.f32 0.0, %v5969_v58  ;;  %v2141_v14 = vsub.f32 0.0, %v5972_v13  ;;  %v5989_v16 = vmul.f32 %v5319_v6, %v1392_v25  ;;  %v1533_v29 = vmul.f32 %v5309_v40, %v1392_v25  ;;  %2366 = vst.msk [vmem:[#allocation3 + $0x10] sm:$0xff] %vm1301_vm7, %v5976_v56  ;;  %2367 = vst.msk [vmem:[#allocation3 + $0x18] sm:$0xff] %vm1301_vm7, %v5980_v7 }
 0x290   : > { %v5997_v43 = vmul.f32 %v5312_v3, %v1392_v25  ;;  %v6000_v36 = vmul.f32 %v5315_v59, %v1392_v25  ;;  %v1468_v31 = vmul.f32 %v5319_v6, %v1398_v20  ;;  %v1536_v35 = vmul.f32 %v5309_v40, %v1398_v20 }
 0x291   : > { %v2172_v0 = vmul.f32 1.442695, %v2140_v24  ;;  %v2174_v50 = vmul.f32 1.442695, %v2141_v14  ;;  %v1627_v10 = vrot.slane %v1533_v29, 1  ;;  %v1635_v48 = vrot.slane %v1537_v41, 1 }
 0x292   : > { %v1827_v30 = vrot.slane %v5997_v43, 2  ;;  %v1633_v39 = vrot.slane %v1536_v35, 1  ;;  %v1736_v12 = vmul.f32 %v5312_v3, %v1398_v20  ;;  %v1835_v25 = vrot.slane %v1737_v37, 2  ;;  %v7270_v37 = vld [vmem:[#allocation21_spill] sm:$0xff] }
 0x293   : > { %4413 = vpow2.f32 %v2172_v0  ;;  %v1628_v51 = vsel %vm1571_vm4, %v1625_v63, %v1627_v10  ;;  %v6009_v22 = vmul.f32 %v5315_v59, %v1398_v20  ;;  %v7258_v41 = vmov %v7256_v26  ;;  %v7261_v0 = vld [vmem:[#allocation16_spill] sm:$0xff] }
 0x294   : > { %4415 = vpow2.f32 %v2174_v50  ;;  %v6012_v24 = vadd.f32 %v1628_v51, %v5905_v44  ;;  %v6017_v14 = vsel %vm1771_vm5, %v7258_v41, %v1827_v30  ;;  %v1636_v29 = vsel %vm1571_vm4, %v1633_v39, %v1635_v48  ;;  %v7263_v51 = vld [vmem:[#allocation14_spill] sm:$0xff]  ;;  %v7265_v26 = vld [vmem:[#allocation12_spill] sm:$0xff] }
 0x295   : > { %7257 = vst [vmem:[#allocation45_spill] sm:$0xff] %v6009_v22  ;;  %v6020_v43 = vadd.f32 %v1636_v29, %v1468_v31  ;;  %v1833_v35 = vrot.slane %v1736_v12, 2  ;;  %v6023_v63 = vmul.f32 %v5315_v59, %v1397_v52  ;;  %v1393_v44 = vrot.slane %v5717_v23, 5  ;;  %v7267_v29 = vld [vmem:[#allocation15_spill] sm:$0xff]  ;;  %v7271_v22 = vld [vmem:[#allocation22_spill] sm:$0xff] }
 0x296   : > { %v1873_v50 = vadd.f32 %v7262_v53, %v7261_v0  ;;  %v7264_v41 = vrot.slane %v7263_v51, 3  ;;  %v7266_v48 = vrot.slane %v7265_v26, 3  ;;  %v7268_v20 = vrot.slane %v7267_v29, 3 }
 0x297   : > { %7259 = vst [vmem:[#allocation46_spill] sm:$0xff] %v6020_v43  ;;  %7260 = vst [vmem:[#allocation47_spill] sm:$0xff] %v6023_v63  ;;  %v6037_v12 = vsel %vm1771_vm5, %v1833_v35, %v1835_v25  ;;  %v1876_v0 = vadd.f32 %v7271_v22, %v7270_v37  ;;  %v1394_v53 = vsel %vm1335_vm3, %v1391_v32, %v1393_v44 }
 0x298   : > { %v1982_v31 = vsel %vm1971_vm6, %v7266_v48, %v7264_v41  ;;  %v7269_v19 = vmov %v7264_v41  ;;  %v1396_v26 = vsel %vm1335_vm3, %v1393_v44, %v1395_v9  ;;  %v7272_v41 = vld [vmem:[#allocation18_spill] sm:$0xff]  ;;  %v1466_v25 = vmul.f32 %v5319_v6, %v1394_v53 }
 0x299   : > { %v1984_v23 = vsel %vm1971_vm6, %v7269_v19, %v7268_v20  ;;  %v2073_v43 = vadd.f32 %v1982_v31, %v1873_v50  ;;  %v1467_v52 = vmul.f32 %v5319_v6, %v1396_v26  ;;  %v1534_v63 = vmul.f32 %v5309_v40, %v1394_v53 }
 0x29a   : > { %v2074_v48 = vadd.f32 %v1984_v23, %v7272_v41  ;;  %v1535_v51 = vmul.f32 %v5309_v40, %v1396_v26  ;;  %v1734_v19 = vmul.f32 %v5312_v3, %v1394_v53  ;;  %v1735_v20 = vmul.f32 %v5312_v3, %v1396_v26 }
 0x29b   : > { %v6057_v22 = vmul.f32 %v5315_v59, %v1394_v53  ;;  %v6060_v9 = vmul.f32 %v5315_v59, %v1396_v26  ;;  %v1629_v32 = vrot.slane %v1534_v63, 1  ;;  %v6063_v44 = vadd.f32 %v5395_v60, %v2073_v43 }
 0x29c   : > { %v1631_v37 = vrot.slane %v1535_v51, 1  ;;  %v6066_v6 = vadd.f32 %v5395_v60, %v2074_v48  ;;  %v1829_v50 = vrot.slane %v1734_v19, 2  ;;  %v1831_v40 = vrot.slane %v1735_v20, 2  ;;  %v1210_v20 = vpop.permute.xlu1 %1209 }
 0x29d   : > { %v4414_v23 = vpop.eup %4413  ;;  %v1630_v53 = vsel %vm1571_vm4, %v1627_v10, %v1629_v32  ;;  %v2144_v26 = vsub.f32 0.0, %v6063_v44  ;;  %1304 = vst.msk [vmem:[#allocation4 + $0x10] sm:$0xff] %vm1301_vm7, %v1210_v20  ;;  %v7282_v20 = vld [vmem:[#allocation27_spill] sm:$0xff] }
 0x29e   : > { %v1632_v59 = vsel %vm1571_vm4, %v1629_v32, %v1631_v37  ;;  %v1634_v63 = vsel %vm1571_vm4, %v1631_v37, %v1633_v39  ;;  %v4416_v43 = vpop.eup %4415  ;;  %v2236_v41 = vadd.f32 1.0, %v4414_v23  ;;  %v6075_v48 = vadd.f32 %v1630_v53, %v5989_v16 }
 0x29f   : > { %v1698_v51 = vadd.f32 %v1632_v59, %v1466_v25  ;;  %v1699_v19 = vadd.f32 %v1634_v63, %v1467_v52  ;;  %v2237_v31 = vadd.f32 1.0, %v4416_v43  ;;  %v6078_v3 = vsel %vm1771_vm5, %v1827_v30, %v1829_v50  ;;  %v7274_v25 = vld [vmem:[#allocation13_spill] sm:$0xff]  ;;  %v7280_v43 = vld [vmem:[#allocation19_spill] sm:$0xff] }
 0x2a0   : > { %v1832_v10 = vsel %vm1771_vm5, %v1829_v50, %v1831_v40  ;;  %v1834_v32 = vsel %vm1771_vm5, %v1831_v40, %v1833_v35  ;;  %4417 = vrcp.f32 %v2236_v41  ;;  %v2145_v16 = vsub.f32 0.0, %v6066_v6  ;;  %v7277_v50 = vld [vmem:[#allocation20_spill] sm:$0xff] }
 0x2a1   : > { %v6083_v39 = vadd.f32 %v1832_v10, %v1698_v51  ;;  %v6085_v37 = vadd.f32 %v1834_v32, %v1699_v19  ;;  %4419 = vrcp.f32 %v2237_v31  ;;  %v2180_v52 = vmul.f32 1.442695, %v2144_v26  ;;  %v7281_v19 = vld [vmem:[#allocation26_spill] sm:$0xff]  ;;  %v1212_v26 = vpop.permute.xlu1 %1211  ;;  %v7283_v10 = vld [vmem:[#allocation24_spill] sm:$0xff] }
 0x2a2   : > { %v7275_v23 = vrot.slane %v7274_v25, 3  ;;  %v7276_v30 = vrot.slane %v7267_v29, 3  ;;  %v7278_v59 = vrot.slane %v7277_v50, 3  ;;  %v2182_v63 = vmul.f32 1.442695, %v2145_v16  ;;  %1305 = vst.msk [vmem:[#allocation4 + $0x18] sm:$0xff] %vm1301_vm7, %v1212_v26 }
 0x2a3   : > { %7273 = vst [vmem:[#allocation16_spill] sm:$0xff] %v6085_v37  ;;  %v1877_v31 = vadd.f32 %v7282_v20, %v7281_v19  ;;  %4421 = vpow2.f32 %v2180_v52  ;;  %v7284_v32 = vrot.slane %v7283_v10, 3  ;;  %v7292_v19 = vld [vmem:[#allocation23_spill] sm:$0xff] }
 0x2a4   : > { %v1986_v53 = vsel %vm1971_vm6, %v7276_v30, %v7275_v23  ;;  %v7279_v35 = vmov %v7275_v23  ;;  %v7285_v29 = vmov %v7278_v59  ;;  %v7286_v30 = vld [vmem:[#allocation25_spill] sm:$0xff]  ;;  %4423 = vpow2.f32 %v2182_v63 }
 0x2a5   : > { %v1988_v40 = vsel %vm1971_vm6, %v7279_v35, %v7278_v59  ;;  %v2075_v41 = vadd.f32 %v1986_v53, %v7280_v43  ;;  %v1990_v23 = vsel %vm1971_vm6, %v7285_v29, %v7284_v32  ;;  %v7287_v37 = vrot.slane %v7286_v30, 3  ;;  %v7289_v59 = vld [vmem:[#allocation32_spill] sm:$0xff]  ;;  %v7290_v53 = vld [vmem:[#allocation31_spill] sm:$0xff] }
 0x2a6   : > { %v2076_v51 = vadd.f32 %v1988_v40, %v1876_v0  ;;  %v7288_v25 = vmov %v7284_v32  ;;  %v1880_v0 = vadd.f32 %v7290_v53, %v7289_v59  ;;  %v2077_v50 = vadd.f32 %v1990_v23, %v1877_v31  ;;  %v7291_v40 = vld [vmem:[#allocation28_spill] sm:$0xff]  ;;  %v7297_v23 = vld [vmem:[#allocation29_spill] sm:$0xff] }
 0x2a7   : > { %v1992_v16 = vsel %vm1971_vm6, %v7288_v25, %v7287_v37  ;;  %v6115_v52 = vadd.f32 %v5395_v60, %v2075_v41  ;;  %v7293_v20 = vrot.slane %v7292_v19, 3  ;;  %v7294_v10 = vmov %v7287_v37 }
 0x2a8   : > { %v6118_v35 = vadd.f32 %v5395_v60, %v2076_v51  ;;  %v2078_v43 = vadd.f32 %v1992_v16, %v7291_v40  ;;  %v7295_v32 = vrot.slane %v5597_v1, 3  ;;  %v2081_v41 = vadd.f32 %v5696_v28, %v5708_v42 }
 0x2a9   : > { %v1994_v37 = vsel %vm1971_vm6, %v7294_v10, %v7293_v20  ;;  %v7296_v26 = vmov %v7293_v20  ;;  %v2146_v51 = vsub.f32 0.0, %v6115_v52  ;;  %v6136_v29 = vadd.f32 %v5395_v60, %v2077_v50  ;;  %v7298_v10 = vld [vmem:[#allocation36_spill] sm:$0xff] }
 0x2aa   : > { %v1996_v63 = vsel %vm1971_vm6, %v7296_v26, %v7295_v32  ;;  %v2147_v31 = vsub.f32 0.0, %v6118_v35  ;;  %v2079_v30 = vadd.f32 %v1994_v37, %v7297_v23  ;;  %v6140_v25 = vadd.f32 %v5395_v60, %v2078_v43  ;;  %v7299_v37 = vld [vmem:[#allocation38_spill] sm:$0xff] }
 0x2ab   : > { %v2080_v1 = vadd.f32 %v1996_v63, %v1880_v0  ;;  %v2082_v16 = vadd.f32 %v5699_v21, %v5710_v49  ;;  %v6145_v59 = vadd.f32 %v5395_v60, %v2081_v41  ;;  %v2184_v28 = vmul.f32 1.442695, %v2146_v51  ;;  %v4418_v49 = vpop.eup %4417 }
 0x2ac   : > { %v2186_v42 = vmul.f32 1.442695, %v2147_v31  ;;  %v2148_v53 = vsub.f32 0.0, %v6136_v29  ;;  %v6149_v40 = vadd.f32 %v5395_v60, %v2079_v30  ;;  %v2149_v50 = vsub.f32 0.0, %v6140_v25  ;;  %v4420_v26 = vpop.eup %4419 }
 0x2ad   : > { %v6153_v19 = vadd.f32 %v5395_v60, %v2080_v1  ;;  %v6156_v0 = vadd.f32 %v5395_v60, %v2082_v16  ;;  %v2152_v21 = vsub.f32 0.0, %v6145_v59  ;;  %4425 = vpow2.f32 %v2184_v28  ;;  %v4422_v30 = vpop.eup %4421  ;;  %v7300_v28 = vld [vmem:[#allocation35_spill] sm:$0xff] }
 0x2ae   : > { %v2188_v43 = vmul.f32 1.442695, %v2148_v53  ;;  %v2150_v20 = vsub.f32 0.0, %v6149_v40  ;;  %v1884_v32 = vadd.f32 %v7299_v37, %v7298_v10  ;;  %v2332_v63 = vmul.f32 %v4418_v49, %v5969_v58  ;;  %v7302_v10 = vld [vmem:[#allocation30_spill] sm:$0xff] }
 0x2af   : > { %4427 = vpow2.f32 %v2186_v42  ;;  %v2190_v41 = vmul.f32 1.442695, %v2149_v50  ;;  %v2151_v51 = vsub.f32 0.0, %v6153_v19  ;;  %v2333_v60 = vmul.f32 %v4420_v26, %v5972_v13  ;;  %v4424_v50 = vpop.eup %4423  ;;  %v7304_v37 = vld [vmem:[#allocation34_spill] sm:$0xff]  ;;  %v7305_v26 = vld [vmem:[#allocation33_spill] sm:$0xff] }
 0x2b0   : > { %4429 = vpow2.f32 %v2188_v43  ;;  %v2192_v31 = vmul.f32 1.442695, %v2150_v20  ;;  %v2153_v23 = vsub.f32 0.0, %v6156_v0  ;;  %2364 = vst.msk [vmem:[#allocation3] sm:$0xff] %vm1301_vm7, %v2332_v63  ;;  %v2196_v16 = vmul.f32 1.442695, %v2152_v21 }
 0x2b1   : > { %4431 = vpow2.f32 %v2190_v41  ;;  %v2194_v1 = vmul.f32 1.442695, %v2151_v51  ;;  %v7301_v53 = vrot.slane %v7300_v28, 3  ;;  %v7303_v58 = vrot.slane %v7302_v10, 3  ;;  %2365 = vst.msk [vmem:[#allocation3 + $0x8] sm:$0xff] %vm1301_vm7, %v2333_v60 }
 0x2b2   : > { %v2396_v13 = vpack.c.bf16 %v2333_v60, %v2332_v63  ;;  %v2240_v49 = vadd.f32 1.0, %v4422_v30  ;;  %4433 = vpow2.f32 %v2192_v31  ;;  %v2198_v43 = vmul.f32 1.442695, %v2153_v23  ;;  %v7308_v60 = vld [vmem:[#allocation39_spill] sm:$0xff] }
 0x2b3   : > { %v2004_v42 = vsel %vm1971_vm6, %v7303_v58, %v7301_v53  ;;  %v2241_v20 = vadd.f32 1.0, %v4424_v50  ;;  %4435 = vpow2.f32 %v2194_v1  ;;  %v2083_v41 = vadd.f32 %v7305_v26, %v7304_v37 }
 0x2b4   : > { %v2084_v51 = vadd.f32 %v2004_v42, %v1884_v32  ;;  %4246 = vmatprep.mubr.msk.bf16.mxu1 %vm1301_vm7, %v2396_v13  ;;  %4437 = vrcp.f32 %v2240_v49  ;;  %v1885_v21 = vadd.f32 %v5790_v4, %v5793_v46  ;;  %v7306_v53 = vrot.slane %v5770_v5, 3  ;;  %v6195_v4 = vld [vmem:[%s7139_s5] ss:$0 sm:$0xff] }
 0x2b5   : > { %v7307_v10 = vrot.slane %v7300_v28, 3  ;;  %v7309_v31 = vrot.slane %v7308_v60, 3  ;;  %v7311_v32 = vpack.c.bf16 %v5980_v7, %v5976_v56  ;;  %4439 = vrcp.f32 %v2241_v20  ;;  %v7312_v7 = vld [vmem:[#allocation37_spill] sm:$0xff] }
 0x2b6   : > { %v7310_v23 = vmov %v7306_v53  ;;  %v6198_v46 = vadd.f32 %v6195_v4, %v2083_v41  ;;  %v6201_v1 = vadd.f32 %v6195_v4, %v2084_v51  ;;  %4441 = vpow2.f32 %v2196_v16 }
 0x2b7   : > { %v2006_v63 = vsel %vm1971_vm6, %v7307_v10, %v7306_v53  ;;  %v2008_v30 = vsel %vm1971_vm6, %v7310_v23, %v7309_v31  ;;  %4247 = vmatmul.mubr.msk.bf16.vlgmr.msra.gmra.mrb[16].mxu1 %vm1301_vm7, %v7311_v32  ;;  %v1888_v56 = vadd.f32 %v5816_v47, %v5820_v62  ;;  %v7313_v58 = vrot.slane %v7312_v7, 3 }
 0x2b8   : > { %v2086_v5 = vadd.f32 %v2008_v30, %v5802_v15  ;;  %v2085_v28 = vadd.f32 %v2006_v63, %v1885_v21  ;;  %v7314_v42 = vmov %v7309_v31  ;;  %4443 = vpow2.f32 %v2198_v43  ;;  %v4426_v15 = vpop.eup %4425 }
 0x2b9   : > { %v2010_v50 = vsel %vm1971_vm6, %v7314_v42, %v7313_v58  ;;  %v2154_v13 = vsub.f32 0.0, %v6198_v46  ;;  %v2155_v49 = vsub.f32 0.0, %v6201_v1  ;;  %v7315_v47 = vrot.slane %v5800_v34, 3  ;;  %v4428_v41 = vpop.eup %4427 }
 0x2ba   : > { %v6214_v20 = vadd.f32 %v6195_v4, %v2086_v5  ;;  %v6217_v16 = vadd.f32 %v6195_v4, %v2085_v28  ;;  %v7316_v62 = vmov %v7313_v58  ;;  %v2087_v26 = vadd.f32 %v2010_v50, %v5804_v54  ;;  %v4430_v63 = vpop.eup %4429 }
 0x2bb   : > { %v2012_v37 = vsel %vm1971_vm6, %v7316_v62, %v7315_v47  ;;  %v1889_v43 = vadd.f32 %v5869_v33, %v5872_v38  ;;  %v2242_v51 = vadd.f32 1.0, %v4426_v15  ;;  %v2200_v21 = vmul.f32 1.442695, %v2154_v13  ;;  %v4432_v32 = vpop.eup %4431  ;;  %v7319_v15 = vld [vmem:[#allocation41_spill] sm:$0xff] }
 0x2bc   : > { %v2202_v53 = vmul.f32 1.442695, %v2155_v49  ;;  %v2157_v10 = vsub.f32 0.0, %v6214_v20  ;;  %v2243_v60 = vadd.f32 1.0, %v4428_v41  ;;  %v2156_v31 = vsub.f32 0.0, %v6217_v16  ;;  %v4434_v7 = vpop.eup %4433 }
 0x2bd   : > { %v2088_v23 = vadd.f32 %v2012_v37, %v1888_v56  ;;  %v6230_v30 = vadd.f32 %v6195_v4, %v2087_v26  ;;  %4445 = vrcp.f32 %v2242_v51  ;;  %v2244_v54 = vadd.f32 1.0, %v4430_v63  ;;  %v4436_v56 = vpop.eup %4435 }
 0x2be   : > { %v2206_v5 = vmul.f32 1.442695, %v2157_v10  ;;  %v7317_v33 = vrot.slane %v5847_v27, 3  ;;  %v7318_v38 = vmov %v7315_v47  ;;  %4447 = vrcp.f32 %v2243_v60  ;;  %v4438_v37 = vpop.eup %4437 }
 0x2bf   : > { %v2245_v58 = vadd.f32 1.0, %v4432_v32  ;;  %v2204_v42 = vmul.f32 1.442695, %v2156_v31  ;;  %v6238_v50 = vadd.f32 %v6195_v4, %v2088_v23  ;;  %4449 = vrcp.f32 %v2244_v54  ;;  %v4440_v10 = vpop.eup %4439 }
 0x2c0   : > { %v2014_v28 = vsel %vm1971_vm6, %v7318_v38, %v7317_v33  ;;  %v2246_v13 = vadd.f32 1.0, %v4434_v7  ;;  %v2158_v49 = vsub.f32 0.0, %v6230_v30  ;;  %v7320_v47 = vrot.slane %v7319_v15, 3  ;;  %v4442_v23 = vpop.eup %4441  ;;  %v1242_v7 = vpop.permute.xlu0 %1241 }
 0x2c1   : > { %v7321_v62 = vmov %v7317_v33  ;;  %4451 = vrcp.f32 %v2245_v58  ;;  %v2247_v26 = vadd.f32 1.0, %v4436_v56  ;;  %v2159_v41 = vsub.f32 0.0, %v6238_v50  ;;  %v7322_v56 = vld [vmem:[#allocation40_spill] sm:$0xff]  ;;  %1320 = vst.msk [vmem:[#allocation4 + $0x90] sm:$0xff] %vm1301_vm7, %v1242_v7 }
 0x2c2   : > { %v2016_v34 = vsel %vm1971_vm6, %v7321_v62, %v7320_v47  ;;  %v2089_v51 = vadd.f32 %v2014_v28, %v1889_v43  ;;  %v2336_v63 = vmul.f32 %v4438_v37, %v6063_v44  ;;  %4453 = vrcp.f32 %v2246_v13  ;;  %v4444_v33 = vpop.eup %4443 }
 0x2c3   : > { %v2208_v60 = vmul.f32 1.442695, %v2158_v49  ;;  %v2090_v31 = vadd.f32 %v2016_v34, %v5882_v2  ;;  %v2337_v32 = vmul.f32 %v4440_v10, %v6066_v6  ;;  %4455 = vrcp.f32 %v2247_v26  ;;  %v7328_v34 = vld [vmem:[#allocation43_spill] sm:$0xff] }
 0x2c4   : > { %v2210_v27 = vmul.f32 1.442695, %v2159_v41  ;;  %v6251_v54 = vadd.f32 %v6195_v4, %v2089_v51  ;;  %2368 = vst.msk [vmem:[#allocation3 + $0x20] sm:$0xff] %vm1301_vm7, %v2336_v63  ;;  %v2248_v38 = vadd.f32 1.0, %v4442_v23  ;;  %4457 = vpow2.f32 %v2200_v21  ;;  %v1244_v41 = vpop.permute.xlu1 %1243 }
 0x2c5   : > { %v6255_v43 = vadd.f32 %v6195_v4, %v2090_v31  ;;  %v1892_v44 = vadd.f32 %v5902_v17, %v5894_v57  ;;  %2369 = vst.msk [vmem:[#allocation3 + $0x28] sm:$0xff] %vm1301_vm7, %v2337_v32  ;;  %v2398_v2 = vpack.c.bf16 %v2337_v32, %v2336_v63  ;;  %v2249_v6 = vadd.f32 1.0, %v4444_v33  ;;  %1321 = vst.msk [vmem:[#allocation4 + $0x98] sm:$0xff] %vm1301_vm7, %v1244_v41 }
 0x2c6   : > { %4459 = vpow2.f32 %v2202_v53  ;;  %v2160_v28 = vsub.f32 0.0, %v6251_v54  ;;  %v7323_v13 = vrot.slane %v7322_v56, 3  ;;  %v7324_v21 = vmov %v7320_v47  ;;  %v7325_v47 = vld [vmem:[#allocation42_spill] sm:$0xff] }
 0x2c7   : > { %4461 = vrcp.f32 %v2248_v38  ;;  %v2161_v58 = vsub.f32 0.0, %v6255_v43  ;;  %v7326_v62 = vrot.slane %v7325_v47, 3  ;;  %4250 = vmatprep.mubr.msk.bf16.mxu1 %vm1301_vm7, %v2398_v2  ;;  %v4446_v51 = vpop.eup %4445  ;;  %v1893_v10 = vadd.f32 %v5953_v45, %v5950_v8 }
 0x2c8   : > { %v2018_v49 = vsel %vm1971_vm6, %v7324_v21, %v7323_v13  ;;  %v7327_v57 = vmov %v7323_v13  ;;  %4463 = vrcp.f32 %v2249_v6  ;;  %v2212_v53 = vmul.f32 1.442695, %v2160_v28  ;;  %v4448_v32 = vpop.eup %4447 }
 0x2c9   : > { %v2020_v17 = vsel %vm1971_vm6, %v7327_v57, %v7326_v62  ;;  %v2091_v37 = vadd.f32 %v2018_v49, %v7328_v34  ;;  %4465 = vpow2.f32 %v2204_v42  ;;  %v2214_v15 = vmul.f32 1.442695, %v2161_v58  ;;  %v4450_v8 = vpop.eup %4449 }
 0x2ca   : > { %v2092_v26 = vadd.f32 %v2020_v17, %v1892_v44  ;;  %v7329_v63 = vrot.slane %v5928_v11, 3  ;;  %v7330_v31 = vmov %v7326_v62  ;;  %v2338_v33 = vmul.f32 %v4446_v51, %v6115_v52  ;;  %v1206_v44 = vpop.permute.xlu0 %1205 }
 0x2cb   : > { %4467 = vpow2.f32 %v2206_v5  ;;  %v6285_v38 = vadd.f32 %v6195_v4, %v2091_v37  ;;  %v2339_v45 = vmul.f32 %v4448_v32, %v6118_v35  ;;  %v7331_v2 = vrot.slane %v5933_v18, 3  ;;  %1302 = vst.msk [vmem:[#allocation4] sm:$0xff] %vm1301_vm7, %v1206_v44  ;;  %v4452_v52 = vpop.eup %4451 }
 0x2cc   : > { %v2022_v23 = vsel %vm1971_vm6, %v7330_v31, %v7329_v63  ;;  %v6288_v42 = vadd.f32 %v6195_v4, %v2092_v26  ;;  %4469 = vpow2.f32 %v2208_v60  ;;  %v7332_v6 = vmov %v7329_v63  ;;  %2370 = vst.msk [vmem:[#allocation3 + $0x30] sm:$0xff] %vm1301_vm7, %v2338_v33  ;;  %v1208_v60 = vpop.permute.xlu1 %1207  ;;  %v4454_v56 = vpop.eup %4453  ;;  %v7333_v26 = vld [vmem:[#allocation44_spill] sm:$0xff] }
 0x2cd   : > { %v2024_v28 = vsel %vm1971_vm6, %v7332_v6, %v7331_v2  ;;  %v2093_v7 = vadd.f32 %v2022_v23, %v1893_v10  ;;  %v2340_v5 = vmul.f32 %v4450_v8, %v6136_v29  ;;  %4471 = vpow2.f32 %v2210_v27  ;;  %2371 = vst.msk [vmem:[#allocation3 + $0x38] sm:$0xff] %vm1301_vm7, %v2339_v45  ;;  %1303 = vst.msk [vmem:[#allocation4 + $0x8] sm:$0xff] %vm1301_vm7, %v1208_v60  ;;  %v4456_v49 = vpop.eup %4455 }
 0x2ce   : > { %v2162_v58 = vsub.f32 0.0, %v6285_v38  ;;  %v2163_v35 = vsub.f32 0.0, %v6288_v42  ;;  %v2399_v11 = vpack.c.bf16 %v2339_v45, %v2338_v33  ;;  %v2341_v13 = vmul.f32 %v4452_v52, %v6140_v25  ;;  %v1238_v62 = vpop.permute.xlu0 %1237  ;;  %v4458_v57 = vpop.eup %4457 }
 0x2cf   : > { %4473 = vpow2.f32 %v2212_v53  ;;  %v2094_v21 = vadd.f32 %v2024_v28, %v5962_v61  ;;  %2372 = vst.msk [vmem:[#allocation3 + $0x40] sm:$0xff] %vm1301_vm7, %v2340_v5  ;;  %v2342_v29 = vmul.f32 %v4454_v56, %v6149_v40  ;;  %v2343_v17 = vmul.f32 %v4456_v49, %v6153_v19  ;;  %1318 = vst.msk [vmem:[#allocation4 + $0x80] sm:$0xff] %vm1301_vm7, %v1238_v62 }
 0x2d0   : > { %4475 = vpow2.f32 %v2214_v15  ;;  %v2216_v27 = vmul.f32 1.442695, %v2162_v58  ;;  %v2218_v47 = vmul.f32 1.442695, %v2163_v35  ;;  %4251 = vmatmul.mubr.msk.bf16.gmra.mrb[20].mxu1 %vm1301_vm7, %v2399_v11  ;;  %2373 = vst.msk [vmem:[#allocation3 + $0x48] sm:$0xff] %vm1301_vm7, %v2341_v13  ;;  %v2400_v25 = vpack.c.bf16 %v2341_v13, %v2340_v5  ;;  %v4460_v40 = vpop.eup %4459  ;;  %v1240_v15 = vpop.permute.xlu1 %1239 }
 0x2d1   : > { %v6311_v61 = vadd.f32 %v6195_v4, %v2093_v7  ;;  %v6314_v53 = vadd.f32 %v6195_v4, %v2094_v21  ;;  %2374 = vst.msk [vmem:[#allocation3 + $0x50] sm:$0xff] %vm1301_vm7, %v2342_v29  ;;  %v2250_v34 = vadd.f32 1.0, %v4458_v57  ;;  %v1896_v37 = vadd.f32 %v6017_v14, %v6012_v24  ;;  %v4462_v10 = vpop.eup %4461  ;;  %2375 = vst.msk [vmem:[#allocation3 + $0x58] sm:$0xff] %vm1301_vm7, %v2343_v17 }
 0x2d2   : > { %4477 = vpow2.f32 %v2216_v27  ;;  %v7334_v41 = vrot.slane %v7333_v26, 3  ;;  %v7335_v19 = vmov %v7331_v2  ;;  %4254 = vmatprep.mubr.msk.bf16.mxu1 %vm1301_vm7, %v2400_v25  ;;  %v2401_v63 = vpack.c.bf16 %v2343_v17, %v2342_v29  ;;  %1319 = vst.msk [vmem:[#allocation4 + $0x88] sm:$0xff] %vm1301_vm7, %v1240_v15  ;;  %v4464_v24 = vpop.eup %4463  ;;  %v1218_v8 = vpop.permute.xlu0 %1217 }
 0x2d3   : > { %v2251_v31 = vadd.f32 1.0, %v4460_v40  ;;  %4479 = vpow2.f32 %v2218_v47  ;;  %v2164_v23 = vsub.f32 0.0, %v6311_v61  ;;  %v2344_v14 = vmul.f32 %v4462_v10, %v6145_v59  ;;  %v4466_v45 = vpop.eup %4465  ;;  %1308 = vst.msk [vmem:[#allocation4 + $0x30] sm:$0xff] %vm1301_vm7, %v1218_v8 }
 0x2d4   : > { %v2026_v51 = vsel %vm1971_vm6, %v7335_v19, %v7334_v41  ;;  %4481 = vrcp.f32 %v2250_v34  ;;  %v2165_v18 = vsub.f32 0.0, %v6314_v53  ;;  %v7336_v32 = vrot.slane %v6000_v36, 3  ;;  %v1220_v35 = vpop.permute.xlu1 %1219 }
 0x2d5   : > { %v7337_v33 = vmov %v7334_v41  ;;  %v2345_v2 = vmul.f32 %v4464_v24, %v6156_v0  ;;  %4483 = vrcp.f32 %v2251_v31  ;;  %v2220_v6 = vmul.f32 1.442695, %v2164_v23  ;;  %v4468_v59 = vpop.eup %4467  ;;  %2376 = vst.msk [vmem:[#allocation3 + $0x60] sm:$0xff] %vm1301_vm7, %v2344_v14  ;;  %1309 = vst.msk [vmem:[#allocation4 + $0x38] sm:$0xff] %vm1301_vm7, %v1220_v35  ;;  %v7349_v35 = vld [vmem:[#allocation16_spill] sm:$0xff] }
 0x2d6   : > { %v2028_v44 = vsel %vm1971_vm6, %v7337_v33, %v7336_v32  ;;  %v2095_v28 = vadd.f32 %v2026_v51, %v5964_v55  ;;  %v2252_v7 = vadd.f32 1.0, %v4466_v45  ;;  %v2222_v52 = vmul.f32 1.442695, %v2165_v18  ;;  %v4470_v60 = vpop.eup %4469  ;;  %v1250_v29 = vpop.permute.xlu0 %1249 }
 0x2d7   : > { %v2096_v5 = vadd.f32 %v2028_v44, %v1896_v37  ;;  %v1897_v58 = vadd.f32 %v6078_v3, %v6075_v48  ;;  %2377 = vst.msk [vmem:[#allocation3 + $0x68] sm:$0xff] %vm1301_vm7, %v2345_v2  ;;  %v2402_v0 = vpack.c.bf16 %v2345_v2, %v2344_v14  ;;  %v2253_v56 = vadd.f32 1.0, %v4468_v59  ;;  %v4472_v11 = vpop.eup %4471  ;;  %1324 = vst.msk [vmem:[#allocation4 + $0xb0] sm:$0xff] %vm1301_vm7, %v1250_v29  ;;  %v7346_v2 = vld [vmem:[#allocation47_spill] sm:$0xff] }
 0x2d8   : > { %4485 = vpow2.f32 %v2220_v6  ;;  %v6344_v55 = vadd.f32 %v6195_v4, %v2095_v28  ;;  %v2254_v13 = vadd.f32 1.0, %v4470_v60  ;;  %v7338_v3 = vrot.slane %v6057_v22, 3  ;;  %4255 = vmatmul.mubr.msk.bf16.gmra.mrb[24].mxu1 %vm1301_vm7, %v2401_v63  ;;  %v1252_v26 = vpop.permute.xlu1 %1251  ;;  %v7342_v63 = vld [vmem:[#allocation46_spill] sm:$0xff] }
 0x2d9   : > { %4487 = vrcp.f32 %v2252_v7  ;;  %v6348_v21 = vadd.f32 %v6195_v4, %v2096_v5  ;;  %v7339_v48 = vmov %v7336_v32  ;;  %v4474_v27 = vpop.eup %4473  ;;  %v2255_v47 = vadd.f32 1.0, %v4472_v11  ;;  %4258 = vmatprep.mubr.msk.bf16.mxu1 %vm1301_vm7, %v2402_v0  ;;  %1325 = vst.msk [vmem:[#allocation4 + $0xb8] sm:$0xff] %vm1301_vm7, %v1252_v26  ;;  %v7343_v32 = vld [vmem:[#allocation45_spill] sm:$0xff] }
 0x2da   : > { %v2030_v49 = vsel %vm1971_vm6, %v7339_v48, %v7338_v3  ;;  %4489 = vrcp.f32 %v2253_v56  ;;  %v2166_v62 = vsub.f32 0.0, %v6344_v55  ;;  %v7340_v57 = vrot.slane %v6060_v9, 3  ;;  %v4476_v40 = vpop.eup %4475  ;;  %v1214_v23 = vpop.permute.xlu0 %1213 }
 0x2db   : > { %v7341_v25 = vmov %v7338_v3  ;;  %4491 = vrcp.f32 %v2254_v13  ;;  %v2256_v36 = vadd.f32 1.0, %v4474_v27  ;;  %v2167_v34 = vsub.f32 0.0, %v6348_v21  ;;  %1306 = vst.msk [vmem:[#allocation4 + $0x20] sm:$0xff] %vm1301_vm7, %v1214_v23 }
 0x2dc   : > { %v2032_v17 = vsel %vm1971_vm6, %v7341_v25, %v7340_v57  ;;  %v2097_v37 = vadd.f32 %v2030_v49, %v1897_v58  ;;  %4493 = vrcp.f32 %v2255_v47  ;;  %v2257_v41 = vadd.f32 1.0, %v4476_v40  ;;  %v4478_v22 = vpop.eup %4477  ;;  %v1216_v7 = vpop.permute.xlu1 %1215 }
 0x2dd   : > { %v2224_v19 = vmul.f32 1.442695, %v2166_v62  ;;  %v2098_v51 = vadd.f32 %v2032_v17, %v6083_v39  ;;  %4495 = vrcp.f32 %v2256_v36  ;;  %v2226_v15 = vmul.f32 1.442695, %v2167_v34  ;;  %v4480_v24 = vpop.eup %4479  ;;  %1307 = vst.msk [vmem:[#allocation4 + $0x28] sm:$0xff] %vm1301_vm7, %v1216_v7 }
 0x2de   : > { %v6368_v10 = vadd.f32 %v6195_v4, %v2097_v37  ;;  %v1900_v31 = vadd.f32 %v6037_v12, %v7342_v63  ;;  %4497 = vrcp.f32 %v2257_v41  ;;  %v2258_v14 = vadd.f32 1.0, %v4478_v22  ;;  %v4482_v8 = vpop.eup %4481  ;;  %v1246_v11 = vpop.permute.xlu0 %1245 }
 0x2df   : > { %v6373_v18 = vadd.f32 %v6195_v4, %v2098_v51  ;;  %v7344_v39 = vrot.slane %v7343_v32, 3  ;;  %v7345_v33 = vmov %v7340_v57  ;;  %v2259_v45 = vadd.f32 1.0, %v4480_v24  ;;  %v4484_v5 = vpop.eup %4483  ;;  %1322 = vst.msk [vmem:[#allocation4 + $0xa0] sm:$0xff] %vm1301_vm7, %v1246_v11 }
 0x2e0   : > { %4499 = vpow2.f32 %v2222_v52  ;;  %v2168_v12 = vsub.f32 0.0, %v6368_v10  ;;  %v7347_v6 = vrot.slane %v7346_v2, 3  ;;  %v2346_v58 = vmul.f32 %v4482_v8, %v6198_v46  ;;  %v1248_v27 = vpop.permute.xlu1 %1247 }
 0x2e1   : > { %v2034_v44 = vsel %vm1971_vm6, %v7345_v33, %v7344_v39  ;;  %v7348_v28 = vmov %v7344_v39  ;;  %4501 = vrcp.f32 %v2258_v14  ;;  %v2169_v9 = vsub.f32 0.0, %v6373_v18  ;;  %1323 = vst.msk [vmem:[#allocation4 + $0xa8] sm:$0xff] %vm1301_vm7, %v1248_v27 }
 0x2e2   : > { %v2036_v59 = vsel %vm1971_vm6, %v7348_v28, %v7347_v6  ;;  %v2099_v60 = vadd.f32 %v2034_v44, %v7349_v35  ;;  %v2347_v52 = vmul.f32 %v4484_v5, %v6201_v1  ;;  %4503 = vrcp.f32 %v2259_v45  ;;  %v4486_v13 = vpop.eup %4485  ;;  %2378 = vst.msk [vmem:[#allocation3 + $0x70] sm:$0xff] %vm1301_vm7, %v2346_v58  ;;  %v1226_v36 = vpop.permute.xlu0 %1225 }
 0x2e3   : > { %v2228_v0 = vmul.f32 1.442695, %v2168_v12  ;;  %v2100_v56 = vadd.f32 %v2036_v59, %v1900_v31  ;;  %4505 = vpow2.f32 %v2224_v19  ;;  %v2230_v3 = vmul.f32 1.442695, %v2169_v9  ;;  %v4488_v48 = vpop.eup %4487  ;;  %1312 = vst.msk [vmem:[#allocation4 + $0x50] sm:$0xff] %vm1301_vm7, %v1226_v36 }
 0x2e4   : > { %v6394_v46 = vadd.f32 %v6195_v4, %v2099_v60  ;;  %2379 = vst.msk [vmem:[#allocation3 + $0x78] sm:$0xff] %vm1301_vm7, %v2347_v52  ;;  %v2403_v49 = vpack.c.bf16 %v2347_v52, %v2346_v58  ;;  %v2260_v29 = vadd.f32 1.0, %v4486_v13  ;;  %4507 = vpow2.f32 %v2226_v15  ;;  %v4490_v62 = vpop.eup %4489  ;;  %v1228_v51 = vpop.permute.xlu1 %1227 }
 0x2e5   : > { %v6399_v1 = vadd.f32 %v6195_v4, %v2100_v56  ;;  %v4715_v47 = vmov 0   ;;  %v2348_v57 = vmul.f32 %v4488_v48, %v6217_v16  ;;  %4509 = vpow2.f32 %v2228_v0  ;;  %v4492_v17 = vpop.eup %4491  ;;  %1313 = vst.msk [vmem:[#allocation4 + $0x58] sm:$0xff] %vm1301_vm7, %v1228_v51 }
 0x2e6   : > { %4339 = vset.pattern.permute.xlu1 %v4715_v47  ;;  %4340 = vset.pattern.permute.xlu0 %v4715_v47  ;;  %v2170_v25 = vsub.f32 0.0, %v6394_v46  ;;  %v2349_v40 = vmul.f32 %v4490_v62, %v6214_v20  ;;  %4511 = vrcp.f32 %v2260_v29  ;;  %v4494_v34 = vpop.eup %4493  ;;  %v2350_v37 = vmul.f32 %v4492_v17, %v6230_v30 }
 0x2e7   : > { %4259 = vmatmul.mubr.msk.bf16.gmra.mrb[28].mxu1 %vm1301_vm7, %v2403_v49  ;;  %v2171_v4 = vsub.f32 0.0, %v6399_v1  ;;  %2380 = vst.msk [vmem:[#allocation3 + $0x80] sm:$0xff] %vm1301_vm7, %v2348_v57  ;;  %4513 = vpow2.f32 %v2230_v3  ;;  %v4496_v26 = vpop.eup %4495  ;;  %v2351_v19 = vmul.f32 %v4494_v34, %v6238_v50  ;;  %v1258_v50 = vpop.permute.xlu0 %1257 }
 0x2e8   : > { %v2232_v16 = vmul.f32 1.442695, %v2170_v25  ;;  %2381 = vst.msk [vmem:[#allocation3 + $0x88] sm:$0xff] %vm1301_vm7, %v2349_v40  ;;  %v2404_v41 = vpack.c.bf16 %v2349_v40, %v2348_v57  ;;  %v4498_v22 = vpop.eup %4497  ;;  %2382 = vst.msk [vmem:[#allocation3 + $0x90] sm:$0xff] %vm1301_vm7, %v2350_v37  ;;  %v2352_v15 = vmul.f32 %v4496_v26, %v6251_v54  ;;  %v1260_v39 = vpop.permute.xlu1 %1259 }
 0x2e9   : > { %v2234_v20 = vmul.f32 1.442695, %v2171_v4  ;;  %2383 = vst.msk [vmem:[#allocation3 + $0x98] sm:$0xff] %vm1301_vm7, %v2351_v19  ;;  %v2405_v63 = vpack.c.bf16 %v2351_v19, %v2350_v37  ;;  %v2353_v31 = vmul.f32 %v4498_v22, %v6255_v43  ;;  %1328 = vst.msk [vmem:[#allocation4 + $0xd0] sm:$0xff] %vm1301_vm7, %v1258_v50 }
 0x2ea   : > { %4515 = vpow2.f32 %v2232_v16  ;;  %v4500_v30 = vpop.eup %4499  ;;  %4262 = vmatprep.mubr.msk.bf16.mxu1 %vm1301_vm7, %v2404_v41  ;;  %2384 = vst.msk [vmem:[#allocation3 + $0xa0] sm:$0xff] %vm1301_vm7, %v2352_v15  ;;  %1329 = vst.msk [vmem:[#allocation4 + $0xd8] sm:$0xff] %vm1301_vm7, %v1260_v39 }
 0x2eb   : > { %4517 = vpow2.f32 %v2234_v20  ;;  %v4502_v23 = vpop.eup %4501  ;;  %v2261_v24 = vadd.f32 1.0, %v4500_v30  ;;  %2385 = vst.msk [vmem:[#allocation3 + $0xa8] sm:$0xff] %vm1301_vm7, %v2353_v31  ;;  %v2406_v14 = vpack.c.bf16 %v2353_v31, %v2352_v15  ;;  %v1222_v45 = vpop.permute.xlu0 %1221 }
 0x2ec   : > { %v4504_v54 = vpop.eup %4503  ;;  %v2354_v32 = vmul.f32 %v4502_v23, %v6285_v38  ;;  %1310 = vst.msk [vmem:[#allocation4 + $0x40] sm:$0xff] %vm1301_vm7, %v1222_v45  ;;  %v1224_v28 = vpop.permute.xlu1 %1223 }
 0x2ed   : > { %v4506_v33 = vpop.eup %4505  ;;  %v2355_v44 = vmul.f32 %v4504_v54, %v6288_v42  ;;  %4519 = vrcp.f32 %v2261_v24  ;;  %1311 = vst.msk [vmem:[#allocation4 + $0x48] sm:$0xff] %vm1301_vm7, %v1224_v28 }
 0x2ee   : > { %v4508_v43 = vpop.eup %4507  ;;  %2386 = vst.msk [vmem:[#allocation3 + $0xb0] sm:$0xff] %vm1301_vm7, %v2354_v32  ;;  %v2262_v8 = vadd.f32 1.0, %v4506_v33 }
 0x2ef   : > { %4263 = vmatmul.mubr.msk.bf16.gmra.mrb[32].mxu1 %vm1301_vm7, %v2405_v63  ;;  %v4510_v12 = vpop.eup %4509  ;;  %2387 = vst.msk [vmem:[#allocation3 + $0xb8] sm:$0xff] %vm1301_vm7, %v2355_v44  ;;  %v2407_v38 = vpack.c.bf16 %v2355_v44, %v2354_v32  ;;  %v2263_v2 = vadd.f32 1.0, %v4508_v43  ;;  %v1254_v58 = vpop.permute.xlu0 %1253 }
 0x2f0   : > { %4266 = vmatprep.mubr.msk.bf16.mxu1 %vm1301_vm7, %v2406_v14  ;;  %v4512_v42 = vpop.eup %4511  ;;  %4521 = vrcp.f32 %v2262_v8  ;;  %v2264_v6 = vadd.f32 1.0, %v4510_v12  ;;  %1326 = vst.msk [vmem:[#allocation4 + $0xc0] sm:$0xff] %vm1301_vm7, %v1254_v58  ;;  %v1256_v52 = vpop.permute.xlu1 %1255 }
 0x2f1   : > { %v4514_v59 = vpop.eup %4513  ;;  %v2356_v7 = vmul.f32 %v4512_v42, %v6311_v61  ;;  %4523 = vrcp.f32 %v2263_v2  ;;  %1327 = vst.msk [vmem:[#allocation4 + $0xc8] sm:$0xff] %vm1301_vm7, %v1256_v52 }
 0x2f2   : > { %v2265_v5 = vadd.f32 1.0, %v4514_v59  ;;  %4525 = vrcp.f32 %v2264_v6 }
 0x2f3   : > { %2388 = vst.msk [vmem:[#allocation3 + $0xc0] sm:$0xff] %vm1301_vm7, %v2356_v7  ;;  %v1234_v61 = vpop.permute.xlu0 %1233 }
 0x2f4   : > { %v4516_v9 = vpop.eup %4515  ;;  %4527 = vrcp.f32 %v2265_v5  ;;  %1316 = vst.msk [vmem:[#allocation4 + $0x70] sm:$0xff] %vm1301_vm7, %v1234_v61  ;;  %v1236_v13 = vpop.permute.xlu1 %1235 }
 0x2f5   : > { %v4518_v35 = vpop.eup %4517  ;;  %v2266_v60 = vadd.f32 1.0, %v4516_v9  ;;  %1317 = vst.msk [vmem:[#allocation4 + $0x78] sm:$0xff] %vm1301_vm7, %v1236_v13 }
 0x2f6   : > { %v2267_v0 = vadd.f32 1.0, %v4518_v35  ;;  %v6497_v35 = vld [vmem:[%s7141_s7] ss:$0 sm:$0xff] }
 0x2f7   : > { %4267 = vmatmul.mubr.msk.bf16.gmra.mrb[36].mxu1 %vm1301_vm7, %v2407_v38  ;;  %4529 = vrcp.f32 %v2266_v60  ;;  %v4520_v56 = vpop.eup %4519  ;;  %v1266_v49 = vpop.permute.xlu0 %1265  ;;  %v6503_v60 = vld [vmem:[%s7142_s8] ss:$0 sm:$0xff] }
 0x2f8   : > { %4531 = vrcp.f32 %v2267_v0  ;;  %v2357_v11 = vmul.f32 %v4520_v56, %v6314_v53  ;;  %1332 = vst.msk [vmem:[#allocation4 + $0xf0] sm:$0xff] %vm1301_vm7, %v1266_v49  ;;  %v1268_v57 = vpop.permute.xlu1 %1267 }
 0x2f9   : > { %1333 = vst.msk [vmem:[#allocation4 + $0xf8] sm:$0xff] %vm1301_vm7, %v1268_v57 }
 0x2fa   : > { %v4522_v3 = vpop.eup %4521  ;;  %2389 = vst.msk [vmem:[#allocation3 + $0xc8] sm:$0xff] %vm1301_vm7, %v2357_v11  ;;  %v2408_v48 = vpack.c.bf16 %v2357_v11, %v2356_v7 }
 0x2fb   : > { %v4524_v29 = vpop.eup %4523  ;;  %v2358_v27 = vmul.f32 %v4522_v3, %v6344_v55  ;;  %v1230_v40 = vpop.permute.xlu0 %1229 }
 0x2fc   : > { %v4526_v47 = vpop.eup %4525  ;;  %4270 = vmatprep.mubr.msk.bf16.mxu1 %vm1301_vm7, %v2408_v48  ;;  %v2359_v62 = vmul.f32 %v4524_v29, %v6348_v21  ;;  %1314 = vst.msk [vmem:[#allocation4 + $0x60] sm:$0xff] %vm1301_vm7, %v1230_v40  ;;  %v1232_v21 = vpop.permute.xlu1 %1231 }
 0x2fd   : > { %2390 = vst.msk [vmem:[#allocation3 + $0xd0] sm:$0xff] %vm1301_vm7, %v2358_v27  ;;  %v2360_v53 = vmul.f32 %v4526_v47, %v6368_v10  ;;  %1315 = vst.msk [vmem:[#allocation4 + $0x68] sm:$0xff] %vm1301_vm7, %v1232_v21 }
 0x2fe   : > { %v4528_v25 = vpop.eup %4527  ;;  %2391 = vst.msk [vmem:[#allocation3 + $0xd8] sm:$0xff] %vm1301_vm7, %v2359_v62  ;;  %v2409_v17 = vpack.c.bf16 %v2359_v62, %v2358_v27 }
 0x2ff   : > { %v2361_v55 = vmul.f32 %v4528_v25, %v6373_v18  ;;  %2392 = vst.msk [vmem:[#allocation3 + $0xe0] sm:$0xff] %vm1301_vm7, %v2360_v53  ;;  %v1262_v16 = vpop.permute.xlu0 %1261 }
 0x300   : > { %4271 = vmatmul.mubr.msk.bf16.gmra.mrb[40].mxu1 %vm1301_vm7, %v2409_v17  ;;  %1330 = vst.msk [vmem:[#allocation4 + $0xe0] sm:$0xff] %vm1301_vm7, %v1262_v16  ;;  %v1264_v26 = vpop.permute.xlu1 %1263 }
 0x301   : > { %v4530_v4 = vpop.eup %4529  ;;  %2393 = vst.msk [vmem:[#allocation3 + $0xe8] sm:$0xff] %vm1301_vm7, %v2361_v55  ;;  %v2410_v10 = vpack.c.bf16 %v2361_v55, %v2360_v53  ;;  %1331 = vst.msk [vmem:[#allocation4 + $0xe8] sm:$0xff] %vm1301_vm7, %v1264_v26 }
 0x302   : > { %v4532_v36 = vpop.eup %4531  ;;  %v2362_v34 = vmul.f32 %v4530_v4, %v6394_v46 }
 0x303   : > { %v2363_v37 = vmul.f32 %v4532_v36, %v6399_v1  ;;  %4274 = vmatprep.mubr.msk.bf16.mxu1 %vm1301_vm7, %v2410_v10 }
 0x304   : > { %2394 = vst.msk [vmem:[#allocation3 + $0xf0] sm:$0xff] %vm1301_vm7, %v2362_v34 }
 0x305   : > { %2395 = vst.msk [vmem:[#allocation3 + $0xf8] sm:$0xff] %vm1301_vm7, %v2363_v37  ;;  %v2411_v18 = vpack.c.bf16 %v2363_v37, %v2362_v34 }
 0x308   : > { %4275 = vmatmul.mubr.msk.bf16.gmra.mrb[44].mxu1 %vm1301_vm7, %v2411_v18 }
 0x38a   : > { %v4248_v46 = vpop.f32.mrb[16].mxu1 }
 0x38b   : > { %2797 = vperm.xlu1 %4339, %v4248_v46   ;;  %2662 = vrot.lane.b32.xlu0 %v4248_v46, %s4716_s28  ;;  %v2499_v1 = vpop.f32.mrb[17].mxu1 }
 0x38c   : > { %v4249_v41 = vpop.f32.mrb[18].mxu1 }
 0x38d   : > { %v2502_v19 = vpop.f32.mrb[19].mxu1 }
 0x38f   : > { %2658 = vrot.lane.b32.xlu0 %v2499_v1, %s4716_s28  ;;  %2664 = vrot.lane.b32.xlu1 %v4249_v41, %s4716_s28 }
 0x393   : > { %2789 = vperm.xlu0 %4340, %v2499_v1   ;;  %2660 = vrot.lane.b32.xlu1 %v2502_v19, %s4716_s28 }
 0x397   : > { %2801 = vperm.xlu0 %4340, %v4249_v41   ;;  %2793 = vperm.xlu1 %4339, %v2502_v19  }
 0x3a3   : > { %v4252_v20 = vpop.f32.mrb[20].mxu1 }
 0x3a4   : > { %v2515_v51 = vpop.f32.mrb[21].mxu1  ;;  %2813 = vperm.xlu1 %4339, %v4252_v20   ;;  %2670 = vrot.lane.b32.xlu0 %v4252_v20, %s4716_s28 }
 0x3a5   : > { %v4253_v22 = vpop.f32.mrb[22].mxu1 }
 0x3a6   : > { %v2518_v15 = vpop.f32.mrb[23].mxu1 }
 0x3a8   : > { %2805 = vperm.xlu1 %4339, %v2515_v51   ;;  %2666 = vrot.lane.b32.xlu0 %v2515_v51, %s4716_s28 }
 0x3ab   : > { %v4256_v30 = vpop.f32.mrb[24].mxu1 }
 0x3ac   : > { %v2531_v63 = vpop.f32.mrb[25].mxu1  ;;  %2817 = vperm.xlu0 %4340, %v4253_v22   ;;  %2672 = vrot.lane.b32.xlu1 %v4253_v22, %s4716_s28 }
 0x3ad   : > { %v4257_v31 = vpop.f32.mrb[26].mxu1 }
 0x3ae   : > { %v2534_v50 = vpop.f32.mrb[27].mxu1 }
 0x3b0   : > { %2809 = vperm.xlu0 %4340, %v2518_v15   ;;  %2668 = vrot.lane.b32.xlu1 %v2518_v15, %s4716_s28 }
 0x3b4   : > { %2829 = vperm.xlu1 %4339, %v4256_v30   ;;  %2678 = vrot.lane.b32.xlu0 %v4256_v30, %s4716_s28 }
 0x3b8   : > { %2821 = vperm.xlu1 %4339, %v2531_v63   ;;  %2674 = vrot.lane.b32.xlu0 %v2531_v63, %s4716_s28 }
 0x3ba   : > { %v4260_v23 = vpop.f32.mrb[28].mxu1 }
 0x3bb   : > { %v2547_v24 = vpop.f32.mrb[29].mxu1 }
 0x3bc   : > { %v4261_v54 = vpop.f32.mrb[30].mxu1  ;;  %2833 = vperm.xlu0 %4340, %v4257_v31   ;;  %2680 = vrot.lane.b32.xlu1 %v4257_v31, %s4716_s28 }
 0x3bd   : > { %v2550_v14 = vpop.f32.mrb[31].mxu1 }
 0x3c0   : > { %2825 = vperm.xlu0 %4340, %v2534_v50   ;;  %2676 = vrot.lane.b32.xlu1 %v2534_v50, %s4716_s28 }
 0x3c2   : > { %v4264_v32 = vpop.f32.mrb[32].mxu1 }
 0x3c3   : > { %v2563_v39 = vpop.f32.mrb[33].mxu1 }
 0x3c4   : > { %v4265_v33 = vpop.f32.mrb[34].mxu1  ;;  %2845 = vperm.xlu1 %4339, %v4260_v23   ;;  %2686 = vrot.lane.b32.xlu0 %v4260_v23, %s4716_s28 }
 0x3c5   : > { %v2566_v44 = vpop.f32.mrb[35].mxu1 }
 0x3c8   : > { %2837 = vperm.xlu1 %4339, %v2547_v24   ;;  %2682 = vrot.lane.b32.xlu0 %v2547_v24, %s4716_s28 }
 0x3ca   : > { %v4268_v43 = vpop.f32.mrb[36].mxu1 }
 0x3cb   : > { %v2579_v8 = vpop.f32.mrb[37].mxu1 }
 0x3cc   : > { %v4269_v45 = vpop.f32.mrb[38].mxu1  ;;  %2849 = vperm.xlu0 %4340, %v4261_v54   ;;  %2688 = vrot.lane.b32.xlu1 %v4261_v54, %s4716_s28 }
 0x3cd   : > { %v2582_v12 = vpop.f32.mrb[39].mxu1 }
 0x3d0   : > { %2841 = vperm.xlu0 %4340, %v2550_v14   ;;  %2684 = vrot.lane.b32.xlu1 %v2550_v14, %s4716_s28 }
 0x3d3   : > { %v4272_v38 = vpop.f32.mrb[40].mxu1 }
 0x3d4   : > { %v2595_v2 = vpop.f32.mrb[41].mxu1  ;;  %2861 = vperm.xlu1 %4339, %v4264_v32   ;;  %2694 = vrot.lane.b32.xlu0 %v4264_v32, %s4716_s28 }
 0x3d5   : > { %v4273_v42 = vpop.f32.mrb[42].mxu1 }
 0x3d6   : > { %v2598_v6 = vpop.f32.mrb[43].mxu1 }
 0x3d8   : > { %2853 = vperm.xlu1 %4339, %v2563_v39   ;;  %2690 = vrot.lane.b32.xlu0 %v2563_v39, %s4716_s28 }
 0x3db   : > { %v4276_v28 = vpop.f32.mrb[44].mxu1 }
 0x3dc   : > { %v2611_v59 = vpop.f32.mrb[45].mxu1  ;;  %2865 = vperm.xlu0 %4340, %v4265_v33   ;;  %2696 = vrot.lane.b32.xlu1 %v4265_v33, %s4716_s28 }
 0x3dd   : > { %v4277_v7 = vpop.f32.mrb[46].mxu1 }
 0x3de   : > { %v2614_v5 = vpop.f32.mrb[47].mxu1 }
 0x3e0   : > { %2857 = vperm.xlu0 %4340, %v2566_v44   ;;  %2692 = vrot.lane.b32.xlu1 %v2566_v44, %s4716_s28 }
 0x3e4   : > { %2877 = vperm.xlu1 %4339, %v4268_v43   ;;  %2702 = vrot.lane.b32.xlu0 %v4268_v43, %s4716_s28 }
 0x3e8   : > { %2869 = vperm.xlu1 %4339, %v2579_v8   ;;  %2698 = vrot.lane.b32.xlu0 %v2579_v8, %s4716_s28 }
 0x3ec   : > { %2881 = vperm.xlu0 %4340, %v4269_v45   ;;  %2704 = vrot.lane.b32.xlu1 %v4269_v45, %s4716_s28 }
 0x3f0   : > { %2873 = vperm.xlu0 %4340, %v2582_v12   ;;  %2700 = vrot.lane.b32.xlu1 %v2582_v12, %s4716_s28 }
 0x3f4   : > { %2893 = vperm.xlu1 %4339, %v4272_v38   ;;  %2710 = vrot.lane.b32.xlu0 %v4272_v38, %s4716_s28 }
 0x3f8   : > { %2885 = vperm.xlu1 %4339, %v2595_v2   ;;  %2706 = vrot.lane.b32.xlu0 %v2595_v2, %s4716_s28 }
 0x3fc   : > { %2897 = vperm.xlu0 %4340, %v4273_v42   ;;  %2712 = vrot.lane.b32.xlu1 %v4273_v42, %s4716_s28 }
 0x3fd   : > { %v2663_v58 = vpop.permute.xlu0 %2662 }
 0x3fe   : > { %2757 = vst.msk [vmem:[#allocation5 + $0x10] sm:$0xff] %vm2754_vm8, %v2663_v58 }
 0x400   : > { %2889 = vperm.xlu0 %4340, %v2598_v6   ;;  %2708 = vrot.lane.b32.xlu1 %v2598_v6, %s4716_s28  ;;  %v4717_v6 = vmov 0.0  }
 0x401   : > { %v2659_v9 = vpop.permute.xlu0 %2658  ;;  %3249 = vst.msk [vmem:[#allocation6] sm:$0xff] %vm1301_vm7, %v4717_v6  ;;  %3250 = vst.msk [vmem:[#allocation6 + $0x8] sm:$0xff] %vm1301_vm7, %v4717_v6 }
 0x402   : > { %2755 = vst.msk [vmem:[#allocation5] sm:$0xff] %vm2754_vm8, %v2659_v9 }
 0x404   : > { %2718 = vrot.lane.b32.xlu0 %v4276_v28, %s4716_s28  ;;  %2901 = vperm.xlu1 %4339, %v2611_v59  }
 0x408   : > { %2714 = vrot.lane.b32.xlu0 %v2611_v59, %s4716_s28  ;;  %2720 = vrot.lane.b32.xlu1 %v4277_v7, %s4716_s28 }
 0x40a   : > { %v2798_v52 = vpop.permute.xlu1 %2797 }
 0x40b   : > { %v2924_v0 = vmul.f32 %v6497_v35, %v2798_v52 }
 0x40c   : > { %2905 = vperm.xlu0 %4340, %v2614_v5   ;;  %2716 = vrot.lane.b32.xlu1 %v2614_v5, %s4716_s28 }
 0x40d   : > { %v2963_v61 = vadd.f32 %v6503_v60, %v2924_v0 }
 0x40e   : > { %v2665_v56 = vpop.permute.xlu1 %2664 }
 0x40f   : > { %v3029_v11 = vmul.f32 1.442695, %v2963_v61  ;;  %2758 = vst.msk [vmem:[#allocation5 + $0x18] sm:$0xff] %vm2754_vm8, %v2665_v56  ;;  %vm2995_vm9 = vcmp.gt.f32.partialorder %v2963_v61, 20.0 }
 0x410   : > { %2913 = vperm.xlu0 %4340, %v4277_v7   ;;  %2909 = vperm.xlu1 %4339, %v4276_v28  }
 0x411   : > { %4533 = vpow2.f32 %v3029_v11 }
 0x412   : > { %v2661_v13 = vpop.permute.xlu1 %2660  ;;  %v2790_v3 = vpop.permute.xlu0 %2789 }
 0x413   : > { %2756 = vst.msk [vmem:[#allocation5 + $0x8] sm:$0xff] %vm2754_vm8, %v2661_v13  ;;  %v2922_v48 = vmul.f32 %v6497_v35, %v2790_v3 }
 0x415   : > { %v6511_v49 = vadd.f32 %v6503_v60, %v2922_v48 }
 0x416   : > { %v2794_v29 = vpop.permute.xlu1 %2793  ;;  %v2802_v27 = vpop.permute.xlu0 %2801 }
 0x417   : > { %v3025_v47 = vmul.f32 1.442695, %v6511_v49  ;;  %v2923_v62 = vmul.f32 %v6497_v35, %v2794_v29  ;;  %v2925_v57 = vmul.f32 %v6497_v35, %v2802_v27  ;;  %vm2993_vm10 = vcmp.gt.f32.partialorder %v6511_v49, 20.0 }
 0x419   : > { %4535 = vpow2.f32 %v3025_v47  ;;  %v6517_v53 = vadd.f32 %v6503_v60, %v2923_v62  ;;  %v6520_v25 = vadd.f32 %v6503_v60, %v2925_v57 }
 0x41a   : > { %v2671_v17 = vpop.permute.xlu0 %2670 }
 0x41b   : > { %v4534_v40 = vpop.eup %4533  ;;  %v3027_v55 = vmul.f32 1.442695, %v6517_v53  ;;  %v3031_v4 = vmul.f32 1.442695, %v6520_v25  ;;  %2761 = vst.msk [vmem:[#allocation5 + $0x30] sm:$0xff] %vm2754_vm8, %v2671_v17  ;;  %vm2994_vm11 = vcmp.gt.f32.partialorder %v6517_v53, 20.0 }
 0x41c   : > { %v3091_v21 = vadd.f32 1.0, %v4534_v40  ;;  %vm2996_vm12 = vcmp.gt.f32.partialorder %v6520_v25, 20.0 }
 0x41d   : > { %4537 = vpow2.f32 %v3027_v55 }
 0x41e   : > { %4539 = vlog2.f32 %v3091_v21  ;;  %v2667_v36 = vpop.permute.xlu0 %2666 }
 0x41f   : > { %4541 = vpow2.f32 %v3031_v4  ;;  %2759 = vst.msk [vmem:[#allocation5 + $0x20] sm:$0xff] %vm2754_vm8, %v2667_v36 }
 0x423   : > { %v2814_v10 = vpop.permute.xlu1 %2813  ;;  %v4536_v37 = vpop.eup %4535 }
 0x424   : > { %v2928_v34 = vmul.f32 %v6497_v35, %v2814_v10  ;;  %v3089_v18 = vadd.f32 1.0, %v4536_v37 }
 0x426   : > { %v6528_v16 = vadd.f32 %v6503_v60, %v2928_v34  ;;  %4543 = vlog2.f32 %v3089_v18 }
 0x427   : > { %v2806_v26 = vpop.permute.xlu1 %2805  ;;  %v4538_v41 = vpop.eup %4537 }
 0x428   : > { %v3037_v46 = vmul.f32 1.442695, %v6528_v16  ;;  %v2926_v1 = vmul.f32 %v6497_v35, %v2806_v26  ;;  %v4540_v20 = vpop.eup %4539  ;;  %v3090_v51 = vadd.f32 1.0, %v4538_v41  ;;  %vm2999_vm13 = vcmp.gt.f32.partialorder %v6528_v16, 20.0 }
 0x429   : > { %v4542_v30 = vpop.eup %4541  ;;  %v3126_v63 = vmul.f32 0.6931472, %v4540_v20 }
 0x42a   : > { %4545 = vpow2.f32 %v3037_v46  ;;  %v6533_v19 = vadd.f32 %v6503_v60, %v2926_v1  ;;  %v3092_v23 = vadd.f32 1.0, %v4542_v30 }
 0x42b   : > { %v2673_v22 = vpop.permute.xlu1 %2672  ;;  %v2818_v15 = vpop.permute.xlu0 %2817  ;;  %4547 = vlog2.f32 %v3090_v51  ;;  %v3187_v24 = vsel %vm2995_vm9, %v2963_v61, %v3126_v63 }
 0x42c   : > { %v3033_v31 = vmul.f32 1.442695, %v6533_v19  ;;  %2762 = vst.msk [vmem:[#allocation5 + $0x38] sm:$0xff] %vm2754_vm8, %v2673_v22  ;;  %v2929_v50 = vmul.f32 %v6497_v35, %v2818_v15  ;;  %vm2997_vm14 = vcmp.gt.f32.partialorder %v6533_v19, 20.0 }
 0x42d   : > { %3219 = vst.msk [vmem:[#allocation2 + $0x10] sm:$0xff] %vm1301_vm7, %v3187_v24 }
 0x42e   : > { %4549 = vpow2.f32 %v3033_v31  ;;  %v6539_v54 = vadd.f32 %v6503_v60, %v2929_v50 }
 0x42f   : > { %4551 = vlog2.f32 %v3092_v23  ;;  %v2669_v14 = vpop.permute.xlu1 %2668  ;;  %v2810_v32 = vpop.permute.xlu0 %2809 }
 0x430   : > { %v3039_v39 = vmul.f32 1.442695, %v6539_v54  ;;  %2760 = vst.msk [vmem:[#allocation5 + $0x28] sm:$0xff] %vm2754_vm8, %v2669_v14  ;;  %v2927_v33 = vmul.f32 %v6497_v35, %v2810_v32  ;;  %v4544_v43 = vpop.eup %4543  ;;  %vm3000_vm15 = vcmp.gt.f32.partialorder %v6539_v54, 20.0 }
 0x431   : > { %v3122_v38 = vmul.f32 0.6931472, %v4544_v43 }
 0x432   : > { %4553 = vpow2.f32 %v3039_v39  ;;  %v6546_v44 = vadd.f32 %v6503_v60, %v2927_v33 }
 0x433   : > { %v2830_v8 = vpop.permute.xlu1 %2829  ;;  %v2679_v45 = vpop.permute.xlu0 %2678  ;;  %v3185_v59 = vsel %vm2993_vm10, %v6511_v49, %v3122_v38 }
 0x434   : > { %v4546_v12 = vpop.eup %4545  ;;  %v3035_v2 = vmul.f32 1.442695, %v6546_v44  ;;  %v2932_v42 = vmul.f32 %v6497_v35, %v2830_v8  ;;  %2765 = vst.msk [vmem:[#allocation5 + $0x50] sm:$0xff] %vm2754_vm8, %v2679_v45  ;;  %vm2998_vm9 = vcmp.gt.f32.partialorder %v6546_v44, 20.0 }
 0x435   : > { %v3095_v28 = vadd.f32 1.0, %v4546_v12  ;;  %v4548_v5 = vpop.eup %4547  ;;  %3217 = vst.msk [vmem:[#allocation2] sm:$0xff] %vm1301_vm7, %v3185_v59 }
 0x436   : > { %4555 = vpow2.f32 %v3035_v2  ;;  %v6556_v7 = vadd.f32 %v6503_v60, %v2932_v42  ;;  %v3124_v0 = vmul.f32 0.6931472, %v4548_v5 }
 0x437   : > { %4557 = vlog2.f32 %v3095_v28  ;;  %v2822_v58 = vpop.permute.xlu1 %2821  ;;  %v2675_v9 = vpop.permute.xlu0 %2674 }
 0x438   : > { %v4550_v52 = vpop.eup %4549  ;;  %v3045_v61 = vmul.f32 1.442695, %v6556_v7  ;;  %v2930_v56 = vmul.f32 %v6497_v35, %v2822_v58  ;;  %2763 = vst.msk [vmem:[#allocation5 + $0x40] sm:$0xff] %vm2754_vm8, %v2675_v9  ;;  %v3186_v3 = vsel %vm2994_vm11, %v6517_v53, %v3124_v0  ;;  %vm3003_vm10 = vcmp.gt.f32.partialorder %v6556_v7, 20.0 }
 0x439   : > { %v4552_v11 = vpop.eup %4551  ;;  %v3093_v13 = vadd.f32 1.0, %v4550_v52  ;;  %3218 = vst.msk [vmem:[#allocation2 + $0x8] sm:$0xff] %vm1301_vm7, %v3186_v3 }
 0x43a   : > { %v3128_v48 = vmul.f32 0.6931472, %v4552_v11  ;;  %4559 = vpow2.f32 %v3045_v61  ;;  %v6565_v49 = vadd.f32 %v6503_v60, %v2930_v56 }
 0x43b   : > { %4561 = vlog2.f32 %v3093_v13  ;;  %v2681_v29 = vpop.permute.xlu1 %2680  ;;  %v2834_v27 = vpop.permute.xlu0 %2833 }
 0x43c   : > { %v4554_v47 = vpop.eup %4553  ;;  %v3188_v62 = vsel %vm2996_vm12, %v6520_v25, %v3128_v48  ;;  %v3041_v57 = vmul.f32 1.442695, %v6565_v49  ;;  %2766 = vst.msk [vmem:[#allocation5 + $0x58] sm:$0xff] %vm2754_vm8, %v2681_v29  ;;  %v2933_v53 = vmul.f32 %v6497_v35, %v2834_v27  ;;  %vm3001_vm11 = vcmp.gt.f32.partialorder %v6565_v49, 20.0 }
 0x43d   : > { %3220 = vst.msk [vmem:[#allocation2 + $0x18] sm:$0xff] %vm1301_vm7, %v3188_v62  ;;  %v3096_v17 = vadd.f32 1.0, %v4554_v47 }
 0x43e   : > { %4563 = vpow2.f32 %v3041_v57  ;;  %v6575_v40 = vadd.f32 %v6503_v60, %v2933_v53 }
 0x43f   : > { %4565 = vlog2.f32 %v3096_v17  ;;  %v2677_v55 = vpop.permute.xlu1 %2676  ;;  %v2826_v4 = vpop.permute.xlu0 %2825 }
 0x440   : > { %v4556_v21 = vpop.eup %4555  ;;  %v3047_v36 = vmul.f32 1.442695, %v6575_v40  ;;  %2764 = vst.msk [vmem:[#allocation5 + $0x48] sm:$0xff] %vm2754_vm8, %v2677_v55  ;;  %v2931_v25 = vmul.f32 %v6497_v35, %v2826_v4  ;;  %vm3004_vm12 = vcmp.gt.f32.partialorder %v6575_v40, 20.0 }
 0x441   : > { %v4558_v10 = vpop.eup %4557  ;;  %v3094_v34 = vadd.f32 1.0, %v4556_v21 }
 0x442   : > { %v3134_v37 = vmul.f32 0.6931472, %v4558_v10  ;;  %4567 = vpow2.f32 %v3047_v36  ;;  %v6581_v18 = vadd.f32 %v6503_v60, %v2931_v25 }
 0x443   : > { %4569 = vlog2.f32 %v3094_v34  ;;  %v2846_v26 = vpop.permute.xlu1 %2845  ;;  %v2687_v46 = vpop.permute.xlu0 %2686 }
 0x444   : > { %v4560_v1 = vpop.eup %4559  ;;  %v3191_v41 = vsel %vm2999_vm13, %v6528_v16, %v3134_v37  ;;  %v3043_v20 = vmul.f32 1.442695, %v6581_v18  ;;  %v2936_v51 = vmul.f32 %v6497_v35, %v2846_v26  ;;  %2769 = vst.msk [vmem:[#allocation5 + $0x70] sm:$0xff] %vm2754_vm8, %v2687_v46  ;;  %vm3002_vm13 = vcmp.gt.f32.partialorder %v6581_v18, 20.0 }
 0x445   : > { %v4562_v22 = vpop.eup %4561  ;;  %3223 = vst.msk [vmem:[#allocation2 + $0x30] sm:$0xff] %vm1301_vm7, %v3191_v41  ;;  %v3099_v15 = vadd.f32 1.0, %v4560_v1 }
 0x446   : > { %v3130_v30 = vmul.f32 0.6931472, %v4562_v22  ;;  %4571 = vpow2.f32 %v3043_v20  ;;  %v6590_v63 = vadd.f32 %v6503_v60, %v2936_v51 }
 0x447   : > { %4573 = vlog2.f32 %v3099_v15  ;;  %v2838_v31 = vpop.permute.xlu1 %2837  ;;  %v2683_v16 = vpop.permute.xlu0 %2682 }
 0x448   : > { %v4564_v50 = vpop.eup %4563  ;;  %v3189_v23 = vsel %vm2997_vm14, %v6533_v19, %v3130_v30  ;;  %v3053_v24 = vmul.f32 1.442695, %v6590_v63  ;;  %v2934_v14 = vmul.f32 %v6497_v35, %v2838_v31  ;;  %2767 = vst.msk [vmem:[#allocation5 + $0x60] sm:$0xff] %vm2754_vm8, %v2683_v16  ;;  %vm3007_vm14 = vcmp.gt.f32.partialorder %v6590_v63, 20.0 }
 0x449   : > { %v4566_v32 = vpop.eup %4565  ;;  %3221 = vst.msk [vmem:[#allocation2 + $0x20] sm:$0xff] %vm1301_vm7, %v3189_v23  ;;  %v3097_v39 = vadd.f32 1.0, %v4564_v50 }
 0x44a   : > { %v3136_v33 = vmul.f32 0.6931472, %v4566_v32  ;;  %4575 = vpow2.f32 %v3053_v24  ;;  %v6599_v43 = vadd.f32 %v6503_v60, %v2934_v14 }
 0x44b   : > { %4577 = vlog2.f32 %v3097_v39  ;;  %v2689_v8 = vpop.permute.xlu1 %2688  ;;  %v2850_v19 = vpop.permute.xlu0 %2849 }
 0x44c   : > { %v4568_v45 = vpop.eup %4567  ;;  %v3192_v12 = vsel %vm3000_vm15, %v6539_v54, %v3136_v33  ;;  %v3049_v38 = vmul.f32 1.442695, %v6599_v43  ;;  %2770 = vst.msk [vmem:[#allocation5 + $0x78] sm:$0xff] %vm2754_vm8, %v2689_v8  ;;  %v2937_v2 = vmul.f32 %v6497_v35, %v2850_v19  ;;  %vm3005_vm15 = vcmp.gt.f32.partialorder %v6599_v43, 20.0 }
 0x44d   : > { %v4570_v42 = vpop.eup %4569  ;;  %3224 = vst.msk [vmem:[#allocation2 + $0x38] sm:$0xff] %vm1301_vm7, %v3192_v12  ;;  %v3100_v6 = vadd.f32 1.0, %v4568_v45 }
 0x44e   : > { %v3132_v28 = vmul.f32 0.6931472, %v4570_v42  ;;  %4579 = vpow2.f32 %v3049_v38  ;;  %v6608_v59 = vadd.f32 %v6503_v60, %v2937_v2 }
 0x44f   : > { %4581 = vlog2.f32 %v3100_v6  ;;  %v2685_v5 = vpop.permute.xlu1 %2684  ;;  %v2842_v54 = vpop.permute.xlu0 %2841 }
 0x450   : > { %v4572_v58 = vpop.eup %4571  ;;  %v3190_v9 = vsel %vm2998_vm9, %v6546_v44, %v3132_v28  ;;  %v3055_v52 = vmul.f32 1.442695, %v6608_v59  ;;  %2768 = vst.msk [vmem:[#allocation5 + $0x68] sm:$0xff] %vm2754_vm8, %v2685_v5  ;;  %v2935_v0 = vmul.f32 %v6497_v35, %v2842_v54  ;;  %vm3008_vm9 = vcmp.gt.f32.partialorder %v6608_v59, 20.0 }
 0x451   : > { %v4574_v61 = vpop.eup %4573  ;;  %3222 = vst.msk [vmem:[#allocation2 + $0x28] sm:$0xff] %vm1301_vm7, %v3190_v9  ;;  %v3098_v56 = vadd.f32 1.0, %v4572_v58 }
 0x452   : > { %v3142_v11 = vmul.f32 0.6931472, %v4574_v61  ;;  %4583 = vpow2.f32 %v3055_v52  ;;  %v6617_v13 = vadd.f32 %v6503_v60, %v2935_v0 }
 0x453   : > { %4585 = vlog2.f32 %v3098_v56  ;;  %v2862_v3 = vpop.permute.xlu1 %2861  ;;  %v2695_v44 = vpop.permute.xlu0 %2694 }
 0x454   : > { %v4576_v48 = vpop.eup %4575  ;;  %v3195_v29 = vsel %vm3003_vm10, %v6556_v7, %v3142_v11  ;;  %v3051_v27 = vmul.f32 1.442695, %v6617_v13  ;;  %v2940_v47 = vmul.f32 %v6497_v35, %v2862_v3  ;;  %2773 = vst.msk [vmem:[#allocation5 + $0x90] sm:$0xff] %vm2754_vm8, %v2695_v44  ;;  %vm3006_vm10 = vcmp.gt.f32.partialorder %v6617_v13, 20.0 }
 0x455   : > { %v4578_v62 = vpop.eup %4577  ;;  %3227 = vst.msk [vmem:[#allocation2 + $0x50] sm:$0xff] %vm1301_vm7, %v3195_v29  ;;  %v3103_v57 = vadd.f32 1.0, %v4576_v48 }
 0x456   : > { %v3138_v53 = vmul.f32 0.6931472, %v4578_v62  ;;  %4587 = vpow2.f32 %v3051_v27  ;;  %v6626_v17 = vadd.f32 %v6503_v60, %v2940_v47 }
 0x457   : > { %4589 = vlog2.f32 %v3103_v57  ;;  %v2854_v55 = vpop.permute.xlu1 %2853  ;;  %v2691_v7 = vpop.permute.xlu0 %2690 }
 0x458   : > { %v4580_v4 = vpop.eup %4579  ;;  %v3193_v21 = vsel %vm3001_vm11, %v6565_v49, %v3138_v53  ;;  %v3061_v36 = vmul.f32 1.442695, %v6626_v17  ;;  %v2938_v25 = vmul.f32 %v6497_v35, %v2854_v55  ;;  %2771 = vst.msk [vmem:[#allocation5 + $0x80] sm:$0xff] %vm2754_vm8, %v2691_v7  ;;  %vm3011_vm11 = vcmp.gt.f32.partialorder %v6626_v17, 20.0 }
 0x459   : > { %v4582_v10 = vpop.eup %4581  ;;  %3225 = vst.msk [vmem:[#allocation2 + $0x40] sm:$0xff] %vm1301_vm7, %v3193_v21  ;;  %v3101_v34 = vadd.f32 1.0, %v4580_v4 }
 0x45a   : > { %v3144_v37 = vmul.f32 0.6931472, %v4582_v10  ;;  %4591 = vpow2.f32 %v3061_v36  ;;  %v6635_v26 = vadd.f32 %v6503_v60, %v2938_v25 }
 0x45b   : > { %4593 = vlog2.f32 %v3101_v34  ;;  %v2697_v46 = vpop.permute.xlu1 %2696  ;;  %v2866_v49 = vpop.permute.xlu0 %2865 }
 0x45c   : > { %v4584_v1 = vpop.eup %4583  ;;  %v3196_v41 = vsel %vm3004_vm12, %v6575_v40, %v3144_v37  ;;  %v3057_v20 = vmul.f32 1.442695, %v6635_v26  ;;  %2774 = vst.msk [vmem:[#allocation5 + $0x98] sm:$0xff] %vm2754_vm8, %v2697_v46  ;;  %v2941_v51 = vmul.f32 %v6497_v35, %v2866_v49  ;;  %vm3009_vm12 = vcmp.gt.f32.partialorder %v6635_v26, 20.0 }
 0x45d   : > { %v4586_v22 = vpop.eup %4585  ;;  %3228 = vst.msk [vmem:[#allocation2 + $0x58] sm:$0xff] %vm1301_vm7, %v3196_v41  ;;  %v3104_v15 = vadd.f32 1.0, %v4584_v1 }
 0x45e   : > { %v3140_v30 = vmul.f32 0.6931472, %v4586_v22  ;;  %4595 = vpow2.f32 %v3057_v20  ;;  %v6644_v31 = vadd.f32 %v6503_v60, %v2941_v51 }
 0x45f   : > { %4597 = vlog2.f32 %v3104_v15  ;;  %v2693_v16 = vpop.permute.xlu1 %2692  ;;  %v2858_v40 = vpop.permute.xlu0 %2857 }
 0x460   : > { %v4588_v50 = vpop.eup %4587  ;;  %v3194_v23 = vsel %vm3002_vm13, %v6581_v18, %v3140_v30  ;;  %v3063_v24 = vmul.f32 1.442695, %v6644_v31  ;;  %2772 = vst.msk [vmem:[#allocation5 + $0x88] sm:$0xff] %vm2754_vm8, %v2693_v16  ;;  %v2939_v14 = vmul.f32 %v6497_v35, %v2858_v40  ;;  %vm3012_vm13 = vcmp.gt.f32.partialorder %v6644_v31, 20.0 }
 0x461   : > { %v4590_v32 = vpop.eup %4589  ;;  %3226 = vst.msk [vmem:[#allocation2 + $0x48] sm:$0xff] %vm1301_vm7, %v3194_v23  ;;  %v3102_v39 = vadd.f32 1.0, %v4588_v50 }
 0x462   : > { %v3150_v33 = vmul.f32 0.6931472, %v4590_v32  ;;  %4599 = vpow2.f32 %v3063_v24  ;;  %v6653_v8 = vadd.f32 %v6503_v60, %v2939_v14 }
 0x463   : > { %4601 = vlog2.f32 %v3102_v39  ;;  %v2878_v19 = vpop.permute.xlu1 %2877  ;;  %v2703_v18 = vpop.permute.xlu0 %2702 }
 0x464   : > { %v4592_v45 = vpop.eup %4591  ;;  %v3199_v12 = vsel %vm3007_vm14, %v6590_v63, %v3150_v33  ;;  %v3059_v38 = vmul.f32 1.442695, %v6653_v8  ;;  %v2944_v2 = vmul.f32 %v6497_v35, %v2878_v19  ;;  %2777 = vst.msk [vmem:[#allocation5 + $0xb0] sm:$0xff] %vm2754_vm8, %v2703_v18  ;;  %vm3010_vm14 = vcmp.gt.f32.partialorder %v6653_v8, 20.0 }
 0x465   : > { %v4594_v42 = vpop.eup %4593  ;;  %3231 = vst.msk [vmem:[#allocation2 + $0x70] sm:$0xff] %vm1301_vm7, %v3199_v12  ;;  %v3107_v6 = vadd.f32 1.0, %v4592_v45 }
 0x466   : > { %v3146_v28 = vmul.f32 0.6931472, %v4594_v42  ;;  %4603 = vpow2.f32 %v3059_v38  ;;  %v6662_v5 = vadd.f32 %v6503_v60, %v2944_v2 }
 0x467   : > { %4605 = vlog2.f32 %v3107_v6  ;;  %v2870_v54 = vpop.permute.xlu1 %2869  ;;  %v2699_v63 = vpop.permute.xlu0 %2698 }
 0x468   : > { %v4596_v58 = vpop.eup %4595  ;;  %v3197_v9 = vsel %vm3005_vm15, %v6599_v43, %v3146_v28  ;;  %v3069_v52 = vmul.f32 1.442695, %v6662_v5  ;;  %v2942_v0 = vmul.f32 %v6497_v35, %v2870_v54  ;;  %2775 = vst.msk [vmem:[#allocation5 + $0xa0] sm:$0xff] %vm2754_vm8, %v2699_v63  ;;  %vm3015_vm15 = vcmp.gt.f32.partialorder %v6662_v5, 20.0 }
 0x469   : > { %v4598_v61 = vpop.eup %4597  ;;  %3229 = vst.msk [vmem:[#allocation2 + $0x60] sm:$0xff] %vm1301_vm7, %v3197_v9  ;;  %v3105_v56 = vadd.f32 1.0, %v4596_v58 }
 0x46a   : > { %v3152_v11 = vmul.f32 0.6931472, %v4598_v61  ;;  %4607 = vpow2.f32 %v3069_v52  ;;  %v6671_v3 = vadd.f32 %v6503_v60, %v2942_v0 }
 0x46b   : > { %4609 = vlog2.f32 %v3105_v56  ;;  %v2705_v44 = vpop.permute.xlu1 %2704  ;;  %v2882_v43 = vpop.permute.xlu0 %2881 }
 0x46c   : > { %v4600_v48 = vpop.eup %4599  ;;  %v3200_v29 = vsel %vm3008_vm9, %v6608_v59, %v3152_v11  ;;  %v3065_v27 = vmul.f32 1.442695, %v6671_v3  ;;  %2778 = vst.msk [vmem:[#allocation5 + $0xb8] sm:$0xff] %vm2754_vm8, %v2705_v44  ;;  %v2945_v47 = vmul.f32 %v6497_v35, %v2882_v43  ;;  %vm3013_vm9 = vcmp.gt.f32.partialorder %v6671_v3, 20.0 }
 0x46d   : > { %v4602_v62 = vpop.eup %4601  ;;  %3232 = vst.msk [vmem:[#allocation2 + $0x78] sm:$0xff] %vm1301_vm7, %v3200_v29  ;;  %v3108_v57 = vadd.f32 1.0, %v4600_v48 }
 0x46e   : > { %v3148_v53 = vmul.f32 0.6931472, %v4602_v62  ;;  %4611 = vpow2.f32 %v3065_v27  ;;  %v6680_v55 = vadd.f32 %v6503_v60, %v2945_v47 }
 0x46f   : > { %4613 = vlog2.f32 %v3108_v57  ;;  %v2701_v7 = vpop.permute.xlu1 %2700  ;;  %v2874_v59 = vpop.permute.xlu0 %2873 }
 0x470   : > { %v4604_v4 = vpop.eup %4603  ;;  %v3198_v21 = vsel %vm3006_vm10, %v6617_v13, %v3148_v53  ;;  %v3071_v36 = vmul.f32 1.442695, %v6680_v55  ;;  %2776 = vst.msk [vmem:[#allocation5 + $0xa8] sm:$0xff] %vm2754_vm8, %v2701_v7  ;;  %v2943_v25 = vmul.f32 %v6497_v35, %v2874_v59  ;;  %vm3016_vm10 = vcmp.gt.f32.partialorder %v6680_v55, 20.0 }
 0x471   : > { %v4606_v10 = vpop.eup %4605  ;;  %3230 = vst.msk [vmem:[#allocation2 + $0x68] sm:$0xff] %vm1301_vm7, %v3198_v21  ;;  %v3106_v34 = vadd.f32 1.0, %v4604_v4 }
 0x472   : > { %v3158_v37 = vmul.f32 0.6931472, %v4606_v10  ;;  %4615 = vpow2.f32 %v3071_v36  ;;  %v6689_v46 = vadd.f32 %v6503_v60, %v2943_v25 }
 0x473   : > { %4617 = vlog2.f32 %v3106_v34  ;;  %v2894_v49 = vpop.permute.xlu1 %2893  ;;  %v2711_v13 = vpop.permute.xlu0 %2710 }
 0x474   : > { %v4608_v1 = vpop.eup %4607  ;;  %v3203_v41 = vsel %vm3011_vm11, %v6626_v17, %v3158_v37  ;;  %v3067_v20 = vmul.f32 1.442695, %v6689_v46  ;;  %v2948_v51 = vmul.f32 %v6497_v35, %v2894_v49  ;;  %2781 = vst.msk [vmem:[#allocation5 + $0xd0] sm:$0xff] %vm2754_vm8, %v2711_v13  ;;  %vm3014_vm11 = vcmp.gt.f32.partialorder %v6689_v46, 20.0 }
 0x475   : > { %v4610_v22 = vpop.eup %4609  ;;  %3235 = vst.msk [vmem:[#allocation2 + $0x90] sm:$0xff] %vm1301_vm7, %v3203_v41  ;;  %v3111_v15 = vadd.f32 1.0, %v4608_v1 }
 0x476   : > { %v3154_v30 = vmul.f32 0.6931472, %v4610_v22  ;;  %4619 = vpow2.f32 %v3067_v20  ;;  %v6698_v16 = vadd.f32 %v6503_v60, %v2948_v51 }
 0x477   : > { %4621 = vlog2.f32 %v3111_v15  ;;  %v2886_v40 = vpop.permute.xlu1 %2885  ;;  %v2707_v17 = vpop.permute.xlu0 %2706 }
 0x478   : > { %v4612_v50 = vpop.eup %4611  ;;  %v3201_v23 = vsel %vm3009_vm12, %v6635_v26, %v3154_v30  ;;  %v3077_v24 = vmul.f32 1.442695, %v6698_v16  ;;  %v2946_v14 = vmul.f32 %v6497_v35, %v2886_v40  ;;  %2779 = vst.msk [vmem:[#allocation5 + $0xc0] sm:$0xff] %vm2754_vm8, %v2707_v17  ;;  %vm3019_vm12 = vcmp.gt.f32.partialorder %v6698_v16, 20.0 }
 0x479   : > { %v4614_v32 = vpop.eup %4613  ;;  %3233 = vst.msk [vmem:[#allocation2 + $0x80] sm:$0xff] %vm1301_vm7, %v3201_v23  ;;  %v3109_v39 = vadd.f32 1.0, %v4612_v50 }
 0x47a   : > { %v3160_v33 = vmul.f32 0.6931472, %v4614_v32  ;;  %4623 = vpow2.f32 %v3077_v24  ;;  %v6707_v19 = vadd.f32 %v6503_v60, %v2946_v14 }
 0x47b   : > { %4625 = vlog2.f32 %v3109_v39  ;;  %v2713_v18 = vpop.permute.xlu1 %2712  ;;  %v2898_v26 = vpop.permute.xlu0 %2897 }
 0x47c   : > { %v4616_v45 = vpop.eup %4615  ;;  %v3204_v12 = vsel %vm3012_vm13, %v6644_v31, %v3160_v33  ;;  %v3073_v38 = vmul.f32 1.442695, %v6707_v19  ;;  %2782 = vst.msk [vmem:[#allocation5 + $0xd8] sm:$0xff] %vm2754_vm8, %v2713_v18  ;;  %v2949_v2 = vmul.f32 %v6497_v35, %v2898_v26  ;;  %vm3017_vm13 = vcmp.gt.f32.partialorder %v6707_v19, 20.0 }
 0x47d   : > { %v4618_v42 = vpop.eup %4617  ;;  %3236 = vst.msk [vmem:[#allocation2 + $0x98] sm:$0xff] %vm1301_vm7, %v3204_v12  ;;  %v3112_v6 = vadd.f32 1.0, %v4616_v45 }
 0x47e   : > { %v3156_v28 = vmul.f32 0.6931472, %v4618_v42  ;;  %4627 = vpow2.f32 %v3073_v38  ;;  %v6716_v54 = vadd.f32 %v6503_v60, %v2949_v2 }
 0x47f   : > { %4629 = vlog2.f32 %v3112_v6  ;;  %v2709_v63 = vpop.permute.xlu1 %2708  ;;  %v2890_v31 = vpop.permute.xlu0 %2889 }
 0x480   : > { %v4620_v58 = vpop.eup %4619  ;;  %v3202_v9 = vsel %vm3010_vm14, %v6653_v8, %v3156_v28  ;;  %v3079_v52 = vmul.f32 1.442695, %v6716_v54  ;;  %2780 = vst.msk [vmem:[#allocation5 + $0xc8] sm:$0xff] %vm2754_vm8, %v2709_v63  ;;  %v2947_v0 = vmul.f32 %v6497_v35, %v2890_v31  ;;  %vm3020_vm14 = vcmp.gt.f32.partialorder %v6716_v54, 20.0 }
 0x481   : > { %v4622_v61 = vpop.eup %4621  ;;  %3234 = vst.msk [vmem:[#allocation2 + $0x88] sm:$0xff] %vm1301_vm7, %v3202_v9  ;;  %v3110_v56 = vadd.f32 1.0, %v4620_v58 }
 0x482   : > { %v3166_v11 = vmul.f32 0.6931472, %v4622_v61  ;;  %4631 = vpow2.f32 %v3079_v52  ;;  %v6725_v44 = vadd.f32 %v6503_v60, %v2947_v0 }
 0x483   : > { %4633 = vlog2.f32 %v3110_v56  ;;  %v2902_v43 = vpop.permute.xlu1 %2901  ;;  %v2719_v8 = vpop.permute.xlu0 %2718 }
 0x484   : > { %v4624_v48 = vpop.eup %4623  ;;  %v3207_v29 = vsel %vm3015_vm15, %v6662_v5, %v3166_v11  ;;  %v3075_v27 = vmul.f32 1.442695, %v6725_v44  ;;  %v2950_v47 = vmul.f32 %v6497_v35, %v2902_v43  ;;  %2785 = vst.msk [vmem:[#allocation5 + $0xf0] sm:$0xff] %vm2754_vm8, %v2719_v8  ;;  %vm3018_vm15 = vcmp.gt.f32.partialorder %v6725_v44, 20.0 }
 0x485   : > { %v4626_v62 = vpop.eup %4625  ;;  %3239 = vst.msk [vmem:[#allocation2 + $0xb0] sm:$0xff] %vm1301_vm7, %v3207_v29  ;;  %v3115_v57 = vadd.f32 1.0, %v4624_v48 }
 0x486   : > { %v3162_v53 = vmul.f32 0.6931472, %v4626_v62  ;;  %4635 = vpow2.f32 %v3075_v27  ;;  %v6734_v7 = vadd.f32 %v6503_v60, %v2950_v47 }
 0x487   : > { %4637 = vlog2.f32 %v3115_v57  ;;  %v2721_v59 = vpop.permute.xlu1 %2720  ;;  %v2715_v5 = vpop.permute.xlu0 %2714 }
 0x488   : > { %v4628_v4 = vpop.eup %4627  ;;  %v3205_v21 = vsel %vm3013_vm9, %v6671_v3, %v3162_v53  ;;  %v3081_v36 = vmul.f32 1.442695, %v6734_v7  ;;  %2786 = vst.msk [vmem:[#allocation5 + $0xf8] sm:$0xff] %vm2754_vm8, %v2721_v59  ;;  %2783 = vst.msk [vmem:[#allocation5 + $0xe0] sm:$0xff] %vm2754_vm8, %v2715_v5  ;;  %vm3021_vm9 = vcmp.gt.f32.partialorder %v6734_v7, 20.0 }
 0x489   : > { %v4630_v25 = vpop.eup %4629  ;;  %3237 = vst.msk [vmem:[#allocation2 + $0xa0] sm:$0xff] %vm1301_vm7, %v3205_v21  ;;  %v3113_v10 = vadd.f32 1.0, %v4628_v4 }
 0x48a   : > { %v3168_v34 = vmul.f32 0.6931472, %v4630_v25  ;;  %4639 = vpow2.f32 %v3081_v36 }
 0x48b   : > { %4641 = vlog2.f32 %v3113_v10  ;;  %v2717_v37 = vpop.permute.xlu1 %2716  ;;  %v2906_v49 = vpop.permute.xlu0 %2905 }
 0x48c   : > { %v4632_v13 = vpop.eup %4631  ;;  %v3208_v3 = vsel %vm3016_vm10, %v6680_v55, %v3168_v34  ;;  %2784 = vst.msk [vmem:[#allocation5 + $0xe8] sm:$0xff] %vm2754_vm8, %v2717_v37  ;;  %v2951_v1 = vmul.f32 %v6497_v35, %v2906_v49 }
 0x48d   : > { %v4634_v41 = vpop.eup %4633  ;;  %3240 = vst.msk [vmem:[#allocation2 + $0xb8] sm:$0xff] %vm1301_vm7, %v3208_v3  ;;  %v3116_v20 = vadd.f32 1.0, %v4632_v13 }
 0x48e   : > { %v3164_v51 = vmul.f32 0.6931472, %v4634_v41  ;;  %v2990_v22 = vadd.f32 %v6503_v60, %v2951_v1 }
 0x48f   : > { %4643 = vlog2.f32 %v3116_v20  ;;  %v2910_v15 = vpop.permute.xlu1 %2909  ;;  %v2914_v30 = vpop.permute.xlu0 %2913 }
 0x490   : > { %v4636_v40 = vpop.eup %4635  ;;  %v3206_v17 = vsel %vm3014_vm11, %v6689_v46, %v3164_v51  ;;  %v3083_v55 = vmul.f32 1.442695, %v2990_v22  ;;  %v2952_v50 = vmul.f32 %v6497_v35, %v2910_v15  ;;  %v2953_v14 = vmul.f32 %v6497_v35, %v2914_v30 }
 0x491   : > { %v4638_v23 = vpop.eup %4637  ;;  %3238 = vst.msk [vmem:[#allocation2 + $0xa8] sm:$0xff] %vm1301_vm7, %v3206_v17  ;;  %v3114_v24 = vadd.f32 1.0, %v4636_v40  ;;  %vm3022_vm10 = vcmp.gt.f32.partialorder %v2990_v22, 20.0 }
 0x492   : > { %v3174_v32 = vmul.f32 0.6931472, %v4638_v23  ;;  %4645 = vpow2.f32 %v3083_v55  ;;  %v2991_v39 = vadd.f32 %v6503_v60, %v2952_v50  ;;  %v2992_v33 = vadd.f32 %v6503_v60, %v2953_v14 }
 0x493   : > { %4647 = vlog2.f32 %v3114_v24 }
 0x494   : > { %v4640_v18 = vpop.eup %4639  ;;  %v3211_v46 = vsel %vm3019_vm12, %v6698_v16, %v3174_v32  ;;  %v3085_v26 = vmul.f32 1.442695, %v2991_v39  ;;  %v3087_v38 = vmul.f32 1.442695, %v2992_v33  ;;  %vm3023_vm11 = vcmp.gt.f32.partialorder %v2991_v39, 20.0 }
 0x495   : > { %v4642_v45 = vpop.eup %4641  ;;  %3243 = vst.msk [vmem:[#allocation2 + $0xd0] sm:$0xff] %vm1301_vm7, %v3211_v46  ;;  %v3117_v12 = vadd.f32 1.0, %v4640_v18  ;;  %vm3024_vm12 = vcmp.gt.f32.partialorder %v2992_v33, 20.0 }
 0x496   : > { %v3170_v2 = vmul.f32 0.6931472, %v4642_v45  ;;  %4649 = vpow2.f32 %v3085_v26 }
 0x497   : > { %4651 = vlog2.f32 %v3117_v12 }
 0x498   : > { %v3209_v35 = vsel %vm3017_vm13, %v6707_v19, %v3170_v2  ;;  %4653 = vpow2.f32 %v3087_v38 }
 0x499   : > { %v4644_v42 = vpop.eup %4643  ;;  %3241 = vst.msk [vmem:[#allocation2 + $0xc0] sm:$0xff] %vm1301_vm7, %v3209_v35 }
 0x49a   : > { %v3176_v60 = vmul.f32 0.6931472, %v4644_v42 }
 0x49c   : > { %v4646_v16 = vpop.eup %4645  ;;  %v3212_v6 = vsel %vm3020_vm14, %v6716_v54, %v3176_v60 }
 0x49d   : > { %v4648_v28 = vpop.eup %4647  ;;  %3244 = vst.msk [vmem:[#allocation2 + $0xd8] sm:$0xff] %vm1301_vm7, %v3212_v6  ;;  %v3118_v63 = vadd.f32 1.0, %v4646_v16 }
 0x49e   : > { %v3172_v31 = vmul.f32 0.6931472, %v4648_v28 }
 0x49f   : > { %4655 = vlog2.f32 %v3118_v63 }
 0x4a0   : > { %v4650_v58 = vpop.eup %4649  ;;  %v3210_v19 = vsel %vm3018_vm15, %v6725_v44, %v3172_v31 }
 0x4a1   : > { %v4652_v9 = vpop.eup %4651  ;;  %3242 = vst.msk [vmem:[#allocation2 + $0xc8] sm:$0xff] %vm1301_vm7, %v3210_v19  ;;  %v3119_v52 = vadd.f32 1.0, %v4650_v58 }
 0x4a2   : > { %v4654_v0 = vpop.eup %4653  ;;  %v3178_v61 = vmul.f32 0.6931472, %v4652_v9 }
 0x4a3   : > { %4657 = vlog2.f32 %v3119_v52  ;;  %v3120_v54 = vadd.f32 1.0, %v4654_v0 }
 0x4a4   : > { %v3213_v56 = vsel %vm3021_vm9, %v6734_v7, %v3178_v61 }
 0x4a5   : > { %3245 = vst.msk [vmem:[#allocation2 + $0xe0] sm:$0xff] %vm1301_vm7, %v3213_v56  ;;  %4659 = vlog2.f32 %v3120_v54 }
 0x4a9   : > { %v4656_v11 = vpop.eup %4655 }
 0x4aa   : > { %v3180_v43 = vmul.f32 0.6931472, %v4656_v11 }
 0x4ac   : > { %v3214_v8 = vsel %vm3022_vm10, %v2990_v22, %v3180_v43 }
 0x4ad   : > { %v4658_v44 = vpop.eup %4657  ;;  %3246 = vst.msk [vmem:[#allocation2 + $0xe8] sm:$0xff] %vm1301_vm7, %v3214_v8 }
 0x4ae   : > { %v3182_v48 = vmul.f32 0.6931472, %v4658_v44 }
 0x4af   : > { %v4660_v29 = vpop.eup %4659 }
 0x4b0   : > { %v3215_v27 = vsel %vm3023_vm11, %v2991_v39, %v3182_v48  ;;  %v3184_v47 = vmul.f32 0.6931472, %v4660_v29 }
 0x4b1   : > { %3247 = vst.msk [vmem:[#allocation2 + $0xf0] sm:$0xff] %vm1301_vm7, %v3215_v27 }
 0x4b2   : > { %v3216_v62 = vsel %vm3024_vm12, %v2992_v33, %v3184_v47 }
 0x4b3   : > { %3248 = vst.msk [vmem:[#allocation2 + $0xf8] sm:$0xff] %vm1301_vm7, %v3216_v62 }
 0x4b4 LB: >> { %v7350_v57 = vlaneseq  ;;  %v7351_v7 = vld [vmem:[#allocation7_spill] sm:$0xff]  ;;  %s6781_s17 = sshll.u32 %s4712_s16, 3  ;;  %v4718_v4 = vmov 0.0   ;;  %v7352_v25 = vld [vmem:[#allocation8_spill] sm:$0xff]  ;;  %v7354_v49 = vld [vmem:[#allocation9_spill] sm:$0xff]  ;;  %vm3701_vm10 = vcmask 1040384   ;;  %s4712_s16 = sphi %s6773_s16, %s3256_s16  }
 0x4b5   : >> { %v3272_v59 = vadd.s32 8, %v7351_v7  ;;  %s3267_s18 = scalar_lea.vmem [#allocation5], %s6781_s17  ;;  %v7353_v34 = vld [vmem:[#allocation11_spill] sm:$0xff]  ;;  %v7355_v15 = vld [vmem:[#allocation10_spill] sm:$0xff]  ;;  %v6814_v40 = vsub.s32 4, %v7351_v7  ;;  %v6827_v14 = vsub.s32 5, %v7351_v7 }
 0x4b6   : >> { %v3276_v53 = vand.u32 127, %v7350_v57  ;;  %v6785_v5 = vld [vmem:[%s3267_s18] sm:$0xff]  ;;  %v6840_v26 = vsub.s32 6, %v7351_v7  ;;  %v3274_v35 = vadd.s32 24, %v7351_v7  ;;  %v3273_v42 = vadd.s32 16, %v7351_v7  ;;  %s3261_s19 = scalar_lea.vmem [#allocation2], %s6781_s17 }
 0x4b7   : >> { %v6793_v10 = vrot.slane %v6785_v5, %v7352_v25  ;;  %v3294_v37 = vrot.slane %v6785_v5, %v7353_v34  ;;  %v6799_v13 = vrot.slane %v6785_v5, %v7354_v49  ;;  %v6811_v30 = vrot.slane %v6785_v5, %v7355_v15  ;;  %s3263_s25 = scalar_lea.vmem [#allocation3], %s6781_s17  ;;  %s3265_s26 = scalar_lea.vmem [#allocation4], %s6781_s17 }
 0x4b8   : >> { %vm3277_vm13 = vcmp.eq.s32.totalorder %v7351_v7, %v3276_v53  ;;  %vm3278_vm14 = vcmp.eq.s32.totalorder %v3272_v59, %v3276_v53  ;;  %v6824_v24 = vrot.slane %v6785_v5, %v6814_v40  ;;  %v6837_v46 = vrot.slane %v6785_v5, %v6827_v14  ;;  %s3256_s16 = sadd.s32 1, %s4712_s16  }
 0x4b9   : >> { %v6787_v21 = vsel %vm3277_vm13, 1.0, %v4718_v4  ;;  %v6789_v36 = vsel %vm3278_vm14, 1.0, %v4718_v4  ;;  %v3600_v63 = vrot.slane %v6785_v5, %v6840_v26  ;;  %vm3280_vm15 = vcmp.eq.s32.totalorder %v3274_v35, %v3276_v53  ;;  %p3253_p4 = scmp.ge.s32.totalorder %s3256_s16, 32  }
 0x4ba   : >> { %v3346_v3 = vmul.f32 %v6787_v21, %v6793_v10  ;;  %v3295_v1 = vmul.f32 %v6787_v21, %v3294_v37  ;;  %v3347_v41 = vmul.f32 %v6789_v36, %v6793_v10  ;;  %v3296_v20 = vmul.f32 %v6789_v36, %v3294_v37 }
 0x4bb   : >> { %v3398_v50 = vmul.f32 %v6789_v36, %v6799_v13  ;;  %v3397_v23 = vmul.f32 %v6787_v21, %v6799_v13  ;;  %v3449_v33 = vmul.f32 %v6789_v36, %v6811_v30  ;;  %v3448_v18 = vmul.f32 %v6787_v21, %v6811_v30 }
 0x4bc   : >> { %v3350_v51 = vsel %vm2754_vm8, %v3346_v3, 0.0  ;;  %v3299_v22 = vsel %vm2754_vm8, %v3295_v1, 0.0  ;;  %v3353_v17 = vsel %vm2754_vm8, %v3347_v41, 0.0  ;;  %v3302_v55 = vsel %vm2754_vm8, %v3296_v20, 0.0 }
 0x4bd   : >> { %3351 = vadd.xlane.f32.xlu1 %v3350_v51  ;;  %3300 = vadd.xlane.f32.xlu0 %v3299_v22  ;;  %v3404_v32 = vsel %vm2754_vm8, %v3398_v50, 0.0  ;;  %v3401_v39 = vsel %vm2754_vm8, %v3397_v23, 0.0  ;;  %v3455_v45 = vsel %vm2754_vm8, %v3449_v33, 0.0  ;;  %v3452_v12 = vsel %vm2754_vm8, %v3448_v18, 0.0 }
 0x4be   : >> { %v3500_v38 = vmul.f32 %v6789_v36, %v6824_v24  ;;  %v3499_v2 = vmul.f32 %v6787_v21, %v6824_v24  ;;  %v3551_v60 = vmul.f32 %v6789_v36, %v6837_v46  ;;  %v3550_v28 = vmul.f32 %v6787_v21, %v6837_v46 }
 0x4bf   : >> { %vm3279_vm9 = vcmp.eq.s32.totalorder %v3273_v42, %v3276_v53  ;;  %v3602_v19 = vmul.f32 %v6789_v36, %v3600_v63  ;;  %v3601_v9 = vmul.f32 %v6787_v21, %v3600_v63  ;;  %v4137_v52 = vsel %vm3280_vm15, 1.0, %v4718_v4  ;;  %v6910_v42 = vld [vmem:[%s7143_s9 + $0x8] sm:$0xff] }
 0x4c0   : >> { %v3506_v16 = vsel %vm2754_vm8, %v3500_v38, 0.0  ;;  %v3503_v6 = vsel %vm2754_vm8, %v3499_v2, 0.0  ;;  %v3557_v31 = vsel %vm2754_vm8, %v3551_v60, 0.0  ;;  %v3554_v58 = vsel %vm2754_vm8, %v3550_v28, 0.0  ;;  %v6904_v2 = vld [vmem:[%s7143_s9] sm:$0xff] }
 0x4c1   : >> { %3354 = vadd.xlane.f32.xlu1 %v3353_v17  ;;  %3303 = vadd.xlane.f32.xlu0 %v3302_v55  ;;  %v4136_v0 = vsel %vm3279_vm9, 1.0, %v4718_v4  ;;  %v3608_v61 = vsel %vm2754_vm8, %v3602_v19, 0.0  ;;  %v3605_v54 = vsel %vm2754_vm8, %v3601_v9, 0.0  ;;  %v3298_v56 = vmul.f32 %v4137_v52, %v3294_v37 }
 0x4c2   : >> { %v3297_v11 = vmul.f32 %v4136_v0, %v3294_v37  ;;  %v3349_v44 = vmul.f32 %v4137_v52, %v6793_v10  ;;  %v3348_v48 = vmul.f32 %v4136_v0, %v6793_v10  ;;  %v6869_v29 = vsub.s32 7, %v7351_v7 }
 0x4c3   : >> { %v3308_v43 = vsel %vm2754_vm8, %v3298_v56, 0.0  ;;  %v3400_v62 = vmul.f32 %v4137_v52, %v6799_v13  ;;  %v3399_v57 = vmul.f32 %v4136_v0, %v6799_v13  ;;  %v3451_v53 = vmul.f32 %v4137_v52, %v6811_v30 }
 0x4c4   : >> { %v3305_v8 = vsel %vm2754_vm8, %v3297_v11, 0.0  ;;  %v3359_v27 = vsel %vm2754_vm8, %v3349_v44, 0.0  ;;  %v3356_v47 = vsel %vm2754_vm8, %v3348_v48, 0.0  ;;  %v3450_v10 = vmul.f32 %v4136_v0, %v6811_v30 }
 0x4c5   : >> { %3405 = vadd.xlane.f32.xlu1 %v3404_v32  ;;  %3402 = vadd.xlane.f32.xlu0 %v3401_v39  ;;  %v3410_v59 = vsel %vm2754_vm8, %v3400_v62, 0.0  ;;  %v3407_v4 = vsel %vm2754_vm8, %v3399_v57, 0.0  ;;  %v3651_v37 = vrot.slane %v6785_v5, %v6869_v29  ;;  %v3461_v3 = vsel %vm2754_vm8, %v3451_v53, 0.0  ;;  %v3289_v62 = vld [vmem:[#allocation6] sm:$0xff] }
 0x4c6   : >> { %v3458_v1 = vsel %vm2754_vm8, %v3450_v10, 0.0  ;;  %v3502_v22 = vmul.f32 %v4137_v52, %v6824_v24  ;;  %v3501_v5 = vmul.f32 %v4136_v0, %v6824_v24  ;;  %v3604_v23 = vmul.f32 %v4137_v52, %v3600_v63 }
 0x4c7   : >> { %v3653_v13 = vmul.f32 %v6789_v36, %v3651_v37  ;;  %v3652_v41 = vmul.f32 %v6787_v21, %v3651_v37  ;;  %v3553_v36 = vmul.f32 %v4137_v52, %v6837_v46  ;;  %v3552_v21 = vmul.f32 %v4136_v0, %v6837_v46 }
 0x4c8   : >> { %v3512_v30 = vsel %vm2754_vm8, %v3502_v22, 0.0  ;;  %v3509_v17 = vsel %vm2754_vm8, %v3501_v5, 0.0  ;;  %v3603_v32 = vmul.f32 %v4136_v0, %v3600_v63  ;;  %v3614_v24 = vsel %vm2754_vm8, %v3604_v23, 0.0 }
 0x4c9   : >> { %3456 = vadd.xlane.f32.xlu1 %v3455_v45  ;;  %3453 = vadd.xlane.f32.xlu0 %v3452_v12  ;;  %v3659_v20 = vsel %vm2754_vm8, %v3653_v13, 0.0  ;;  %v3656_v51 = vsel %vm2754_vm8, %v3652_v41, 0.0  ;;  %v3563_v55 = vsel %vm2754_vm8, %v3553_v36, 0.0  ;;  %v3560_v50 = vsel %vm2754_vm8, %v3552_v21, 0.0  ;;  %v3262_v12 = vld [vmem:[%s3261_s19] sm:$0xff] }
 0x4ca   : >> { %v3611_v39 = vsel %vm2754_vm8, %v3603_v32, 0.0  ;;  %v3655_v33 = vmul.f32 %v4137_v52, %v3651_v37  ;;  %v3654_v18 = vmul.f32 %v4136_v0, %v3651_v37  ;;  %v3314_v38 = vrot.slane %v3262_v12, %v7353_v34  ;;  %v6920_v0 = vld [vmem:[%s3263_s25] sm:$0xff] }
 0x4cb   : >> { %v3365_v60 = vrot.slane %v3262_v12, %v7352_v25  ;;  %v3416_v63 = vrot.slane %v3262_v12, %v7354_v49  ;;  %v3467_v52 = vrot.slane %v3262_v12, %v7355_v15  ;;  %v3518_v56 = vrot.slane %v3262_v12, %v6814_v40 }
 0x4cc   : >> { %v3665_v46 = vsel %vm2754_vm8, %v3655_v33, 0.0  ;;  %v3662_v45 = vsel %vm2754_vm8, %v3654_v18, 0.0  ;;  %v3315_v35 = vmul.f32 %v3314_v38, %v6904_v2  ;;  %v3671_v23 = vrot.slane %v3262_v12, %v6869_v29 }
 0x4cd   : >> { %3507 = vadd.xlane.f32.xlu1 %v3506_v16  ;;  %3504 = vadd.xlane.f32.xlu0 %v3503_v6  ;;  %v3316_v16 = vmul.f32 %v3314_v38, %v6910_v42  ;;  %v3366_v28 = vmul.f32 %v3365_v60, %v6904_v2  ;;  %v3417_v9 = vmul.f32 %v3416_v63, %v6904_v2 }
 0x4ce   : >> { %v3317_v6 = vmul.f32 1.442695, %v3315_v35  ;;  %v3469_v48 = vmul.f32 %v3467_v52, %v6910_v42  ;;  %v3519_v53 = vmul.f32 %v3518_v56, %v6904_v2  ;;  %v3520_v37 = vmul.f32 %v3518_v56, %v6910_v42 }
 0x4cf   : >> { %v3368_v19 = vmul.f32 1.442695, %v3366_v28  ;;  %v3419_v11 = vmul.f32 1.442695, %v3417_v9  ;;  %v3672_v9 = vmul.f32 %v3671_v23, %v6904_v2 }
 0x4d0   : >> { %4662 = vpow2.f32 %v3317_v6  ;;  %v3472_v10 = vmul.f32 1.442695, %v3469_v48 }
 0x4d1   : >> { %3558 = vadd.xlane.f32.xlu1 %v3557_v31  ;;  %3555 = vadd.xlane.f32.xlu0 %v3554_v58  ;;  %v3319_v31 = vmul.f32 1.442695, %v3316_v16  ;;  %v3367_v58 = vmul.f32 %v3365_v60, %v6910_v42 }
 0x4d3   : >> { %4664 = vpow2.f32 %v3319_v31 }
 0x4d4   : >> { %4666 = vpow2.f32 %v3368_v19 }
 0x4d5   : >> { %3609 = vadd.xlane.f32.xlu1 %v3608_v61  ;;  %3606 = vadd.xlane.f32.xlu0 %v3605_v54  ;;  %v3370_v61 = vmul.f32 1.442695, %v3367_v58  ;;  %v3418_v54 = vmul.f32 %v3416_v63, %v6910_v42 }
 0x4d7   : >> { %4668 = vpow2.f32 %v3370_v61  ;;  %v3421_v44 = vmul.f32 1.442695, %v3418_v54 }
 0x4d8   : >> { %4670 = vpow2.f32 %v3419_v11 }
 0x4d9   : >> { %3309 = vadd.xlane.f32.xlu1 %v3308_v43  ;;  %3306 = vadd.xlane.f32.xlu0 %v3305_v8  ;;  %v3468_v43 = vmul.f32 %v3467_v52, %v6904_v2  ;;  %v6926_v8 = vmul.f32 %v6920_v0, %v3262_v12  ;;  %4672 = vpow2.f32 %v3421_v44 }
 0x4db   : >> { %v3470_v57 = vmul.f32 1.442695, %v3468_v43  ;;  %v3377_v5 = vrot.slane %v6926_v8, %v7352_v25  ;;  %v3428_v38 = vrot.slane %v6926_v8, %v7354_v49  ;;  %v3479_v58 = vrot.slane %v6926_v8, %v7355_v15 }
 0x4dd   : >> { %3360 = vadd.xlane.f32.xlu1 %v3359_v27  ;;  %3357 = vadd.xlane.f32.xlu0 %v3356_v47  ;;  %v4663_v27 = vpop.eup %4662  ;;  %v3569_v47 = vrot.slane %v3262_v12, %v6827_v14  ;;  %4674 = vpow2.f32 %v3470_v57  ;;  %v3530_v57 = vrot.slane %v6926_v8, %v6814_v40  ;;  %v3581_v40 = vrot.slane %v6926_v8, %v6827_v14 }
 0x4de   : >> { %4676 = vpow2.f32 %v3472_v10 }
 0x4df   : >> { %v3570_v22 = vmul.f32 %v3569_v47, %v6904_v2  ;;  %v3571_v36 = vmul.f32 %v3569_v47, %v6910_v42 }
 0x4e1   : >> { %3411 = vadd.xlane.f32.xlu1 %v3410_v59  ;;  %3408 = vadd.xlane.f32.xlu0 %v3407_v4  ;;  %v3326_v59 = vrot.slane %v6926_v8, %v7353_v34  ;;  %v3321_v4 = vmul.f32 %v4663_v27, %v3289_v62  ;;  %v3574_v16 = vmul.f32 1.442695, %v3571_v36 }
 0x4e5   : >> { %3462 = vadd.xlane.f32.xlu1 %v3461_v3  ;;  %3459 = vadd.xlane.f32.xlu0 %v3458_v1  ;;  %v4665_v3 = vpop.eup %4664  ;;  %v3620_v1 = vrot.slane %v3262_v12, %v6840_v26 }
 0x4e7   : >> { %v3621_v33 = vmul.f32 %v3620_v1, %v6904_v2  ;;  %v3622_v12 = vmul.f32 %v3620_v1, %v6910_v42  ;;  %v3673_v2 = vmul.f32 %v3671_v23, %v6910_v42 }
 0x4e9   : >> { %3660 = vadd.xlane.f32.xlu1 %v3659_v20  ;;  %3657 = vadd.xlane.f32.xlu0 %v3656_v51  ;;  %v3290_v20 = vld [vmem:[#allocation6 + $0x8] sm:$0xff]  ;;  %v3521_v51 = vmul.f32 1.442695, %v3519_v53  ;;  %v3623_v19 = vmul.f32 1.442695, %v3621_v33 }
 0x4ea   : >> { %v3322_v21 = vmul.f32 %v4665_v3, %v3290_v20  ;;  %v3625_v27 = vmul.f32 1.442695, %v3622_v12  ;;  %v3674_v53 = vmul.f32 1.442695, %v3672_v9 }
 0x4eb   : >> { %4678 = vpow2.f32 %v3521_v51 }
 0x4ed   : >> { %3513 = vadd.xlane.f32.xlu1 %v3512_v30  ;;  %3510 = vadd.xlane.f32.xlu0 %v3509_v17  ;;  %v4667_v17 = vpop.eup %4666 }
 0x4ee   : >> { %v4669_v18 = vpop.eup %4668 }
 0x4ef   : >> { %v4671_v60 = vpop.eup %4670 }
 0x4f0   : >> { %v4673_v52 = vpop.eup %4672 }
 0x4f1   : >> { %3564 = vadd.xlane.f32.xlu1 %v3563_v55  ;;  %3561 = vadd.xlane.f32.xlu0 %v3560_v50  ;;  %v3523_v50 = vmul.f32 1.442695, %v3520_v37  ;;  %v4675_v43 = vpop.eup %4674 }
 0x4f3   : >> { %4680 = vpow2.f32 %v3523_v50 }
 0x4f5   : >> { %3615 = vadd.xlane.f32.xlu1 %v3614_v24  ;;  %3612 = vadd.xlane.f32.xlu0 %v3611_v39  ;;  %v3572_v39 = vmul.f32 1.442695, %v3570_v22  ;;  %v3676_v22 = vmul.f32 1.442695, %v3673_v2 }
 0x4f7   : >> { %4682 = vpow2.f32 %v3572_v39  ;;  %v3632_v39 = vrot.slane %v6926_v8, %v6840_v26 }
 0x4f8   : >> { %4684 = vpow2.f32 %v3574_v16 }
 0x4f9   : >> { %3666 = vadd.xlane.f32.xlu1 %v3665_v46  ;;  %3663 = vadd.xlane.f32.xlu0 %v3662_v45  ;;  %4686 = vpow2.f32 %v3623_v19 }
 0x4fa   : >> { %4688 = vpow2.f32 %v3625_v27 }
 0x4fb   : >> { %4690 = vpow2.f32 %v3674_v53 }
 0x4fc   : >> { %4692 = vpow2.f32 %v3676_v22 }
 0x54a   : >> { %v3352_v13 = vpop.xlane.xlu1 %3351  ;;  %v3301_v41 = vpop.xlane.xlu0 %3300 }
 0x54b   : >> { %v3327_v30 = vmul.f32 %v3326_v59, %v3301_v41  ;;  %v3378_v46 = vmul.f32 %v3377_v5, %v3352_v13 }
 0x54d   : >> { %v6939_v55 = vadd.f32 %v3327_v30, %v3321_v4 }
 0x54e   : >> { %v3355_v32 = vpop.xlane.xlu1 %3354  ;;  %v3304_v24 = vpop.xlane.xlu0 %3303 }
 0x54f   : >> { %v3328_v45 = vmul.f32 %v3326_v59, %v3304_v24  ;;  %v3372_v35 = vmul.f32 %v4667_v17, %v6939_v55  ;;  %v3379_v61 = vmul.f32 %v3377_v5, %v3355_v32  ;;  %v4677_v59 = vpop.eup %4676 }
 0x550   : >> { %v4679_v1 = vpop.eup %4678 }
 0x551   : >> { %v6946_v6 = vadd.f32 %v3328_v45, %v3322_v21  ;;  %v6948_v28 = vadd.f32 %v3378_v46, %v3372_v35  ;;  %v4681_v42 = vpop.eup %4680 }
 0x552   : >> { %v3406_v63 = vpop.xlane.xlu1 %3405  ;;  %v3403_v31 = vpop.xlane.xlu0 %3402 }
 0x553   : >> { %v3429_v54 = vmul.f32 %v3428_v38, %v3403_v31  ;;  %v3373_v56 = vmul.f32 %v4669_v18, %v6946_v6  ;;  %v3423_v11 = vmul.f32 %v4671_v60, %v6948_v28  ;;  %v3430_v4 = vmul.f32 %v3428_v38, %v3406_v63  ;;  %v4683_v21 = vpop.eup %4682 }
 0x554   : >> { %v4685_v33 = vpop.eup %4684 }
 0x555   : >> { %v6956_v44 = vadd.f32 %v3379_v61, %v3373_v56  ;;  %v6958_v48 = vadd.f32 %v3429_v54, %v3423_v11  ;;  %v4687_v38 = vpop.eup %4686 }
 0x556   : >> { %v3457_v47 = vpop.xlane.xlu1 %3456  ;;  %v3454_v62 = vpop.xlane.xlu0 %3453 }
 0x557   : >> { %v3480_v10 = vmul.f32 %v3479_v58, %v3454_v62  ;;  %v3424_v37 = vmul.f32 %v4673_v52, %v6956_v44  ;;  %v3474_v3 = vmul.f32 %v4675_v43, %v6958_v48  ;;  %v3481_v5 = vmul.f32 %v3479_v58, %v3457_v47  ;;  %v4689_v63 = vpop.eup %4688 }
 0x558   : >> { %v4691_v9 = vpop.eup %4690 }
 0x559   : >> { %v3432_v13 = vadd.f32 %v3430_v4, %v3424_v37  ;;  %v6965_v41 = vadd.f32 %v3480_v10, %v3474_v3  ;;  %v4693_v47 = vpop.eup %4692  ;;  %v6997_v3 = vld [vmem:[%s3265_s26] sm:$0xff] }
 0x55a   : >> { %v3508_v20 = vpop.xlane.xlu1 %3507  ;;  %v3505_v51 = vpop.xlane.xlu0 %3504 }
 0x55b   : >> { %v3531_v30 = vmul.f32 %v3530_v57, %v3505_v51  ;;  %v3475_v17 = vmul.f32 %v4677_v59, %v3432_v13  ;;  %v3525_v36 = vmul.f32 %v4679_v1, %v6965_v41  ;;  %v3532_v14 = vmul.f32 %v3530_v57, %v3508_v20 }
 0x55d   : >> { %v3483_v50 = vadd.f32 %v3481_v5, %v3475_v17  ;;  %v6970_v23 = vadd.f32 %v3531_v30, %v3525_v36 }
 0x55e   : >> { %v3559_v32 = vpop.xlane.xlu1 %3558  ;;  %v3556_v24 = vpop.xlane.xlu0 %3555 }
 0x55f   : >> { %v3582_v18 = vmul.f32 %v3581_v40, %v3556_v24  ;;  %v3526_v46 = vmul.f32 %v4681_v42, %v3483_v50  ;;  %v3576_v45 = vmul.f32 %v4683_v21, %v6970_v23  ;;  %v3583_v31 = vmul.f32 %v3581_v40, %v3559_v32 }
 0x561   : >> { %v6975_v35 = vadd.f32 %v3532_v14, %v3526_v46  ;;  %v6977_v60 = vadd.f32 %v3582_v18, %v3576_v45  ;;  %v3683_v14 = vrot.slane %v6926_v8, %v6869_v29 }
 0x562   : >> { %v3610_v16 = vpop.xlane.xlu1 %3609  ;;  %v3607_v12 = vpop.xlane.xlu0 %3606 }
 0x563   : >> { %v3633_v58 = vmul.f32 %v3632_v39, %v3607_v12  ;;  %v3577_v19 = vmul.f32 %v4685_v33, %v6975_v35  ;;  %v3627_v26 = vmul.f32 %v4687_v38, %v6977_v60  ;;  %v3634_v11 = vmul.f32 %v3632_v39, %v3610_v16 }
 0x565   : >> { %v6981_v52 = vadd.f32 %v3583_v31, %v3577_v19  ;;  %v6983_v61 = vadd.f32 %v3633_v58, %v3627_v26 }
 0x566   : >> { %v3310_v54 = vpop.xlane.xlu1 %3309  ;;  %v3307_v56 = vpop.xlane.xlu0 %3306 }
 0x567   : >> { %v3628_v43 = vmul.f32 %v4689_v63, %v6981_v52  ;;  %v3678_v27 = vmul.f32 %v4691_v9, %v6983_v61  ;;  %v3332_v57 = vmul.f32 %v6946_v6, %v3310_v54  ;;  %v3331_v2 = vmul.f32 %v6939_v55, %v3307_v56 }
 0x569   : >> { %v6987_v62 = vadd.f32 %v3634_v11, %v3628_v43  ;;  %v3334_v6 = vsel %vm1301_vm7, %v3332_v57, 0.0  ;;  %v3333_v55 = vsel %vm1301_vm7, %v3331_v2, 0.0 }
 0x56a   : >> { %v3361_v53 = vpop.xlane.xlu1 %3360  ;;  %v3358_v59 = vpop.xlane.xlu0 %3357  ;;  %v3335_v5 = vadd.f32 %v3334_v6, %v3333_v55 }
 0x56b   : >> { %v3383_v4 = vmul.f32 %v6956_v44, %v3361_v53  ;;  %v3382_v10 = vmul.f32 %v6948_v28, %v3358_v59  ;;  %v3679_v37 = vmul.f32 %v4693_v47, %v6987_v62  ;;  %v3717_v44 = vsub.f32 0.0, %v6997_v3 }
 0x56d   : >> { %v3385_v1 = vsel %vm1301_vm7, %v3383_v4, 0.0  ;;  %v3384_v20 = vsel %vm1301_vm7, %v3382_v10, 0.0  ;;  %v3718_v24 = vmul.f32 1.442695, %v3717_v44 }
 0x56e   : >> { %v3412_v51 = vpop.xlane.xlu1 %3411  ;;  %v3409_v40 = vpop.xlane.xlu0 %3408  ;;  %v3386_v42 = vadd.f32 %v3385_v1, %v3384_v20 }
 0x56f   : >> { %v3434_v22 = vmul.f32 %v3432_v13, %v3412_v51  ;;  %v3433_v28 = vmul.f32 %v6958_v48, %v3409_v40  ;;  %v3336_v13 = vrot.slane %v3335_v5, 4  ;;  %4694 = vpow2.f32 %v3718_v24 }
 0x570   : >> { %v3387_v18 = vrot.slane %v3386_v42, 4 }
 0x571   : >> { %v3436_v30 = vsel %vm1301_vm7, %v3434_v22, 0.0  ;;  %v3435_v17 = vsel %vm1301_vm7, %v3433_v28, 0.0  ;;  %v3337_v19 = vadd.f32 %v3336_v13, %v3335_v5 }
 0x572   : >> { %v3437_v36 = vadd.f32 %v3436_v30, %v3435_v17  ;;  %v3463_v21 = vpop.xlane.xlu1 %3462  ;;  %v3460_v32 = vpop.xlane.xlu0 %3459  ;;  %v3388_v58 = vadd.f32 %v3387_v18, %v3386_v42 }
 0x573   : >> { %v3485_v39 = vmul.f32 %v3483_v50, %v3463_v21  ;;  %v3484_v33 = vmul.f32 %v6965_v41, %v3460_v32  ;;  %v3338_v47 = vrot.slane %v3337_v19, 2 }
 0x574   : >> { %v3438_v46 = vrot.slane %v3437_v36, 4  ;;  %v3389_v43 = vrot.slane %v3388_v58, 2 }
 0x575   : >> { %v3487_v48 = vsel %vm1301_vm7, %v3485_v39, 0.0  ;;  %v3486_v45 = vsel %vm1301_vm7, %v3484_v33, 0.0  ;;  %v3339_v6 = vadd.f32 %v3338_v47, %v3337_v19 }
 0x576   : >> { %v3488_v38 = vadd.f32 %v3487_v48, %v3486_v45  ;;  %v3661_v16 = vpop.xlane.xlu1 %3660  ;;  %v3658_v12 = vpop.xlane.xlu0 %3657  ;;  %v3439_v41 = vadd.f32 %v3438_v46, %v3437_v36  ;;  %v3390_v1 = vadd.f32 %v3389_v43, %v3388_v58 }
 0x577   : >> { %v3685_v63 = vmul.f32 %v3683_v14, %v3661_v16  ;;  %v3684_v31 = vmul.f32 %v3683_v14, %v3658_v12  ;;  %v3340_v32 = vrot.slane %v3339_v6, 1 }
 0x578   : >> { %v3489_v50 = vrot.slane %v3488_v38, 4  ;;  %v3440_v57 = vrot.slane %v3439_v41, 2 }
 0x579   : >> { %v3687_v26 = vadd.f32 %v3685_v63, %v3679_v37  ;;  %v3686_v9 = vadd.f32 %v3684_v31, %v3678_v27  ;;  %v3341_v31 = vadd.f32 %v3340_v32, %v3339_v6 }
 0x57a   : >> { %v3490_v29 = vadd.f32 %v3489_v50, %v3488_v38  ;;  %v3514_v8 = vpop.xlane.xlu1 %3513  ;;  %v3511_v54 = vpop.xlane.xlu0 %3510  ;;  %v3441_v55 = vadd.f32 %v3440_v57, %v3439_v41 }
 0x57b   : >> { %v3536_v56 = vmul.f32 %v6975_v35, %v3514_v8  ;;  %v3535_v11 = vmul.f32 %v6970_v23, %v3511_v54  ;;  %3700 = vst.msk [vmem:[#allocation6 + $0x8] sm:$0xff] %vm1301_vm7, %v3687_v26  ;;  %3699 = vst.msk [vmem:[#allocation6] sm:$0xff] %vm1301_vm7, %v3686_v9  ;;  %v4695_v23 = vpop.eup %4694 }
 0x57c   : >> { %v3491_v59 = vrot.slane %v3490_v29, 2  ;;  %v3720_v17 = vadd.f32 1.0, %v4695_v23  ;;  %v3442_v24 = vrot.slane %v3441_v55, 1 }
 0x57d   : >> { %v3538_v2 = vsel %vm1301_vm7, %v3536_v56, 0.0  ;;  %v3537_v53 = vsel %vm1301_vm7, %v3535_v11, 0.0 }
 0x57e   : >> { %v3539_v27 = vadd.f32 %v3538_v2, %v3537_v53  ;;  %v3565_v4 = vpop.xlane.xlu1 %3564  ;;  %v3562_v10 = vpop.xlane.xlu0 %3561  ;;  %v3492_v44 = vadd.f32 %v3491_v59, %v3490_v29  ;;  %4696 = vrcp.f32 %v3720_v17  ;;  %v3443_v58 = vadd.f32 %v3442_v24, %v3441_v55 }
 0x57f   : >> { %v3587_v37 = vmul.f32 %v6981_v52, %v3565_v4  ;;  %v3586_v35 = vmul.f32 %v6977_v60, %v3562_v10  ;;  %v3391_v60 = vrot.slane %v3390_v1, 1 }
 0x580   : >> { %v3540_v20 = vrot.slane %v3539_v27, 4  ;;  %v3493_v14 = vrot.slane %v3492_v44, 1 }
 0x581   : >> { %v3589_v51 = vsel %vm1301_vm7, %v3587_v37, 0.0  ;;  %v3588_v40 = vsel %vm1301_vm7, %v3586_v35, 0.0 }
 0x582   : >> { %v3541_v22 = vadd.f32 %v3540_v20, %v3539_v27  ;;  %v3590_v28 = vadd.f32 %v3589_v51, %v3588_v40  ;;  %v3616_v42 = vpop.xlane.xlu1 %3615  ;;  %v3613_v5 = vpop.xlane.xlu0 %3612  ;;  %v3494_v41 = vadd.f32 %v3493_v14, %v3492_v44 }
 0x583   : >> { %v3638_v30 = vmul.f32 %v6987_v62, %v3616_v42  ;;  %v3637_v52 = vmul.f32 %v6983_v61, %v3613_v5  ;;  %v3392_v61 = vadd.f32 %v3391_v60, %v3390_v1  ;;  %v4138_v1 = vld [vmem:[%s7144_s10] ss:$0 sm:$0xff] }
 0x584   : >> { %v3542_v36 = vrot.slane %v3541_v22, 2  ;;  %v3591_v21 = vrot.slane %v3590_v28, 4  ;;  %v3715_v51 = vmul.f32 %v4138_v1, %v6920_v0  ;;  %v3774_v0 = vld [vmem:[%s7145_s11] sm:$0xf] (%p3253_p4) }
 0x585   : >> { %v3640_v39 = vsel %vm1301_vm7, %v3638_v30, 0.0  ;;  %v3639_v33 = vsel %vm1301_vm7, %v3637_v52, 0.0  ;;  %v3702_v11 = vsel %vm3701_vm10, %v3341_v31, %v3392_v61  ;;  %4317 = vmatprep.subr.msk.bf16.mxu0 (%p3253_p4), %vm2461_vm2, %v3774_v0 }
 0x586   : >> { %v3543_v18 = vadd.f32 %v3542_v36, %v3541_v22  ;;  %v3592_v13 = vadd.f32 %v3591_v21, %v3590_v28  ;;  %v3641_v46 = vadd.f32 %v3640_v39, %v3639_v33  ;;  %v3667_v48 = vpop.xlane.xlu1 %3666  ;;  %v3664_v45 = vpop.xlane.xlu0 %3663  ;;  %v3703_v47 = vsel %vm1008_vm1, %v3702_v11, %v3443_v58 }
 0x587   : >> { %v3689_v62 = vmul.f32 %v3687_v26, %v3667_v48  ;;  %v3688_v38 = vmul.f32 %v3686_v9, %v3664_v45  ;;  %v3704_v57 = vsel %vm1335_vm3, %v3703_v47, %v3494_v41 }
 0x588   : >> { %v3544_v16 = vrot.slane %v3543_v18, 1  ;;  %v3593_v12 = vrot.slane %v3592_v13, 2  ;;  %v3642_v63 = vrot.slane %v3641_v46, 4  ;;  %v4697_v35 = vpop.eup %4696 }
 0x589   : >> { %v3691_v50 = vsel %vm1301_vm7, %v3689_v62, 0.0  ;;  %v3690_v19 = vsel %vm1301_vm7, %v3688_v38, 0.0  ;;  %v3723_v44 = vmul.f32 %v4697_v35, %v6997_v3  ;;  %v3824_v3 = vsel (%p3253_p4), %vm2461_vm2, %v3774_v0, 0 }
 0x58a   : >> { %v3594_v29 = vadd.f32 %v3593_v12, %v3592_v13  ;;  %v3643_v8 = vadd.f32 %v3642_v63, %v3641_v46  ;;  %v3692_v54 = vadd.f32 %v3691_v50, %v3690_v19  ;;  %v3545_v56 = vadd.f32 %v3544_v16, %v3543_v18  ;;  %4279 = vmatpush3.bf16.msra.mxu0 (%p3253_p4), %v3824_v3 }
 0x58c   : >> { %v3595_v26 = vrot.slane %v3594_v29, 1  ;;  %v3644_v9 = vrot.slane %v3643_v8, 2  ;;  %v3693_v43 = vrot.slane %v3692_v54, 4  ;;  %v3705_v27 = vsel %vm2461_vm2, %v3704_v57, %v3545_v56 }
 0x58e   : >> { %v3596_v2 = vadd.f32 %v3595_v26, %v3594_v29  ;;  %v3645_v53 = vadd.f32 %v3644_v9, %v3643_v8  ;;  %v3694_v59 = vadd.f32 %v3693_v43, %v3692_v54 }
 0x590   : >> { %v3706_v4 = vsel %vm1971_vm6, %v3705_v27, %v3596_v2  ;;  %v3646_v10 = vrot.slane %v3645_v53, 1  ;;  %v3695_v37 = vrot.slane %v3694_v59, 2 }
 0x592   : >> { %v3647_v23 = vadd.f32 %v3646_v10, %v3645_v53  ;;  %v3696_v20 = vadd.f32 %v3695_v37, %v3694_v59 }
 0x594   : >> { %v3707_v6 = vsel %vm1771_vm5, %v3706_v4, %v3647_v23  ;;  %v3697_v55 = vrot.slane %v3696_v20, 1 }
 0x596   : >> { %v3698_v40 = vadd.f32 %v3697_v55, %v3696_v20 }
 0x597   : > { %3255 = sbr.rel (!%p3253_p4) target bundleno = 1204 (0x4b4), region = 109 }
 0x598   : >> { %v3708_v22 = vsel %vm1571_vm4, %v3707_v6, %v3698_v40 }
 0x599   : >> { %v3716_v28 = vadd.f32 %v3715_v51, %v3708_v22 }
 0x59b   : >> { %v3724_v42 = vmul.f32 %v3723_v44, %v3716_v28 }
 0x59d   : >> { %3725 = vst.msk [vmem:[%s3265_s26] sm:$0xff] %vm1301_vm7, %v3724_v42 }
 0x5a4   : > { %v3726_v5 = vld [vmem:[#allocation4] sm:$0xff]  ;;  %v3727_v30 = vld [vmem:[#allocation4 + $0x8] sm:$0xff]  ;;  %v3728_v17 = vld [vmem:[#allocation4 + $0x10] sm:$0xff] }
 0x5a5   : > { %v3758_v52 = vpack.c.bf16 %v3727_v30, %v3726_v5  ;;  %v3729_v60 = vld [vmem:[#allocation4 + $0x18] sm:$0xff]  ;;  %v3730_v36 = vld [vmem:[#allocation4 + $0x20] sm:$0xff]  ;;  %v3731_v32 = vld [vmem:[#allocation4 + $0x28] sm:$0xff] }
 0x5a6   : > { %v3759_v21 = vpack.c.bf16 %v3729_v60, %v3728_v17  ;;  %v3760_v24 = vpack.c.bf16 %v3731_v32, %v3730_v36  ;;  %v3732_v7 = vld [vmem:[#allocation4 + $0x30] sm:$0xff]  ;;  %v3733_v25 = vld [vmem:[#allocation4 + $0x38] sm:$0xff]  ;;  %v3734_v34 = vld [vmem:[#allocation4 + $0x40] sm:$0xff] }
 0x5a7   : > { %4280 = vmatprep.mubr.msk.bf16.mxu0 %vm1301_vm7, %v3758_v52  ;;  %v3735_v49 = vld [vmem:[#allocation4 + $0x48] sm:$0xff]  ;;  %v3761_v15 = vpack.c.bf16 %v3733_v25, %v3732_v7  ;;  %v3736_v33 = vld [vmem:[#allocation4 + $0x50] sm:$0xff]  ;;  %v3737_v14 = vld [vmem:[#allocation4 + $0x58] sm:$0xff] }
 0x5a8   : > { %4281 = vmatmul.mubr.msk.bf16.vlgmr.msra.gmra.mrb[16].mxu0 %vm1301_vm7, %v3759_v21  ;;  %v3762_v39 = vpack.c.bf16 %v3735_v49, %v3734_v34  ;;  %v3738_v18 = vld [vmem:[#allocation4 + $0x60] sm:$0xff]  ;;  %v3739_v13 = vld [vmem:[#allocation4 + $0x68] sm:$0xff]  ;;  %v3763_v46 = vpack.c.bf16 %v3737_v14, %v3736_v33  ;;  %v3740_v45 = vld [vmem:[#allocation4 + $0x70] sm:$0xff] }
 0x5a9   : > { %4284 = vmatprep.mubr.msk.bf16.mxu0 %vm1301_vm7, %v3760_v24  ;;  %v3764_v48 = vpack.c.bf16 %v3739_v13, %v3738_v18  ;;  %v3741_v62 = vld [vmem:[#allocation4 + $0x78] sm:$0xff]  ;;  %v3742_v38 = vld [vmem:[#allocation4 + $0x80] sm:$0xff]  ;;  %v3743_v61 = vld [vmem:[#allocation4 + $0x88] sm:$0xff] }
 0x5aa   : > { %v3765_v16 = vpack.c.bf16 %v3741_v62, %v3740_v45  ;;  %v3766_v12 = vpack.c.bf16 %v3743_v61, %v3742_v38  ;;  %v3744_v63 = vld [vmem:[#allocation4 + $0x90] sm:$0xff]  ;;  %v3745_v31 = vld [vmem:[#allocation4 + $0x98] sm:$0xff]  ;;  %v3746_v58 = vld [vmem:[#allocation4 + $0xa0] sm:$0xff] }
 0x5ab   : > { %v3747_v50 = vld [vmem:[#allocation4 + $0xa8] sm:$0xff]  ;;  %v3767_v19 = vpack.c.bf16 %v3745_v31, %v3744_v63  ;;  %v3748_v29 = vld [vmem:[#allocation4 + $0xb0] sm:$0xff]  ;;  %v3749_v8 = vld [vmem:[#allocation4 + $0xb8] sm:$0xff] }
 0x5ac   : > { %v3768_v41 = vpack.c.bf16 %v3747_v50, %v3746_v58  ;;  %v3750_v54 = vld [vmem:[#allocation4 + $0xc0] sm:$0xff]  ;;  %v3751_v56 = vld [vmem:[#allocation4 + $0xc8] sm:$0xff]  ;;  %v3769_v11 = vpack.c.bf16 %v3749_v8, %v3748_v29  ;;  %v3752_v9 = vld [vmem:[#allocation4 + $0xd0] sm:$0xff] }
 0x5ad   : > { %v3770_v26 = vpack.c.bf16 %v3751_v56, %v3750_v54  ;;  %v3753_v43 = vld [vmem:[#allocation4 + $0xd8] sm:$0xff]  ;;  %v3754_v47 = vld [vmem:[#allocation4 + $0xe0] sm:$0xff]  ;;  %v3755_v57 = vld [vmem:[#allocation4 + $0xe8] sm:$0xff] }
 0x5ae   : > { %v3771_v2 = vpack.c.bf16 %v3753_v43, %v3752_v9  ;;  %v3772_v53 = vpack.c.bf16 %v3755_v57, %v3754_v47  ;;  %v3756_v59 = vld [vmem:[#allocation4 + $0xf0] sm:$0xff]  ;;  %v3757_v27 = vld [vmem:[#allocation4 + $0xf8] sm:$0xff] }
 0x5af   : > { %v3773_v4 = vpack.c.bf16 %v3757_v27, %v3756_v59 }
 0x5b0   : > { %4285 = vmatmul.mubr.msk.bf16.gmra.mrb[20].mxu0 %vm1301_vm7, %v3761_v15 }
 0x5b1   : > { %4288 = vmatprep.mubr.msk.bf16.mxu0 %vm1301_vm7, %v3762_v39 }
 0x5b8   : > { %4289 = vmatmul.mubr.msk.bf16.gmra.mrb[24].mxu0 %vm1301_vm7, %v3763_v46 }
 0x5b9   : > { %4292 = vmatprep.mubr.msk.bf16.mxu0 %vm1301_vm7, %v3764_v48 }
 0x5c0   : > { %4293 = vmatmul.mubr.msk.bf16.gmra.mrb[28].mxu0 %vm1301_vm7, %v3765_v16 }
 0x5c1   : > { %4296 = vmatprep.mubr.msk.bf16.mxu0 %vm1301_vm7, %v3766_v12 }
 0x5c8   : > { %4297 = vmatmul.mubr.msk.bf16.gmra.mrb[32].mxu0 %vm1301_vm7, %v3767_v19 }
 0x5c9   : > { %4300 = vmatprep.mubr.msk.bf16.mxu0 %vm1301_vm7, %v3768_v41 }
 0x5d0   : > { %4301 = vmatmul.mubr.msk.bf16.gmra.mrb[36].mxu0 %vm1301_vm7, %v3769_v11 }
 0x5d1   : > { %4304 = vmatprep.mubr.msk.bf16.mxu0 %vm1301_vm7, %v3770_v26 }
 0x5d8   : > { %4305 = vmatmul.mubr.msk.bf16.gmra.mrb[40].mxu0 %vm1301_vm7, %v3771_v2 }
 0x5d9   : > { %4308 = vmatprep.mubr.msk.bf16.mxu0 %vm1301_vm7, %v3772_v53 }
 0x5e0   : > { %4309 = vmatmul.mubr.msk.bf16.gmra.mrb[44].mxu0 %vm1301_vm7, %v3773_v4 }
 0x67b   : > { %v4282_v10 = vpop.f32.mrb[16].mxu0 }
 0x67c   : > { %3989 = vst.msk [vmem:[%s4800_s29 + $0x10] sm:$0xff] %vm447_vm0, %v4282_v10  ;;  %v3860_v37 = vpop.f32.mrb[17].mxu0 }
 0x67d   : > { %3987 = vst.msk [vmem:[%s4800_s29] sm:$0xff] %vm447_vm0, %v3860_v37  ;;  %v4283_v35 = vpop.f32.mrb[18].mxu0 }
 0x67e   : > { %3990 = vst.msk [vmem:[%s4800_s29 + $0x18] sm:$0xff] %vm447_vm0, %v4283_v35  ;;  %v3863_v23 = vpop.f32.mrb[19].mxu0 }
 0x67f   : > { %3988 = vst.msk [vmem:[%s4800_s29 + $0x8] sm:$0xff] %vm447_vm0, %v3863_v23 }
 0x683   : > { %v4286_v1 = vpop.f32.mrb[20].mxu0 }
 0x684   : > { %3993 = vst.msk [vmem:[%s4800_s29 + $0x30] sm:$0xff] %vm447_vm0, %v4286_v1  ;;  %v3876_v20 = vpop.f32.mrb[21].mxu0 }
 0x685   : > { %3991 = vst.msk [vmem:[%s4800_s29 + $0x20] sm:$0xff] %vm447_vm0, %v3876_v20  ;;  %v4287_v6 = vpop.f32.mrb[22].mxu0 }
 0x686   : > { %3994 = vst.msk [vmem:[%s4800_s29 + $0x38] sm:$0xff] %vm447_vm0, %v4287_v6  ;;  %v3879_v55 = vpop.f32.mrb[23].mxu0 }
 0x687   : > { %3992 = vst.msk [vmem:[%s4800_s29 + $0x28] sm:$0xff] %vm447_vm0, %v3879_v55 }
 0x68b   : > { %v4290_v51 = vpop.f32.mrb[24].mxu0 }
 0x68c   : > { %3997 = vst.msk [vmem:[%s4800_s29 + $0x50] sm:$0xff] %vm447_vm0, %v4290_v51  ;;  %v3892_v40 = vpop.f32.mrb[25].mxu0 }
 0x68d   : > { %3995 = vst.msk [vmem:[%s4800_s29 + $0x40] sm:$0xff] %vm447_vm0, %v3892_v40  ;;  %v4291_v44 = vpop.f32.mrb[26].mxu0 }
 0x68e   : > { %3998 = vst.msk [vmem:[%s4800_s29 + $0x58] sm:$0xff] %vm447_vm0, %v4291_v44  ;;  %v3895_v22 = vpop.f32.mrb[27].mxu0 }
 0x68f   : > { %3996 = vst.msk [vmem:[%s4800_s29 + $0x48] sm:$0xff] %vm447_vm0, %v3895_v22 }
 0x693   : > { %v4294_v28 = vpop.f32.mrb[28].mxu0 }
 0x694   : > { %4001 = vst.msk [vmem:[%s4800_s29 + $0x70] sm:$0xff] %vm447_vm0, %v4294_v28  ;;  %v3908_v42 = vpop.f32.mrb[29].mxu0 }
 0x695   : > { %3999 = vst.msk [vmem:[%s4800_s29 + $0x60] sm:$0xff] %vm447_vm0, %v3908_v42  ;;  %v4295_v0 = vpop.f32.mrb[30].mxu0 }
 0x696   : > { %4002 = vst.msk [vmem:[%s4800_s29 + $0x78] sm:$0xff] %vm447_vm0, %v4295_v0  ;;  %v3911_v5 = vpop.f32.mrb[31].mxu0 }
 0x697   : > { %4000 = vst.msk [vmem:[%s4800_s29 + $0x68] sm:$0xff] %vm447_vm0, %v3911_v5 }
 0x69b   : > { %v4298_v30 = vpop.f32.mrb[32].mxu0 }
 0x69c   : > { %4005 = vst.msk [vmem:[%s4800_s29 + $0x90] sm:$0xff] %vm447_vm0, %v4298_v30  ;;  %v3924_v3 = vpop.f32.mrb[33].mxu0 }
 0x69d   : > { %4003 = vst.msk [vmem:[%s4800_s29 + $0x80] sm:$0xff] %vm447_vm0, %v3924_v3  ;;  %v4299_v52 = vpop.f32.mrb[34].mxu0 }
 0x69e   : > { %4006 = vst.msk [vmem:[%s4800_s29 + $0x98] sm:$0xff] %vm447_vm0, %v4299_v52  ;;  %v3927_v17 = vpop.f32.mrb[35].mxu0 }
 0x69f   : > { %4004 = vst.msk [vmem:[%s4800_s29 + $0x88] sm:$0xff] %vm447_vm0, %v3927_v17 }
 0x6a3   : > { %v4302_v60 = vpop.f32.mrb[36].mxu0 }
 0x6a4   : > { %4009 = vst.msk [vmem:[%s4800_s29 + $0xb0] sm:$0xff] %vm447_vm0, %v4302_v60  ;;  %v3940_v36 = vpop.f32.mrb[37].mxu0 }
 0x6a5   : > { %4007 = vst.msk [vmem:[%s4800_s29 + $0xa0] sm:$0xff] %vm447_vm0, %v3940_v36  ;;  %v4303_v21 = vpop.f32.mrb[38].mxu0 }
 0x6a6   : > { %4010 = vst.msk [vmem:[%s4800_s29 + $0xb8] sm:$0xff] %vm447_vm0, %v4303_v21  ;;  %v3943_v32 = vpop.f32.mrb[39].mxu0 }
 0x6a7   : > { %4008 = vst.msk [vmem:[%s4800_s29 + $0xa8] sm:$0xff] %vm447_vm0, %v3943_v32 }
 0x6ab   : > { %v4306_v24 = vpop.f32.mrb[40].mxu0 }
 0x6ac   : > { %4013 = vst.msk [vmem:[%s4800_s29 + $0xd0] sm:$0xff] %vm447_vm0, %v4306_v24  ;;  %v3956_v7 = vpop.f32.mrb[41].mxu0 }
 0x6ad   : > { %4011 = vst.msk [vmem:[%s4800_s29 + $0xc0] sm:$0xff] %vm447_vm0, %v3956_v7  ;;  %v4307_v25 = vpop.f32.mrb[42].mxu0 }
 0x6ae   : > { %4014 = vst.msk [vmem:[%s4800_s29 + $0xd8] sm:$0xff] %vm447_vm0, %v4307_v25  ;;  %v3959_v34 = vpop.f32.mrb[43].mxu0 }
 0x6af   : > { %4012 = vst.msk [vmem:[%s4800_s29 + $0xc8] sm:$0xff] %vm447_vm0, %v3959_v34 }
 0x6b3   : > { %v4310_v49 = vpop.f32.mrb[44].mxu0 }
 0x6b4   : > { %4017 = vst.msk [vmem:[%s4800_s29 + $0xf0] sm:$0xff] %vm447_vm0, %v4310_v49  ;;  %v3972_v15 = vpop.f32.mrb[45].mxu0 }
 0x6b5   : > { %4015 = vst.msk [vmem:[%s4800_s29 + $0xe0] sm:$0xff] %vm447_vm0, %v3972_v15  ;;  %v4311_v39 = vpop.f32.mrb[46].mxu0 }
 0x6b6   : > { %4018 = vst.msk [vmem:[%s4800_s29 + $0xf8] sm:$0xff] %vm447_vm0, %v4311_v39  ;;  %v3975_v33 = vpop.f32.mrb[47].mxu0 }
 0x6b7   : > { %4016 = vst.msk [vmem:[%s4800_s29 + $0xe8] sm:$0xff] %vm447_vm0, %v3975_v33 }
 0x6b8 PF: > { %s22_s21 = sadd.s32 1, %s4708_s21  }
 0x6b9   : > { %p19_p5 = scmp.ge.s32.totalorder %s22_s21, 4  }
 0x6bb   :  { %21 = sbr.rel (!%p19_p5) target bundleno = 1 (0x1), region = 120 }

</bundles_post_ra>
